<compile_context>
chip_gen: v6e
topology: v6e:2x2x1
jax: 0.10.0
libtpu: 0.0.40
codegen_flags: <defaults>
</compile_context>

<pallas_src>
import functools
import math

import jax
import jax.numpy as jnp
from jax import lax
from jax.experimental import pallas as pl
from jax.experimental.pallas import tpu as pltpu


def _layernorm_f32(x, gamma, beta, eps=1e-5):
    # PyTorch nn.LayerNorm: biased variance, eps inside the sqrt.
    mean = jnp.mean(x, axis=-1, keepdims=True)
    var = jnp.mean((x - mean) ** 2, axis=-1, keepdims=True)
    return (x - mean) * lax.rsqrt(var + eps) * gamma + beta


def encoder_kernel(
    x_ref,
    wqkv_ref, bqkv_ref, wo_ref, bo_ref, g_att_ref, b_att_ref,
    w1_ref, b1_ref, w2_ref, b2_ref, g_ffn_ref, b_ffn_ref,
    out_ref,
    qkv_ref, ctx_ref, attn_ref, attn_bf_ref, acc_ref,
    *, num_head):
    k_step = pl.program_id(1)
    n_steps = pl.num_programs(1)
    Bb, S, D = x_ref.shape
    dh = D // num_head
    R = Bb * S

    # ------------- attention + first LayerNorm (once per batch block) -------
    @pl.when(k_step == 0)
    def _attention_phase():
        x = x_ref[...].reshape(R, D).astype(jnp.float32)      # f32 residual

        # Fused QKV projection: one wide bf16 MXU matmul, f32 accumulation.
        # The 1/sqrt(dh) scale is already folded into Wq / bq on the host.
        qkv = jnp.dot(x.astype(jnp.bfloat16), wqkv_ref[...],
                      preferred_element_type=jnp.float32) + bqkv_ref[...]
        qkv_ref[...] = qkv.astype(jnp.bfloat16)                # bf16 staging

        # Per-row, per-head attention; heads are ref-sliced at static offsets
        # (static loops: Bb and H are small; stores bound live ranges).
        for b in range(Bb):
            r0 = b * S
            for h in range(num_head):
                lo = h * dh
                qh = qkv_ref[r0:r0 + S, lo:lo + dh]                  # bf16
                kh = qkv_ref[r0:r0 + S, D + lo:D + lo + dh]          # bf16
                vh = qkv_ref[r0:r0 + S, 2 * D + lo:2 * D + lo + dh]  # bf16

                # scores = qh @ kh^T, no explicit transpose.
                s = lax.dot_general(qh, kh, (((1,), (1,)), ((), ())),
                                    preferred_element_type=jnp.float32)
                m = jnp.max(s, axis=-1, keepdims=True)
                p = jnp.exp(s - m)                                   # (S, S)
                inv = pl.reciprocal(jnp.sum(p, axis=-1, keepdims=True),
                                    approx=True)                     # (S, 1)
                ctx_h = jnp.dot(p.astype(jnp.bfloat16), vh,
                                preferred_element_type=jnp.float32)
                # normalize the small (S, dh) context, not the (S, S) probs
                ctx_ref[r0:r0 + S, lo:lo + dh] = (ctx_h * inv).astype(
                    jnp.bfloat16)

        att = jnp.dot(ctx_ref[...], wo_ref[...],
                      preferred_element_type=jnp.float32) + bo_ref[...]
        y = _layernorm_f32(x + att, g_att_ref[...], b_att_ref[...])
        attn_ref[...] = y                                    # f32 (residual)
        attn_bf_ref[...] = y.astype(jnp.bfloat16)            # bf16 (FFN input)
        acc_ref[...] = jnp.zeros_like(acc_ref)

    # ------------- FFN: accumulate one d_ff chunk per grid step -------------
    h1 = jnp.dot(attn_bf_ref[...], w1_ref[...],
                 preferred_element_type=jnp.float32) + b1_ref[...]
    h1 = jnp.maximum(h1, 0.0)                                # ReLU
    acc_ref[...] += jnp.dot(h1.astype(jnp.bfloat16), w2_ref[...],
                            preferred_element_type=jnp.float32)

    # ------------- finalize: +b2, residual, second LayerNorm ----------------
    @pl.when(k_step == n_steps - 1)
    def _finalize():
        ffn = acc_ref[...] + b2_ref[...]
        y = attn_ref[...]
        res = _layernorm_f32(y + ffn, g_ffn_ref[...], b_ffn_ref[...])
        out_ref[...] = res.reshape(Bb, S, D).astype(out_ref.dtype)


def _largest_divisor_leq(n, cap):
    for d in range(min(n, max(cap, 1)), 0, -1):
        if n % d == 0:
            return d
    return 1


def transformer_encoder(x, params, num_head, *, ff_chunk=512, batch_block=None,
                        vmem_limit_bytes=40 * 1024 * 1024):
    B, S, D = x.shape
    d_ff = params["w1"].shape[1]
    assert D % num_head == 0
    dh = D // num_head
    scale = 1.0 / math.sqrt(dh)

    f32, bf16 = jnp.float32, jnp.bfloat16

    # ---- host-side weight packing (fold scale into Wq, fuse QKV, bf16) -----
    wq = params["wq"].astype(f32) * scale
    bq = params["bq"].astype(f32) * scale
    wqkv = jnp.concatenate([wq, params["wk"], params["wv"]], axis=1).astype(bf16)
    bqkv = jnp.concatenate([bq, params["bk"], params["bv"]], axis=1).astype(f32)
    wo = params["wo"].astype(bf16)
    w1 = params["w1"].astype(bf16)
    w2 = params["w2"].astype(bf16)
    bo = params["bo"].astype(f32)
    b1 = params["b1"].astype(f32)
    b2 = params["b2"].astype(f32)
    g_att, be_att = params["g_att"].astype(f32), params["be_att"].astype(f32)
    g_ffn, be_ffn = params["g_ffn"].astype(f32), params["be_ffn"].astype(f32)

    # d_ff chunking (reduction axis of the grid, placed last).
    if d_ff <= ff_chunk:
        tk = d_ff
    else:
        tk = ff_chunk
        assert d_ff % tk == 0 and tk % 128 == 0, "ff_chunk must tile d_ff"
    n_ff = d_ff // tk

    # Amortize w1/w2 streaming over several batch rows per grid step.
    if batch_block is None:
        batch_block = _largest_divisor_leq(B, max(1, 1024 // max(S, 1)))
    assert B % batch_block == 0
    Bb = batch_block
    R = Bb * S

    args = (x, wqkv, bqkv, wo, bo, g_att, be_att,
            w1, b1, w2, b2, g_ffn, be_ffn)

    def build(single_buffer_consts):
        def const_spec(shape):
            nd = len(shape)
            idx = lambda bi, k, _nd=nd: (0,) * _nd
            if single_buffer_consts:
                # Constant-index blocks: no need to double-buffer them.
                return pl.BlockSpec(shape, idx, pipeline_mode=pl.Buffered(1))
            return pl.BlockSpec(shape, idx)

        in_specs = [
            pl.BlockSpec((Bb, S, D), lambda bi, k: (bi, 0, 0)),    # x
            const_spec(wqkv.shape), const_spec(bqkv.shape),        # fused QKV
            const_spec(wo.shape), const_spec(bo.shape),            # out proj
            const_spec(g_att.shape), const_spec(be_att.shape),     # LN (att)
            pl.BlockSpec((D, tk), lambda bi, k: (0, k)),           # w1 chunk
            pl.BlockSpec((1, tk), lambda bi, k: (0, k)),           # b1 chunk
            pl.BlockSpec((tk, D), lambda bi, k: (k, 0)),           # w2 chunk
            const_spec(b2.shape),                                  # b2
            const_spec(g_ffn.shape), const_spec(be_ffn.shape),     # LN (ffn)
        ]

        kernel = functools.partial(encoder_kernel, num_head=num_head)

        return pl.pallas_call(
            kernel,
            out_shape=jax.ShapeDtypeStruct((B, S, D), jnp.float32),
            grid_spec=pltpu.PrefetchScalarGridSpec(
                num_scalar_prefetch=0,
                grid=(B // Bb, n_ff),
                in_specs=in_specs,
                out_specs=pl.BlockSpec((Bb, S, D), lambda bi, k: (bi, 0, 0)),
                scratch_shapes=[
                    pltpu.VMEM((R, 3 * D), jnp.bfloat16),  # qkv staging
                    pltpu.VMEM((R, D), jnp.bfloat16),      # per-head ctx
                    pltpu.VMEM((R, D), jnp.float32),       # post-LN1 (f32)
                    pltpu.VMEM((R, D), jnp.bfloat16),      # post-LN1 (bf16)
                    pltpu.VMEM((R, D), jnp.float32),       # FFN accumulator
                ],
            ),
            compiler_params=pltpu.CompilerParams(
                dimension_semantics=("parallel", "arbitrary"),
                vmem_limit_bytes=vmem_limit_bytes,
            ),
        )

    try:
        # Preferred: constant weights single-buffered (half the VMEM).
        return build(single_buffer_consts=True)(*args)
    except Exception:
        # Fallback for jax versions without pipeline_mode / Buffered(1).
        return build(single_buffer_consts=False)(*args)


def init_params(key, d_model, d_ff):
    ks = jax.random.split(key, 12)
    s = 0.05
    return {
        "wq": jax.random.normal(ks[0], (d_model, d_model), jnp.float32) * s,
        "bq": jax.random.normal(ks[1], (1, d_model), jnp.float32) * s,
        "wk": jax.random.normal(ks[2], (d_model, d_model), jnp.float32) * s,
        "bk": jax.random.normal(ks[3], (1, d_model), jnp.float32) * s,
        "wv": jax.random.normal(ks[4], (d_model, d_model), jnp.float32) * s,
        "bv": jax.random.normal(ks[5], (1, d_model), jnp.float32) * s,
        "wo": jax.random.normal(ks[6], (d_model, d_model), jnp.float32) * s,
        "bo": jax.random.normal(ks[7], (1, d_model), jnp.float32) * s,
        "g_att": jnp.ones((1, d_model), jnp.float32),
        "be_att": jnp.zeros((1, d_model), jnp.float32),
        "w1": jax.random.normal(ks[8], (d_model, d_ff), jnp.float32) * s,
        "b1": jax.random.normal(ks[9], (1, d_ff), jnp.float32) * s,
        "w2": jax.random.normal(ks[10], (d_ff, d_model), jnp.float32) * s,
        "b2": jax.random.normal(ks[11], (1, d_model), jnp.float32) * s,
        "g_ffn": jnp.ones((1, d_model), jnp.float32),
        "be_ffn": jnp.zeros((1, d_model), jnp.float32),
    }


def reference_encoder(x, p, num_head):
    # pure-f32 JAX reference matching PyTorch semantics (eval mode, no mask)
    B, S, D = x.shape
    dh = D // num_head
    scale = 1.0 / math.sqrt(dh)

    def ln(v, g, b, eps=1e-5):
        m = jnp.mean(v, axis=-1, keepdims=True)
        var = jnp.mean((v - m) ** 2, axis=-1, keepdims=True)
        return (v - m) / jnp.sqrt(var + eps) * g + b

    q = x @ p["wq"] + p["bq"]
    k = x @ p["wk"] + p["bk"]
    v = x @ p["wv"] + p["bv"]
    qh = q.reshape(B, S, num_head, dh).transpose(0, 2, 1, 3)
    kh = k.reshape(B, S, num_head, dh).transpose(0, 2, 1, 3)
    vh = v.reshape(B, S, num_head, dh).transpose(0, 2, 1, 3)
    sc = jnp.einsum("bhqd,bhkd->bhqk", qh, kh) * scale
    pr = jax.nn.softmax(sc, axis=-1)
    ctx = jnp.einsum("bhqk,bhkd->bhqd", pr, vh).transpose(0, 2, 1, 3).reshape(B, S, D)
    att = ctx @ p["wo"] + p["bo"]
    y = ln(x + att, p["g_att"], p["be_att"])
    f = jnp.maximum(y @ p["w1"] + p["b1"], 0.0) @ p["w2"] + p["b2"]
    return ln(y + f, p["g_ffn"], p["be_ffn"])


if __name__ == "__main__":
    B, S, D, d_ff, H = 2, 8, 32, 64, 4
    key = jax.random.PRNGKey(0)
    kx, kp = jax.random.split(key)
    x = jax.random.normal(kx, (B, S, D), jnp.float32)
    params = init_params(kp, D, d_ff)

    out = transformer_encoder(x, params, num_head=H)
    out = jax.block_until_ready(out)

    ref = reference_encoder(x, params, H)
    assert out.shape == (B, S, D)
    max_err = float(jnp.max(jnp.abs(out - ref)))
    # tolerance relaxed vs pure-f32 reference because MXU operands are bf16
    assert jnp.allclose(out, ref, atol=3e-2, rtol=3e-2), (
        f"mismatch vs reference, max abs err {max_err}")
    print("KERNEL_OK")
</pallas_src>

<mosaic_0001>
module attributes {stable_mosaic.version = 11 : i64} {
  func.func @encoder_kernel(%arg0: i32, %arg1: i32, %arg2: memref<2x8x32xf32, #tpu.memory_space<vmem>>, %arg3: memref<32x96xbf16, #tpu.memory_space<vmem>>, %arg4: memref<1x96xf32, #tpu.memory_space<vmem>>, %arg5: memref<32x32xbf16, #tpu.memory_space<vmem>>, %arg6: memref<1x32xf32, #tpu.memory_space<vmem>>, %arg7: memref<1x32xf32, #tpu.memory_space<vmem>>, %arg8: memref<1x32xf32, #tpu.memory_space<vmem>>, %arg9: memref<32x64xbf16, #tpu.memory_space<vmem>>, %arg10: memref<1x64xf32, #tpu.memory_space<vmem>>, %arg11: memref<64x32xbf16, #tpu.memory_space<vmem>>, %arg12: memref<1x32xf32, #tpu.memory_space<vmem>>, %arg13: memref<1x32xf32, #tpu.memory_space<vmem>>, %arg14: memref<1x32xf32, #tpu.memory_space<vmem>>, %arg15: memref<2x8x32xf32, #tpu.memory_space<vmem>>, %arg16: memref<16x96xbf16, #tpu.memory_space<vmem>>, %arg17: memref<16x32xbf16, #tpu.memory_space<vmem>>, %arg18: memref<16x32xf32, #tpu.memory_space<vmem>>, %arg19: memref<16x32xbf16, #tpu.memory_space<vmem>>, %arg20: memref<16x32xf32, #tpu.memory_space<vmem>>) attributes {dimension_semantics = [#tpu.dimension_semantics<parallel>, #tpu.dimension_semantics<arbitrary>], iteration_bounds = array<i64: 1, 1>, scalar_prefetch = 0 : i64, scratch_operands = 5 : i64, tpu.core_type = #tpu.core_type<tc>, window_params = [{transform_indices = @transform_0, window_bounds = array<i64: 2, 8, 32>}, {pipeline_mode = #tpu.pipeline_mode<synchronous>, transform_indices = @transform_1, window_bounds = array<i64: 32, 96>}, {pipeline_mode = #tpu.pipeline_mode<synchronous>, transform_indices = @transform_2, window_bounds = array<i64: 1, 96>}, {pipeline_mode = #tpu.pipeline_mode<synchronous>, transform_indices = @transform_3, window_bounds = array<i64: 32, 32>}, {pipeline_mode = #tpu.pipeline_mode<synchronous>, transform_indices = @transform_4, window_bounds = array<i64: 1, 32>}, {pipeline_mode = #tpu.pipeline_mode<synchronous>, transform_indices = @transform_5, window_bounds = array<i64: 1, 32>}, {pipeline_mode = #tpu.pipeline_mode<synchronous>, transform_indices = @transform_6, window_bounds = array<i64: 1, 32>}, {transform_indices = @transform_7, window_bounds = array<i64: 32, 64>}, {transform_indices = @transform_8, window_bounds = array<i64: 1, 64>}, {transform_indices = @transform_9, window_bounds = array<i64: 64, 32>}, {pipeline_mode = #tpu.pipeline_mode<synchronous>, transform_indices = @transform_10, window_bounds = array<i64: 1, 32>}, {pipeline_mode = #tpu.pipeline_mode<synchronous>, transform_indices = @transform_11, window_bounds = array<i64: 1, 32>}, {pipeline_mode = #tpu.pipeline_mode<synchronous>, transform_indices = @transform_12, window_bounds = array<i64: 1, 32>}, {transform_indices = @transform_13, window_bounds = array<i64: 2, 8, 32>}]} {
    %c0_i32 = arith.constant 0 : i32
    %0 = arith.cmpi eq, %arg1, %c0_i32 : i32
    %1 = arith.extui %0 : i1 to i32
    %c0_i32_0 = arith.constant 0 : i32
    %2 = arith.cmpi ne, %1, %c0_i32_0 : i32
    scf.if %2 {
      %c0_16 = arith.constant 0 : index
      %c0_17 = arith.constant 0 : index
      %c0_18 = arith.constant 0 : index
      %20 = vector.load %arg2[%c0_16, %c0_17, %c0_18] : memref<2x8x32xf32, #tpu.memory_space<vmem>>, vector<2x8x32xf32>
      %21 = vector.shape_cast %20 : vector<2x8x32xf32> to vector<16x32xf32>
      %22 = arith.truncf %21 : vector<16x32xf32> to vector<16x32xbf16>
      %c0_19 = arith.constant 0 : index
      %c0_20 = arith.constant 0 : index
      %23 = vector.load %arg3[%c0_19, %c0_20] : memref<32x96xbf16, #tpu.memory_space<vmem>>, vector<32x96xbf16>
      %cst_21 = arith.constant dense<0.000000e+00> : vector<16x96xf32>
      %24 = tpu.matmul %22, %23, %cst_21 {dimension_numbers = #tpu.dot_dimension_numbers<[1], [0], [0], [1], [0, 0, 1, 1], [], []>} : vector<16x32xbf16>, vector<32x96xbf16>, vector<16x96xf32> -> vector<16x96xf32>
      %c0_22 = arith.constant 0 : index
      %c0_23 = arith.constant 0 : index
      %25 = vector.load %arg4[%c0_22, %c0_23] : memref<1x96xf32, #tpu.memory_space<vmem>>, vector<1x96xf32>
      %26 = vector.broadcast %25 : vector<1x96xf32> to vector<16x96xf32>
      %27 = arith.addf %24, %26 : vector<16x96xf32>
      %28 = arith.truncf %27 : vector<16x96xf32> to vector<16x96xbf16>
      %c0_24 = arith.constant 0 : index
      %c0_25 = arith.constant 0 : index
      %29 = vector.load %arg16[%c0_24, %c0_25] : memref<16x96xbf16, #tpu.memory_space<vmem>>, vector<16x96xbf16>
      tpu.vector_store %arg16[%c0_24, %c0_25], %28 {strides = array<i32>} : memref<16x96xbf16, #tpu.memory_space<vmem>>, vector<16x96xbf16>,
      %c0_26 = arith.constant 0 : index
      %c0_27 = arith.constant 0 : index
      %30 = vector.load %arg16[%c0_26, %c0_27] : memref<16x96xbf16, #tpu.memory_space<vmem>>, vector<8x8xbf16>
      %c0_28 = arith.constant 0 : index
      %c32 = arith.constant 32 : index
      %31 = vector.load %arg16[%c0_28, %c32] : memref<16x96xbf16, #tpu.memory_space<vmem>>, vector<8x8xbf16>
      %c0_29 = arith.constant 0 : index
      %c64 = arith.constant 64 : index
      %32 = vector.load %arg16[%c0_29, %c64] : memref<16x96xbf16, #tpu.memory_space<vmem>>, vector<8x8xbf16>
      %cst_30 = arith.constant dense<0.000000e+00> : vector<8x8xf32>
      %33 = tpu.matmul %30, %31, %cst_30 {dimension_numbers = #tpu.dot_dimension_numbers<[1], [1], [0], [0], [0, 0, 1, 0], [], []>} : vector<8x8xbf16>, vector<8x8xbf16>, vector<8x8xf32> -> vector<8x8xf32>
      %cst_31 = arith.constant dense<0xFF800000> : vector<8xf32>
      %34 = vector.multi_reduction <maximumf>, %33, %cst_31 [1] : vector<8x8xf32> to vector<8xf32>
      %35 = vector.shape_cast %34 : vector<8xf32> to vector<8x1xf32>
      %36 = vector.broadcast %35 : vector<8x1xf32> to vector<8x8xf32>
      %37 = arith.subf %33, %36 : vector<8x8xf32>
      %38 = math.exp %37 : vector<8x8xf32>
      %cst_32 = arith.constant dense<0.000000e+00> : vector<8xf32>
      %39 = vector.multi_reduction <add>, %38, %cst_32 [1] : vector<8x8xf32> to vector<8xf32>
      %40 = vector.shape_cast %39 : vector<8xf32> to vector<8x1xf32>
      %41 = tpu.reciprocal %40 {approx = true} : vector<8x1xf32> -> vector<8x1xf32>
      %42 = arith.truncf %38 : vector<8x8xf32> to vector<8x8xbf16>
      %cst_33 = arith.constant dense<0.000000e+00> : vector<8x8xf32>
      %43 = tpu.matmul %42, %32, %cst_33 {dimension_numbers = #tpu.dot_dimension_numbers<[1], [0], [0], [1], [0, 0, 1, 1], [], []>} : vector<8x8xbf16>, vector<8x8xbf16>, vector<8x8xf32> -> vector<8x8xf32>
      %44 = vector.broadcast %41 : vector<8x1xf32> to vector<8x8xf32>
      %45 = arith.mulf %43, %44 : vector<8x8xf32>
      %46 = arith.truncf %45 : vector<8x8xf32> to vector<8x8xbf16>
      %c0_34 = arith.constant 0 : index
      %c0_35 = arith.constant 0 : index
      %47 = vector.load %arg17[%c0_34, %c0_35] : memref<16x32xbf16, #tpu.memory_space<vmem>>, vector<8x8xbf16>
      tpu.vector_store %arg17[%c0_34, %c0_35], %46 {strides = array<i32>} : memref<16x32xbf16, #tpu.memory_space<vmem>>, vector<8x8xbf16>,
      %c0_36 = arith.constant 0 : index
      %c8 = arith.constant 8 : index
      %48 = vector.load %arg16[%c0_36, %c8] : memref<16x96xbf16, #tpu.memory_space<vmem>>, vector<8x8xbf16>
      %c0_37 = arith.constant 0 : index
      %c40 = arith.constant 40 : index
      %49 = vector.load %arg16[%c0_37, %c40] : memref<16x96xbf16, #tpu.memory_space<vmem>>, vector<8x8xbf16>
      %c0_38 = arith.constant 0 : index
      %c72 = arith.constant 72 : index
      %50 = vector.load %arg16[%c0_38, %c72] : memref<16x96xbf16, #tpu.memory_space<vmem>>, vector<8x8xbf16>
      %cst_39 = arith.constant dense<0.000000e+00> : vector<8x8xf32>
      %51 = tpu.matmul %48, %49, %cst_39 {dimension_numbers = #tpu.dot_dimension_numbers<[1], [1], [0], [0], [0, 0, 1, 0], [], []>} : vector<8x8xbf16>, vector<8x8xbf16>, vector<8x8xf32> -> vector<8x8xf32>
      %cst_40 = arith.constant dense<0xFF800000> : vector<8xf32>
      %52 = vector.multi_reduction <maximumf>, %51, %cst_40 [1] : vector<8x8xf32> to vector<8xf32>
      %53 = vector.shape_cast %52 : vector<8xf32> to vector<8x1xf32>
      %54 = vector.broadcast %53 : vector<8x1xf32> to vector<8x8xf32>
      %55 = arith.subf %51, %54 : vector<8x8xf32>
      %56 = math.exp %55 : vector<8x8xf32>
      %cst_41 = arith.constant dense<0.000000e+00> : vector<8xf32>
      %57 = vector.multi_reduction <add>, %56, %cst_41 [1] : vector<8x8xf32> to vector<8xf32>
      %58 = vector.shape_cast %57 : vector<8xf32> to vector<8x1xf32>
      %59 = tpu.reciprocal %58 {approx = true} : vector<8x1xf32> -> vector<8x1xf32>
      %60 = arith.truncf %56 : vector<8x8xf32> to vector<8x8xbf16>
      %cst_42 = arith.constant dense<0.000000e+00> : vector<8x8xf32>
      %61 = tpu.matmul %60, %50, %cst_42 {dimension_numbers = #tpu.dot_dimension_numbers<[1], [0], [0], [1], [0, 0, 1, 1], [], []>} : vector<8x8xbf16>, vector<8x8xbf16>, vector<8x8xf32> -> vector<8x8xf32>
      %62 = vector.broadcast %59 : vector<8x1xf32> to vector<8x8xf32>
      %63 = arith.mulf %61, %62 : vector<8x8xf32>
      %64 = arith.truncf %63 : vector<8x8xf32> to vector<8x8xbf16>
      %c0_43 = arith.constant 0 : index
      %c8_44 = arith.constant 8 : index
      %65 = vector.load %arg17[%c0_43, %c8_44] : memref<16x32xbf16, #tpu.memory_space<vmem>>, vector<8x8xbf16>
      tpu.vector_store %arg17[%c0_43, %c8_44], %64 {strides = array<i32>} : memref<16x32xbf16, #tpu.memory_space<vmem>>, vector<8x8xbf16>,
      %c0_45 = arith.constant 0 : index
      %c16 = arith.constant 16 : index
      %66 = vector.load %arg16[%c0_45, %c16] : memref<16x96xbf16, #tpu.memory_space<vmem>>, vector<8x8xbf16>
      %c0_46 = arith.constant 0 : index
      %c48 = arith.constant 48 : index
      %67 = vector.load %arg16[%c0_46, %c48] : memref<16x96xbf16, #tpu.memory_space<vmem>>, vector<8x8xbf16>
      %c0_47 = arith.constant 0 : index
      %c80 = arith.constant 80 : index
      %68 = vector.load %arg16[%c0_47, %c80] : memref<16x96xbf16, #tpu.memory_space<vmem>>, vector<8x8xbf16>
      %cst_48 = arith.constant dense<0.000000e+00> : vector<8x8xf32>
      %69 = tpu.matmul %66, %67, %cst_48 {dimension_numbers = #tpu.dot_dimension_numbers<[1], [1], [0], [0], [0, 0, 1, 0], [], []>} : vector<8x8xbf16>, vector<8x8xbf16>, vector<8x8xf32> -> vector<8x8xf32>
      %cst_49 = arith.constant dense<0xFF800000> : vector<8xf32>
      %70 = vector.multi_reduction <maximumf>, %69, %cst_49 [1] : vector<8x8xf32> to vector<8xf32>
      %71 = vector.shape_cast %70 : vector<8xf32> to vector<8x1xf32>
      %72 = vector.broadcast %71 : vector<8x1xf32> to vector<8x8xf32>
      %73 = arith.subf %69, %72 : vector<8x8xf32>
      %74 = math.exp %73 : vector<8x8xf32>
      %cst_50 = arith.constant dense<0.000000e+00> : vector<8xf32>
      %75 = vector.multi_reduction <add>, %74, %cst_50 [1] : vector<8x8xf32> to vector<8xf32>
      %76 = vector.shape_cast %75 : vector<8xf32> to vector<8x1xf32>
      %77 = tpu.reciprocal %76 {approx = true} : vector<8x1xf32> -> vector<8x1xf32>
      %78 = arith.truncf %74 : vector<8x8xf32> to vector<8x8xbf16>
      %cst_51 = arith.constant dense<0.000000e+00> : vector<8x8xf32>
      %79 = tpu.matmul %78, %68, %cst_51 {dimension_numbers = #tpu.dot_dimension_numbers<[1], [0], [0], [1], [0, 0, 1, 1], [], []>} : vector<8x8xbf16>, vector<8x8xbf16>, vector<8x8xf32> -> vector<8x8xf32>
      %80 = vector.broadcast %77 : vector<8x1xf32> to vector<8x8xf32>
      %81 = arith.mulf %79, %80 : vector<8x8xf32>
      %82 = arith.truncf %81 : vector<8x8xf32> to vector<8x8xbf16>
      %c0_52 = arith.constant 0 : index
      %c16_53 = arith.constant 16 : index
      %83 = vector.load %arg17[%c0_52, %c16_53] : memref<16x32xbf16, #tpu.memory_space<vmem>>, vector<8x8xbf16>
      tpu.vector_store %arg17[%c0_52, %c16_53], %82 {strides = array<i32>} : memref<16x32xbf16, #tpu.memory_space<vmem>>, vector<8x8xbf16>,
      %c0_54 = arith.constant 0 : index
      %c24 = arith.constant 24 : index
      %84 = vector.load %arg16[%c0_54, %c24] : memref<16x96xbf16, #tpu.memory_space<vmem>>, vector<8x8xbf16>
      %c0_55 = arith.constant 0 : index
      %c56 = arith.constant 56 : index
      %85 = vector.load %arg16[%c0_55, %c56] : memref<16x96xbf16, #tpu.memory_space<vmem>>, vector<8x8xbf16>
      %c0_56 = arith.constant 0 : index
      %c88 = arith.constant 88 : index
      %86 = vector.load %arg16[%c0_56, %c88] : memref<16x96xbf16, #tpu.memory_space<vmem>>, vector<8x8xbf16>
      %cst_57 = arith.constant dense<0.000000e+00> : vector<8x8xf32>
      %87 = tpu.matmul %84, %85, %cst_57 {dimension_numbers = #tpu.dot_dimension_numbers<[1], [1], [0], [0], [0, 0, 1, 0], [], []>} : vector<8x8xbf16>, vector<8x8xbf16>, vector<8x8xf32> -> vector<8x8xf32>
      %cst_58 = arith.constant dense<0xFF800000> : vector<8xf32>
      %88 = vector.multi_reduction <maximumf>, %87, %cst_58 [1] : vector<8x8xf32> to vector<8xf32>
      %89 = vector.shape_cast %88 : vector<8xf32> to vector<8x1xf32>
      %90 = vector.broadcast %89 : vector<8x1xf32> to vector<8x8xf32>
      %91 = arith.subf %87, %90 : vector<8x8xf32>
      %92 = math.exp %91 : vector<8x8xf32>
      %cst_59 = arith.constant dense<0.000000e+00> : vector<8xf32>
      %93 = vector.multi_reduction <add>, %92, %cst_59 [1] : vector<8x8xf32> to vector<8xf32>
      %94 = vector.shape_cast %93 : vector<8xf32> to vector<8x1xf32>
      %95 = tpu.reciprocal %94 {approx = true} : vector<8x1xf32> -> vector<8x1xf32>
      %96 = arith.truncf %92 : vector<8x8xf32> to vector<8x8xbf16>
      %cst_60 = arith.constant dense<0.000000e+00> : vector<8x8xf32>
      %97 = tpu.matmul %96, %86, %cst_60 {dimension_numbers = #tpu.dot_dimension_numbers<[1], [0], [0], [1], [0, 0, 1, 1], [], []>} : vector<8x8xbf16>, vector<8x8xbf16>, vector<8x8xf32> -> vector<8x8xf32>
      %98 = vector.broadcast %95 : vector<8x1xf32> to vector<8x8xf32>
      %99 = arith.mulf %97, %98 : vector<8x8xf32>
      %100 = arith.truncf %99 : vector<8x8xf32> to vector<8x8xbf16>
      %c0_61 = arith.constant 0 : index
      %c24_62 = arith.constant 24 : index
      %101 = vector.load %arg17[%c0_61, %c24_62] : memref<16x32xbf16, #tpu.memory_space<vmem>>, vector<8x8xbf16>
      tpu.vector_store %arg17[%c0_61, %c24_62], %100 {strides = array<i32>} : memref<16x32xbf16, #tpu.memory_space<vmem>>, vector<8x8xbf16>,
      %c8_63 = arith.constant 8 : index
      %c0_64 = arith.constant 0 : index
      %102 = vector.load %arg16[%c8_63, %c0_64] : memref<16x96xbf16, #tpu.memory_space<vmem>>, vector<8x8xbf16>
      %c8_65 = arith.constant 8 : index
      %c32_66 = arith.constant 32 : index
      %103 = vector.load %arg16[%c8_65, %c32_66] : memref<16x96xbf16, #tpu.memory_space<vmem>>, vector<8x8xbf16>
      %c8_67 = arith.constant 8 : index
      %c64_68 = arith.constant 64 : index
      %104 = vector.load %arg16[%c8_67, %c64_68] : memref<16x96xbf16, #tpu.memory_space<vmem>>, vector<8x8xbf16>
      %cst_69 = arith.constant dense<0.000000e+00> : vector<8x8xf32>
      %105 = tpu.matmul %102, %103, %cst_69 {dimension_numbers = #tpu.dot_dimension_numbers<[1], [1], [0], [0], [0, 0, 1, 0], [], []>} : vector<8x8xbf16>, vector<8x8xbf16>, vector<8x8xf32> -> vector<8x8xf32>
      %cst_70 = arith.constant dense<0xFF800000> : vector<8xf32>
      %106 = vector.multi_reduction <maximumf>, %105, %cst_70 [1] : vector<8x8xf32> to vector<8xf32>
      %107 = vector.shape_cast %106 : vector<8xf32> to vector<8x1xf32>
      %108 = vector.broadcast %107 : vector<8x1xf32> to vector<8x8xf32>
      %109 = arith.subf %105, %108 : vector<8x8xf32>
      %110 = math.exp %109 : vector<8x8xf32>
      %cst_71 = arith.constant dense<0.000000e+00> : vector<8xf32>
      %111 = vector.multi_reduction <add>, %110, %cst_71 [1] : vector<8x8xf32> to vector<8xf32>
      %112 = vector.shape_cast %111 : vector<8xf32> to vector<8x1xf32>
      %113 = tpu.reciprocal %112 {approx = true} : vector<8x1xf32> -> vector<8x1xf32>
      %114 = arith.truncf %110 : vector<8x8xf32> to vector<8x8xbf16>
      %cst_72 = arith.constant dense<0.000000e+00> : vector<8x8xf32>
      %115 = tpu.matmul %114, %104, %cst_72 {dimension_numbers = #tpu.dot_dimension_numbers<[1], [0], [0], [1], [0, 0, 1, 1], [], []>} : vector<8x8xbf16>, vector<8x8xbf16>, vector<8x8xf32> -> vector<8x8xf32>
      %116 = vector.broadcast %113 : vector<8x1xf32> to vector<8x8xf32>
      %117 = arith.mulf %115, %116 : vector<8x8xf32>
      %118 = arith.truncf %117 : vector<8x8xf32> to vector<8x8xbf16>
      %c8_73 = arith.constant 8 : index
      %c0_74 = arith.constant 0 : index
      %119 = vector.load %arg17[%c8_73, %c0_74] : memref<16x32xbf16, #tpu.memory_space<vmem>>, vector<8x8xbf16>
      tpu.vector_store %arg17[%c8_73, %c0_74], %118 {strides = array<i32>} : memref<16x32xbf16, #tpu.memory_space<vmem>>, vector<8x8xbf16>,
      %c8_75 = arith.constant 8 : index
      %c8_76 = arith.constant 8 : index
      %120 = vector.load %arg16[%c8_75, %c8_76] : memref<16x96xbf16, #tpu.memory_space<vmem>>, vector<8x8xbf16>
      %c8_77 = arith.constant 8 : index
      %c40_78 = arith.constant 40 : index
      %121 = vector.load %arg16[%c8_77, %c40_78] : memref<16x96xbf16, #tpu.memory_space<vmem>>, vector<8x8xbf16>
      %c8_79 = arith.constant 8 : index
      %c72_80 = arith.constant 72 : index
      %122 = vector.load %arg16[%c8_79, %c72_80] : memref<16x96xbf16, #tpu.memory_space<vmem>>, vector<8x8xbf16>
      %cst_81 = arith.constant dense<0.000000e+00> : vector<8x8xf32>
      %123 = tpu.matmul %120, %121, %cst_81 {dimension_numbers = #tpu.dot_dimension_numbers<[1], [1], [0], [0], [0, 0, 1, 0], [], []>} : vector<8x8xbf16>, vector<8x8xbf16>, vector<8x8xf32> -> vector<8x8xf32>
      %cst_82 = arith.constant dense<0xFF800000> : vector<8xf32>
      %124 = vector.multi_reduction <maximumf>, %123, %cst_82 [1] : vector<8x8xf32> to vector<8xf32>
      %125 = vector.shape_cast %124 : vector<8xf32> to vector<8x1xf32>
      %126 = vector.broadcast %125 : vector<8x1xf32> to vector<8x8xf32>
      %127 = arith.subf %123, %126 : vector<8x8xf32>
      %128 = math.exp %127 : vector<8x8xf32>
      %cst_83 = arith.constant dense<0.000000e+00> : vector<8xf32>
      %129 = vector.multi_reduction <add>, %128, %cst_83 [1] : vector<8x8xf32> to vector<8xf32>
      %130 = vector.shape_cast %129 : vector<8xf32> to vector<8x1xf32>
      %131 = tpu.reciprocal %130 {approx = true} : vector<8x1xf32> -> vector<8x1xf32>
      %132 = arith.truncf %128 : vector<8x8xf32> to vector<8x8xbf16>
      %cst_84 = arith.constant dense<0.000000e+00> : vector<8x8xf32>
      %133 = tpu.matmul %132, %122, %cst_84 {dimension_numbers = #tpu.dot_dimension_numbers<[1], [0], [0], [1], [0, 0, 1, 1], [], []>} : vector<8x8xbf16>, vector<8x8xbf16>, vector<8x8xf32> -> vector<8x8xf32>
      %134 = vector.broadcast %131 : vector<8x1xf32> to vector<8x8xf32>
      %135 = arith.mulf %133, %134 : vector<8x8xf32>
      %136 = arith.truncf %135 : vector<8x8xf32> to vector<8x8xbf16>
      %c8_85 = arith.constant 8 : index
      %c8_86 = arith.constant 8 : index
      %137 = vector.load %arg17[%c8_85, %c8_86] : memref<16x32xbf16, #tpu.memory_space<vmem>>, vector<8x8xbf16>
      tpu.vector_store %arg17[%c8_85, %c8_86], %136 {strides = array<i32>} : memref<16x32xbf16, #tpu.memory_space<vmem>>, vector<8x8xbf16>,
      %c8_87 = arith.constant 8 : index
      %c16_88 = arith.constant 16 : index
      %138 = vector.load %arg16[%c8_87, %c16_88] : memref<16x96xbf16, #tpu.memory_space<vmem>>, vector<8x8xbf16>
      %c8_89 = arith.constant 8 : index
      %c48_90 = arith.constant 48 : index
      %139 = vector.load %arg16[%c8_89, %c48_90] : memref<16x96xbf16, #tpu.memory_space<vmem>>, vector<8x8xbf16>
      %c8_91 = arith.constant 8 : index
      %c80_92 = arith.constant 80 : index
      %140 = vector.load %arg16[%c8_91, %c80_92] : memref<16x96xbf16, #tpu.memory_space<vmem>>, vector<8x8xbf16>
      %cst_93 = arith.constant dense<0.000000e+00> : vector<8x8xf32>
      %141 = tpu.matmul %138, %139, %cst_93 {dimension_numbers = #tpu.dot_dimension_numbers<[1], [1], [0], [0], [0, 0, 1, 0], [], []>} : vector<8x8xbf16>, vector<8x8xbf16>, vector<8x8xf32> -> vector<8x8xf32>
      %cst_94 = arith.constant dense<0xFF800000> : vector<8xf32>
      %142 = vector.multi_reduction <maximumf>, %141, %cst_94 [1] : vector<8x8xf32> to vector<8xf32>
      %143 = vector.shape_cast %142 : vector<8xf32> to vector<8x1xf32>
      %144 = vector.broadcast %143 : vector<8x1xf32> to vector<8x8xf32>
      %145 = arith.subf %141, %144 : vector<8x8xf32>
      %146 = math.exp %145 : vector<8x8xf32>
      %cst_95 = arith.constant dense<0.000000e+00> : vector<8xf32>
      %147 = vector.multi_reduction <add>, %146, %cst_95 [1] : vector<8x8xf32> to vector<8xf32>
      %148 = vector.shape_cast %147 : vector<8xf32> to vector<8x1xf32>
      %149 = tpu.reciprocal %148 {approx = true} : vector<8x1xf32> -> vector<8x1xf32>
      %150 = arith.truncf %146 : vector<8x8xf32> to vector<8x8xbf16>
      %cst_96 = arith.constant dense<0.000000e+00> : vector<8x8xf32>
      %151 = tpu.matmul %150, %140, %cst_96 {dimension_numbers = #tpu.dot_dimension_numbers<[1], [0], [0], [1], [0, 0, 1, 1], [], []>} : vector<8x8xbf16>, vector<8x8xbf16>, vector<8x8xf32> -> vector<8x8xf32>
      %152 = vector.broadcast %149 : vector<8x1xf32> to vector<8x8xf32>
      %153 = arith.mulf %151, %152 : vector<8x8xf32>
      %154 = arith.truncf %153 : vector<8x8xf32> to vector<8x8xbf16>
      %c8_97 = arith.constant 8 : index
      %c16_98 = arith.constant 16 : index
      %155 = vector.load %arg17[%c8_97, %c16_98] : memref<16x32xbf16, #tpu.memory_space<vmem>>, vector<8x8xbf16>
      tpu.vector_store %arg17[%c8_97, %c16_98], %154 {strides = array<i32>} : memref<16x32xbf16, #tpu.memory_space<vmem>>, vector<8x8xbf16>,
      %c8_99 = arith.constant 8 : index
      %c24_100 = arith.constant 24 : index
      %156 = vector.load %arg16[%c8_99, %c24_100] : memref<16x96xbf16, #tpu.memory_space<vmem>>, vector<8x8xbf16>
      %c8_101 = arith.constant 8 : index
      %c56_102 = arith.constant 56 : index
      %157 = vector.load %arg16[%c8_101, %c56_102] : memref<16x96xbf16, #tpu.memory_space<vmem>>, vector<8x8xbf16>
      %c8_103 = arith.constant 8 : index
      %c88_104 = arith.constant 88 : index
      %158 = vector.load %arg16[%c8_103, %c88_104] : memref<16x96xbf16, #tpu.memory_space<vmem>>, vector<8x8xbf16>
      %cst_105 = arith.constant dense<0.000000e+00> : vector<8x8xf32>
      %159 = tpu.matmul %156, %157, %cst_105 {dimension_numbers = #tpu.dot_dimension_numbers<[1], [1], [0], [0], [0, 0, 1, 0], [], []>} : vector<8x8xbf16>, vector<8x8xbf16>, vector<8x8xf32> -> vector<8x8xf32>
      %cst_106 = arith.constant dense<0xFF800000> : vector<8xf32>
      %160 = vector.multi_reduction <maximumf>, %159, %cst_106 [1] : vector<8x8xf32> to vector<8xf32>
      %161 = vector.shape_cast %160 : vector<8xf32> to vector<8x1xf32>
      %162 = vector.broadcast %161 : vector<8x1xf32> to vector<8x8xf32>
      %163 = arith.subf %159, %162 : vector<8x8xf32>
      %164 = math.exp %163 : vector<8x8xf32>
      %cst_107 = arith.constant dense<0.000000e+00> : vector<8xf32>
      %165 = vector.multi_reduction <add>, %164, %cst_107 [1] : vector<8x8xf32> to vector<8xf32>
      %166 = vector.shape_cast %165 : vector<8xf32> to vector<8x1xf32>
      %167 = tpu.reciprocal %166 {approx = true} : vector<8x1xf32> -> vector<8x1xf32>
      %168 = arith.truncf %164 : vector<8x8xf32> to vector<8x8xbf16>
      %cst_108 = arith.constant dense<0.000000e+00> : vector<8x8xf32>
      %169 = tpu.matmul %168, %158, %cst_108 {dimension_numbers = #tpu.dot_dimension_numbers<[1], [0], [0], [1], [0, 0, 1, 1], [], []>} : vector<8x8xbf16>, vector<8x8xbf16>, vector<8x8xf32> -> vector<8x8xf32>
      %170 = vector.broadcast %167 : vector<8x1xf32> to vector<8x8xf32>
      %171 = arith.mulf %169, %170 : vector<8x8xf32>
      %172 = arith.truncf %171 : vector<8x8xf32> to vector<8x8xbf16>
      %c8_109 = arith.constant 8 : index
      %c24_110 = arith.constant 24 : index
      %173 = vector.load %arg17[%c8_109, %c24_110] : memref<16x32xbf16, #tpu.memory_space<vmem>>, vector<8x8xbf16>
      tpu.vector_store %arg17[%c8_109, %c24_110], %172 {strides = array<i32>} : memref<16x32xbf16, #tpu.memory_space<vmem>>, vector<8x8xbf16>,
      %c0_111 = arith.constant 0 : index
      %c0_112 = arith.constant 0 : index
      %174 = vector.load %arg17[%c0_111, %c0_112] : memref<16x32xbf16, #tpu.memory_space<vmem>>, vector<16x32xbf16>
      %c0_113 = arith.constant 0 : index
      %c0_114 = arith.constant 0 : index
      %175 = vector.load %arg5[%c0_113, %c0_114] : memref<32x32xbf16, #tpu.memory_space<vmem>>, vector<32x32xbf16>
      %cst_115 = arith.constant dense<0.000000e+00> : vector<16x32xf32>
      %176 = tpu.matmul %174, %175, %cst_115 {dimension_numbers = #tpu.dot_dimension_numbers<[1], [0], [0], [1], [0, 0, 1, 1], [], []>} : vector<16x32xbf16>, vector<32x32xbf16>, vector<16x32xf32> -> vector<16x32xf32>
      %c0_116 = arith.constant 0 : index
      %c0_117 = arith.constant 0 : index
      %177 = vector.load %arg6[%c0_116, %c0_117] : memref<1x32xf32, #tpu.memory_space<vmem>>, vector<1x32xf32>
      %178 = vector.broadcast %177 : vector<1x32xf32> to vector<16x32xf32>
      %179 = arith.addf %176, %178 : vector<16x32xf32>
      %180 = arith.addf %21, %179 : vector<16x32xf32>
      %c0_118 = arith.constant 0 : index
      %c0_119 = arith.constant 0 : index
      %181 = vector.load %arg7[%c0_118, %c0_119] : memref<1x32xf32, #tpu.memory_space<vmem>>, vector<1x32xf32>
      %c0_120 = arith.constant 0 : index
      %c0_121 = arith.constant 0 : index
      %182 = vector.load %arg8[%c0_120, %c0_121] : memref<1x32xf32, #tpu.memory_space<vmem>>, vector<1x32xf32>
      %cst_122 = arith.constant dense<0.000000e+00> : vector<16xf32>
      %183 = vector.multi_reduction <add>, %180, %cst_122 [1] : vector<16x32xf32> to vector<16xf32>
      %184 = vector.shape_cast %183 : vector<16xf32> to vector<16x1xf32>
      %cst_123 = arith.constant 3.200000e+01 : f32
      %185 = vector.broadcast %cst_123 : f32 to vector<16x1xf32>
      %186 = arith.divf %184, %185 : vector<16x1xf32>
      %187 = vector.broadcast %186 : vector<16x1xf32> to vector<16x32xf32>
      %188 = arith.subf %180, %187 : vector<16x32xf32>
      %189 = arith.mulf %188, %188 : vector<16x32xf32>
      %cst_124 = arith.constant dense<0.000000e+00> : vector<16xf32>
      %190 = vector.multi_reduction <add>, %189, %cst_124 [1] : vector<16x32xf32> to vector<16xf32>
      %191 = vector.shape_cast %190 : vector<16xf32> to vector<16x1xf32>
      %cst_125 = arith.constant 3.200000e+01 : f32
      %192 = vector.broadcast %cst_125 : f32 to vector<16x1xf32>
      %193 = arith.divf %191, %192 : vector<16x1xf32>
      %194 = vector.broadcast %186 : vector<16x1xf32> to vector<16x32xf32>
      %195 = arith.subf %180, %194 : vector<16x32xf32>
      %cst_126 = arith.constant 9.99999974E-6 : f32
      %196 = vector.broadcast %cst_126 : f32 to vector<16x1xf32>
      %197 = arith.addf %193, %196 : vector<16x1xf32>
      %198 = math.rsqrt %197 : vector<16x1xf32>
      %199 = vector.broadcast %198 : vector<16x1xf32> to vector<16x32xf32>
      %200 = arith.mulf %195, %199 : vector<16x32xf32>
      %201 = vector.broadcast %181 : vector<1x32xf32> to vector<16x32xf32>
      %202 = arith.mulf %200, %201 : vector<16x32xf32>
      %203 = vector.broadcast %182 : vector<1x32xf32> to vector<16x32xf32>
      %204 = arith.addf %202, %203 : vector<16x32xf32>
      %c0_127 = arith.constant 0 : index
      %c0_128 = arith.constant 0 : index
      %205 = vector.load %arg18[%c0_127, %c0_128] : memref<16x32xf32, #tpu.memory_space<vmem>>, vector<16x32xf32>
      tpu.vector_store %arg18[%c0_127, %c0_128], %204 {strides = array<i32>} : memref<16x32xf32, #tpu.memory_space<vmem>>, vector<16x32xf32>,
      %206 = arith.truncf %204 : vector<16x32xf32> to vector<16x32xbf16>
      %c0_129 = arith.constant 0 : index
      %c0_130 = arith.constant 0 : index
      %207 = vector.load %arg19[%c0_129, %c0_130] : memref<16x32xbf16, #tpu.memory_space<vmem>>, vector<16x32xbf16>
      tpu.vector_store %arg19[%c0_129, %c0_130], %206 {strides = array<i32>} : memref<16x32xbf16, #tpu.memory_space<vmem>>, vector<16x32xbf16>,
      %cst_131 = arith.constant 0.000000e+00 : f32
      %208 = vector.broadcast %cst_131 : f32 to vector<16x32xf32>
      %c0_132 = arith.constant 0 : index
      %c0_133 = arith.constant 0 : index
      %209 = vector.load %arg20[%c0_132, %c0_133] : memref<16x32xf32, #tpu.memory_space<vmem>>, vector<16x32xf32>
      tpu.vector_store %arg20[%c0_132, %c0_133], %208 {strides = array<i32>} : memref<16x32xf32, #tpu.memory_space<vmem>>, vector<16x32xf32>,
    } else {
    }
    %c0 = arith.constant 0 : index
    %c0_1 = arith.constant 0 : index
    %3 = vector.load %arg19[%c0, %c0_1] : memref<16x32xbf16, #tpu.memory_space<vmem>>, vector<16x32xbf16>
    %c0_2 = arith.constant 0 : index
    %c0_3 = arith.constant 0 : index
    %4 = vector.load %arg9[%c0_2, %c0_3] : memref<32x64xbf16, #tpu.memory_space<vmem>>, vector<32x64xbf16>
    %cst = arith.constant dense<0.000000e+00> : vector<16x64xf32>
    %5 = tpu.matmul %3, %4, %cst {dimension_numbers = #tpu.dot_dimension_numbers<[1], [0], [0], [1], [0, 0, 1, 1], [], []>} : vector<16x32xbf16>, vector<32x64xbf16>, vector<16x64xf32> -> vector<16x64xf32>
    %c0_4 = arith.constant 0 : index
    %c0_5 = arith.constant 0 : index
    %6 = vector.load %arg10[%c0_4, %c0_5] : memref<1x64xf32, #tpu.memory_space<vmem>>, vector<1x64xf32>
    %7 = vector.broadcast %6 : vector<1x64xf32> to vector<16x64xf32>
    %8 = arith.addf %5, %7 : vector<16x64xf32>
    %cst_6 = arith.constant 0.000000e+00 : f32
    %9 = vector.broadcast %cst_6 : f32 to vector<16x64xf32>
    %10 = arith.maximumf %8, %9 : vector<16x64xf32>
    %c0_7 = arith.constant 0 : index
    %c0_8 = arith.constant 0 : index
    %11 = vector.load %arg20[%c0_7, %c0_8] : memref<16x32xf32, #tpu.memory_space<vmem>>, vector<16x32xf32>
    %12 = arith.truncf %10 : vector<16x64xf32> to vector<16x64xbf16>
    %c0_9 = arith.constant 0 : index
    %c0_10 = arith.constant 0 : index
    %13 = vector.load %arg11[%c0_9, %c0_10] : memref<64x32xbf16, #tpu.memory_space<vmem>>, vector<64x32xbf16>
    %cst_11 = arith.constant dense<0.000000e+00> : vector<16x32xf32>
    %14 = tpu.matmul %12, %13, %cst_11 {dimension_numbers = #tpu.dot_dimension_numbers<[1], [0], [0], [1], [0, 0, 1, 1], [], []>} : vector<16x64xbf16>, vector<64x32xbf16>, vector<16x32xf32> -> vector<16x32xf32>
    %15 = arith.addf %11, %14 : vector<16x32xf32>
    %c0_12 = arith.constant 0 : index
    %c0_13 = arith.constant 0 : index
    %16 = vector.load %arg20[%c0_12, %c0_13] : memref<16x32xf32, #tpu.memory_space<vmem>>, vector<16x32xf32>
    tpu.vector_store %arg20[%c0_12, %c0_13], %15 {strides = array<i32>} : memref<16x32xf32, #tpu.memory_space<vmem>>, vector<16x32xf32>,
    %c0_i32_14 = arith.constant 0 : i32
    %17 = arith.cmpi eq, %arg1, %c0_i32_14 : i32
    %18 = arith.extui %17 : i1 to i32
    %c0_i32_15 = arith.constant 0 : i32
    %19 = arith.cmpi ne, %18, %c0_i32_15 : i32
    scf.if %19 {
      %c0_16 = arith.constant 0 : index
      %c0_17 = arith.constant 0 : index
      %20 = vector.load %arg20[%c0_16, %c0_17] : memref<16x32xf32, #tpu.memory_space<vmem>>, vector<16x32xf32>
      %c0_18 = arith.constant 0 : index
      %c0_19 = arith.constant 0 : index
      %21 = vector.load %arg12[%c0_18, %c0_19] : memref<1x32xf32, #tpu.memory_space<vmem>>, vector<1x32xf32>
      %22 = vector.broadcast %21 : vector<1x32xf32> to vector<16x32xf32>
      %23 = arith.addf %20, %22 : vector<16x32xf32>
      %c0_20 = arith.constant 0 : index
      %c0_21 = arith.constant 0 : index
      %24 = vector.load %arg18[%c0_20, %c0_21] : memref<16x32xf32, #tpu.memory_space<vmem>>, vector<16x32xf32>
      %25 = arith.addf %24, %23 : vector<16x32xf32>
      %c0_22 = arith.constant 0 : index
      %c0_23 = arith.constant 0 : index
      %26 = vector.load %arg13[%c0_22, %c0_23] : memref<1x32xf32, #tpu.memory_space<vmem>>, vector<1x32xf32>
      %c0_24 = arith.constant 0 : index
      %c0_25 = arith.constant 0 : index
      %27 = vector.load %arg14[%c0_24, %c0_25] : memref<1x32xf32, #tpu.memory_space<vmem>>, vector<1x32xf32>
      %cst_26 = arith.constant dense<0.000000e+00> : vector<16xf32>
      %28 = vector.multi_reduction <add>, %25, %cst_26 [1] : vector<16x32xf32> to vector<16xf32>
      %29 = vector.shape_cast %28 : vector<16xf32> to vector<16x1xf32>
      %cst_27 = arith.constant 3.200000e+01 : f32
      %30 = vector.broadcast %cst_27 : f32 to vector<16x1xf32>
      %31 = arith.divf %29, %30 : vector<16x1xf32>
      %32 = vector.broadcast %31 : vector<16x1xf32> to vector<16x32xf32>
      %33 = arith.subf %25, %32 : vector<16x32xf32>
      %34 = arith.mulf %33, %33 : vector<16x32xf32>
      %cst_28 = arith.constant dense<0.000000e+00> : vector<16xf32>
      %35 = vector.multi_reduction <add>, %34, %cst_28 [1] : vector<16x32xf32> to vector<16xf32>
      %36 = vector.shape_cast %35 : vector<16xf32> to vector<16x1xf32>
      %cst_29 = arith.constant 3.200000e+01 : f32
      %37 = vector.broadcast %cst_29 : f32 to vector<16x1xf32>
      %38 = arith.divf %36, %37 : vector<16x1xf32>
      %39 = vector.broadcast %31 : vector<16x1xf32> to vector<16x32xf32>
      %40 = arith.subf %25, %39 : vector<16x32xf32>
      %cst_30 = arith.constant 9.99999974E-6 : f32
      %41 = vector.broadcast %cst_30 : f32 to vector<16x1xf32>
      %42 = arith.addf %38, %41 : vector<16x1xf32>
      %43 = math.rsqrt %42 : vector<16x1xf32>
      %44 = vector.broadcast %43 : vector<16x1xf32> to vector<16x32xf32>
      %45 = arith.mulf %40, %44 : vector<16x32xf32>
      %46 = vector.broadcast %26 : vector<1x32xf32> to vector<16x32xf32>
      %47 = arith.mulf %45, %46 : vector<16x32xf32>
      %48 = vector.broadcast %27 : vector<1x32xf32> to vector<16x32xf32>
      %49 = arith.addf %47, %48 : vector<16x32xf32>
      %50 = vector.shape_cast %49 : vector<16x32xf32> to vector<2x8x32xf32>
      %c0_31 = arith.constant 0 : index
      %c0_32 = arith.constant 0 : index
      %c0_33 = arith.constant 0 : index
      %51 = vector.load %arg15[%c0_31, %c0_32, %c0_33] : memref<2x8x32xf32, #tpu.memory_space<vmem>>, vector<2x8x32xf32>
      tpu.vector_store %arg15[%c0_31, %c0_32, %c0_33], %50 {strides = array<i32>} : memref<2x8x32xf32, #tpu.memory_space<vmem>>, vector<2x8x32xf32>,
    } else {
    }
    return
  }
  func.func @transform_0(%arg0: i32, %arg1: i32) -> (i32, i32, i32) {
    %c0_i32 = arith.constant 0 : i32
    %c0_i32_0 = arith.constant 0 : i32
    %c0_i32_1 = arith.constant 0 : i32
    return %arg0, %c0_i32, %c0_i32_0 : i32, i32, i32
  }
  func.func @transform_1(%arg0: i32, %arg1: i32) -> (i32, i32) {
    %c0_i32 = arith.constant 0 : i32
    %c0_i32_0 = arith.constant 0 : i32
    %c0_i32_1 = arith.constant 0 : i32
    return %c0_i32, %c0_i32_0 : i32, i32
  }
  func.func @transform_2(%arg0: i32, %arg1: i32) -> (i32, i32) {
    %c0_i32 = arith.constant 0 : i32
    %c0_i32_0 = arith.constant 0 : i32
    %c0_i32_1 = arith.constant 0 : i32
    return %c0_i32, %c0_i32_0 : i32, i32
  }
  func.func @transform_3(%arg0: i32, %arg1: i32) -> (i32, i32) {
    %c0_i32 = arith.constant 0 : i32
    %c0_i32_0 = arith.constant 0 : i32
    %c0_i32_1 = arith.constant 0 : i32
    return %c0_i32, %c0_i32_0 : i32, i32
  }
  func.func @transform_4(%arg0: i32, %arg1: i32) -> (i32, i32) {
    %c0_i32 = arith.constant 0 : i32
    %c0_i32_0 = arith.constant 0 : i32
    %c0_i32_1 = arith.constant 0 : i32
    return %c0_i32, %c0_i32_0 : i32, i32
  }
  func.func @transform_5(%arg0: i32, %arg1: i32) -> (i32, i32) {
    %c0_i32 = arith.constant 0 : i32
    %c0_i32_0 = arith.constant 0 : i32
    %c0_i32_1 = arith.constant 0 : i32
    return %c0_i32, %c0_i32_0 : i32, i32
  }
  func.func @transform_6(%arg0: i32, %arg1: i32) -> (i32, i32) {
    %c0_i32 = arith.constant 0 : i32
    %c0_i32_0 = arith.constant 0 : i32
    %c0_i32_1 = arith.constant 0 : i32
    return %c0_i32, %c0_i32_0 : i32, i32
  }
  func.func @transform_7(%arg0: i32, %arg1: i32) -> (i32, i32) {
    %c0_i32 = arith.constant 0 : i32
    %c0_i32_0 = arith.constant 0 : i32
    return %c0_i32, %arg1 : i32, i32
  }
  func.func @transform_8(%arg0: i32, %arg1: i32) -> (i32, i32) {
    %c0_i32 = arith.constant 0 : i32
    %c0_i32_0 = arith.constant 0 : i32
    return %c0_i32, %arg1 : i32, i32
  }
  func.func @transform_9(%arg0: i32, %arg1: i32) -> (i32, i32) {
    %c0_i32 = arith.constant 0 : i32
    %c0_i32_0 = arith.constant 0 : i32
    return %arg1, %c0_i32 : i32, i32
  }
  func.func @transform_10(%arg0: i32, %arg1: i32) -> (i32, i32) {
    %c0_i32 = arith.constant 0 : i32
    %c0_i32_0 = arith.constant 0 : i32
    %c0_i32_1 = arith.constant 0 : i32
    return %c0_i32, %c0_i32_0 : i32, i32
  }
  func.func @transform_11(%arg0: i32, %arg1: i32) -> (i32, i32) {
    %c0_i32 = arith.constant 0 : i32
    %c0_i32_0 = arith.constant 0 : i32
    %c0_i32_1 = arith.constant 0 : i32
    return %c0_i32, %c0_i32_0 : i32, i32
  }
  func.func @transform_12(%arg0: i32, %arg1: i32) -> (i32, i32) {
    %c0_i32 = arith.constant 0 : i32
    %c0_i32_0 = arith.constant 0 : i32
    %c0_i32_1 = arith.constant 0 : i32
    return %c0_i32, %c0_i32_0 : i32, i32
  }
  func.func @transform_13(%arg0: i32, %arg1: i32) -> (i32, i32, i32) {
    %c0_i32 = arith.constant 0 : i32
    %c0_i32_0 = arith.constant 0 : i32
    %c0_i32_1 = arith.constant 0 : i32
    return %arg0, %c0_i32, %c0_i32_0 : i32, i32, i32
  }
}

module attributes {stable_mosaic.version = 11 : i64} {
  func.func @encoder_kernel(%arg0: i32, %arg1: i32, %arg2: memref<2x8x32xf32, #tpu.memory_space<vmem>>, %arg3: memref<32x96xbf16, #tpu.memory_space<vmem>>, %arg4: memref<1x96xf32, #tpu.memory_space<vmem>>, %arg5: memref<32x32xbf16, #tpu.memory_space<vmem>>, %arg6: memref<1x32xf32, #tpu.memory_space<vmem>>, %arg7: memref<1x32xf32, #tpu.memory_space<vmem>>, %arg8: memref<1x32xf32, #tpu.memory_space<vmem>>, %arg9: memref<32x64xbf16, #tpu.memory_space<vmem>>, %arg10: memref<1x64xf32, #tpu.memory_space<vmem>>, %arg11: memref<64x32xbf16, #tpu.memory_space<vmem>>, %arg12: memref<1x32xf32, #tpu.memory_space<vmem>>, %arg13: memref<1x32xf32, #tpu.memory_space<vmem>>, %arg14: memref<1x32xf32, #tpu.memory_space<vmem>>, %arg15: memref<2x8x32xf32, #tpu.memory_space<vmem>>, %arg16: memref<16x96xbf16, #tpu.memory_space<vmem>>, %arg17: memref<16x32xbf16, #tpu.memory_space<vmem>>, %arg18: memref<16x32xf32, #tpu.memory_space<vmem>>, %arg19: memref<16x32xbf16, #tpu.memory_space<vmem>>, %arg20: memref<16x32xf32, #tpu.memory_space<vmem>>) attributes {dimension_semantics = [#tpu.dimension_semantics<parallel>, #tpu.dimension_semantics<arbitrary>], iteration_bounds = array<i64: 1, 1>, scalar_prefetch = 0 : i64, scratch_operands = 5 : i64, tpu.core_type = #tpu.core_type<tc>, window_params = [{transform_indices = @transform_0, window_bounds = array<i64: 2, 8, 32>}, {pipeline_mode = #tpu.pipeline_mode<synchronous>, transform_indices = @transform_1, window_bounds = array<i64: 32, 96>}, {pipeline_mode = #tpu.pipeline_mode<synchronous>, transform_indices = @transform_2, window_bounds = array<i64: 1, 96>}, {pipeline_mode = #tpu.pipeline_mode<synchronous>, transform_indices = @transform_3, window_bounds = array<i64: 32, 32>}, {pipeline_mode = #tpu.pipeline_mode<synchronous>, transform_indices = @transform_4, window_bounds = array<i64: 1, 32>}, {pipeline_mode = #tpu.pipeline_mode<synchronous>, transform_indices = @transform_5, window_bounds = array<i64: 1, 32>}, {pipeline_mode = #tpu.pipeline_mode<synchronous>, transform_indices = @transform_6, window_bounds = array<i64: 1, 32>}, {transform_indices = @transform_7, window_bounds = array<i64: 32, 64>}, {transform_indices = @transform_8, window_bounds = array<i64: 1, 64>}, {transform_indices = @transform_9, window_bounds = array<i64: 64, 32>}, {pipeline_mode = #tpu.pipeline_mode<synchronous>, transform_indices = @transform_10, window_bounds = array<i64: 1, 32>}, {pipeline_mode = #tpu.pipeline_mode<synchronous>, transform_indices = @transform_11, window_bounds = array<i64: 1, 32>}, {pipeline_mode = #tpu.pipeline_mode<synchronous>, transform_indices = @transform_12, window_bounds = array<i64: 1, 32>}, {transform_indices = @transform_13, window_bounds = array<i64: 2, 8, 32>}]} {
    %c0_i32 = arith.constant 0 : i32
    %0 = arith.cmpi eq, %arg1, %c0_i32 : i32
    %1 = arith.extui %0 : i1 to i32
    %c0_i32_0 = arith.constant 0 : i32
    %2 = arith.cmpi ne, %1, %c0_i32_0 : i32
    scf.if %2 {
      %c0_16 = arith.constant 0 : index
      %c0_17 = arith.constant 0 : index
      %c0_18 = arith.constant 0 : index
      %20 = vector.load %arg2[%c0_16, %c0_17, %c0_18] : memref<2x8x32xf32, #tpu.memory_space<vmem>>, vector<2x8x32xf32>
      %21 = vector.shape_cast %20 : vector<2x8x32xf32> to vector<16x32xf32>
      %22 = arith.truncf %21 : vector<16x32xf32> to vector<16x32xbf16>
      %c0_19 = arith.constant 0 : index
      %c0_20 = arith.constant 0 : index
      %23 = vector.load %arg3[%c0_19, %c0_20] : memref<32x96xbf16, #tpu.memory_space<vmem>>, vector<32x96xbf16>
      %cst_21 = arith.constant dense<0.000000e+00> : vector<16x96xf32>
      %24 = tpu.matmul %22, %23, %cst_21 {dimension_numbers = #tpu.dot_dimension_numbers<[1], [0], [0], [1], [0, 0, 1, 1], [], []>} : vector<16x32xbf16>, vector<32x96xbf16>, vector<16x96xf32> -> vector<16x96xf32>
      %c0_22 = arith.constant 0 : index
      %c0_23 = arith.constant 0 : index
      %25 = vector.load %arg4[%c0_22, %c0_23] : memref<1x96xf32, #tpu.memory_space<vmem>>, vector<1x96xf32>
      %26 = vector.broadcast %25 : vector<1x96xf32> to vector<16x96xf32>
      %27 = arith.addf %24, %26 : vector<16x96xf32>
      %28 = arith.truncf %27 : vector<16x96xf32> to vector<16x96xbf16>
      %c0_24 = arith.constant 0 : index
      %c0_25 = arith.constant 0 : index
      %29 = vector.load %arg16[%c0_24, %c0_25] : memref<16x96xbf16, #tpu.memory_space<vmem>>, vector<16x96xbf16>
      tpu.vector_store %arg16[%c0_24, %c0_25], %28 {strides = array<i32>} : memref<16x96xbf16, #tpu.memory_space<vmem>>, vector<16x96xbf16>,
      %c0_26 = arith.constant 0 : index
      %c0_27 = arith.constant 0 : index
      %30 = vector.load %arg16[%c0_26, %c0_27] : memref<16x96xbf16, #tpu.memory_space<vmem>>, vector<8x8xbf16>
      %c0_28 = arith.constant 0 : index
      %c32 = arith.constant 32 : index
      %31 = vector.load %arg16[%c0_28, %c32] : memref<16x96xbf16, #tpu.memory_space<vmem>>, vector<8x8xbf16>
      %c0_29 = arith.constant 0 : index
      %c64 = arith.constant 64 : index
      %32 = vector.load %arg16[%c0_29, %c64] : memref<16x96xbf16, #tpu.memory_space<vmem>>, vector<8x8xbf16>
      %cst_30 = arith.constant dense<0.000000e+00> : vector<8x8xf32>
      %33 = tpu.matmul %30, %31, %cst_30 {dimension_numbers = #tpu.dot_dimension_numbers<[1], [1], [0], [0], [0, 0, 1, 0], [], []>} : vector<8x8xbf16>, vector<8x8xbf16>, vector<8x8xf32> -> vector<8x8xf32>
      %cst_31 = arith.constant dense<0xFF800000> : vector<8xf32>
      %34 = vector.multi_reduction <maximumf>, %33, %cst_31 [1] : vector<8x8xf32> to vector<8xf32>
      %35 = vector.shape_cast %34 : vector<8xf32> to vector<8x1xf32>
      %36 = vector.broadcast %35 : vector<8x1xf32> to vector<8x8xf32>
      %37 = arith.subf %33, %36 : vector<8x8xf32>
      %38 = math.exp %37 : vector<8x8xf32>
      %cst_32 = arith.constant dense<0.000000e+00> : vector<8xf32>
      %39 = vector.multi_reduction <add>, %38, %cst_32 [1] : vector<8x8xf32> to vector<8xf32>
      %40 = vector.shape_cast %39 : vector<8xf32> to vector<8x1xf32>
      %41 = tpu.reciprocal %40 {approx = true} : vector<8x1xf32> -> vector<8x1xf32>
      %42 = arith.truncf %38 : vector<8x8xf32> to vector<8x8xbf16>
      %cst_33 = arith.constant dense<0.000000e+00> : vector<8x8xf32>
      %43 = tpu.matmul %42, %32, %cst_33 {dimension_numbers = #tpu.dot_dimension_numbers<[1], [0], [0], [1], [0, 0, 1, 1], [], []>} : vector<8x8xbf16>, vector<8x8xbf16>, vector<8x8xf32> -> vector<8x8xf32>
      %44 = vector.broadcast %41 : vector<8x1xf32> to vector<8x8xf32>
      %45 = arith.mulf %43, %44 : vector<8x8xf32>
      %46 = arith.truncf %45 : vector<8x8xf32> to vector<8x8xbf16>
      %c0_34 = arith.constant 0 : index
      %c0_35 = arith.constant 0 : index
      %47 = vector.load %arg17[%c0_34, %c0_35] : memref<16x32xbf16, #tpu.memory_space<vmem>>, vector<8x8xbf16>
      tpu.vector_store %arg17[%c0_34, %c0_35], %46 {strides = array<i32>} : memref<16x32xbf16, #tpu.memory_space<vmem>>, vector<8x8xbf16>,
      %c0_36 = arith.constant 0 : index
      %c8 = arith.constant 8 : index
      %48 = vector.load %arg16[%c0_36, %c8] : memref<16x96xbf16, #tpu.memory_space<vmem>>, vector<8x8xbf16>
      %c0_37 = arith.constant 0 : index
      %c40 = arith.constant 40 : index
      %49 = vector.load %arg16[%c0_37, %c40] : memref<16x96xbf16, #tpu.memory_space<vmem>>, vector<8x8xbf16>
      %c0_38 = arith.constant 0 : index
      %c72 = arith.constant 72 : index
      %50 = vector.load %arg16[%c0_38, %c72] : memref<16x96xbf16, #tpu.memory_space<vmem>>, vector<8x8xbf16>
      %cst_39 = arith.constant dense<0.000000e+00> : vector<8x8xf32>
      %51 = tpu.matmul %48, %49, %cst_39 {dimension_numbers = #tpu.dot_dimension_numbers<[1], [1], [0], [0], [0, 0, 1, 0], [], []>} : vector<8x8xbf16>, vector<8x8xbf16>, vector<8x8xf32> -> vector<8x8xf32>
      %cst_40 = arith.constant dense<0xFF800000> : vector<8xf32>
      %52 = vector.multi_reduction <maximumf>, %51, %cst_40 [1] : vector<8x8xf32> to vector<8xf32>
      %53 = vector.shape_cast %52 : vector<8xf32> to vector<8x1xf32>
      %54 = vector.broadcast %53 : vector<8x1xf32> to vector<8x8xf32>
      %55 = arith.subf %51, %54 : vector<8x8xf32>
      %56 = math.exp %55 : vector<8x8xf32>
      %cst_41 = arith.constant dense<0.000000e+00> : vector<8xf32>
      %57 = vector.multi_reduction <add>, %56, %cst_41 [1] : vector<8x8xf32> to vector<8xf32>
      %58 = vector.shape_cast %57 : vector<8xf32> to vector<8x1xf32>
      %59 = tpu.reciprocal %58 {approx = true} : vector<8x1xf32> -> vector<8x1xf32>
      %60 = arith.truncf %56 : vector<8x8xf32> to vector<8x8xbf16>
      %cst_42 = arith.constant dense<0.000000e+00> : vector<8x8xf32>
      %61 = tpu.matmul %60, %50, %cst_42 {dimension_numbers = #tpu.dot_dimension_numbers<[1], [0], [0], [1], [0, 0, 1, 1], [], []>} : vector<8x8xbf16>, vector<8x8xbf16>, vector<8x8xf32> -> vector<8x8xf32>
      %62 = vector.broadcast %59 : vector<8x1xf32> to vector<8x8xf32>
      %63 = arith.mulf %61, %62 : vector<8x8xf32>
      %64 = arith.truncf %63 : vector<8x8xf32> to vector<8x8xbf16>
      %c0_43 = arith.constant 0 : index
      %c8_44 = arith.constant 8 : index
      %65 = vector.load %arg17[%c0_43, %c8_44] : memref<16x32xbf16, #tpu.memory_space<vmem>>, vector<8x8xbf16>
      tpu.vector_store %arg17[%c0_43, %c8_44], %64 {strides = array<i32>} : memref<16x32xbf16, #tpu.memory_space<vmem>>, vector<8x8xbf16>,
      %c0_45 = arith.constant 0 : index
      %c16 = arith.constant 16 : index
      %66 = vector.load %arg16[%c0_45, %c16] : memref<16x96xbf16, #tpu.memory_space<vmem>>, vector<8x8xbf16>
      %c0_46 = arith.constant 0 : index
      %c48 = arith.constant 48 : index
      %67 = vector.load %arg16[%c0_46, %c48] : memref<16x96xbf16, #tpu.memory_space<vmem>>, vector<8x8xbf16>
      %c0_47 = arith.constant 0 : index
      %c80 = arith.constant 80 : index
      %68 = vector.load %arg16[%c0_47, %c80] : memref<16x96xbf16, #tpu.memory_space<vmem>>, vector<8x8xbf16>
      %cst_48 = arith.constant dense<0.000000e+00> : vector<8x8xf32>
      %69 = tpu.matmul %66, %67, %cst_48 {dimension_numbers = #tpu.dot_dimension_numbers<[1], [1], [0], [0], [0, 0, 1, 0], [], []>} : vector<8x8xbf16>, vector<8x8xbf16>, vector<8x8xf32> -> vector<8x8xf32>
      %cst_49 = arith.constant dense<0xFF800000> : vector<8xf32>
      %70 = vector.multi_reduction <maximumf>, %69, %cst_49 [1] : vector<8x8xf32> to vector<8xf32>
      %71 = vector.shape_cast %70 : vector<8xf32> to vector<8x1xf32>
      %72 = vector.broadcast %71 : vector<8x1xf32> to vector<8x8xf32>
      %73 = arith.subf %69, %72 : vector<8x8xf32>
      %74 = math.exp %73 : vector<8x8xf32>
      %cst_50 = arith.constant dense<0.000000e+00> : vector<8xf32>
      %75 = vector.multi_reduction <add>, %74, %cst_50 [1] : vector<8x8xf32> to vector<8xf32>
      %76 = vector.shape_cast %75 : vector<8xf32> to vector<8x1xf32>
      %77 = tpu.reciprocal %76 {approx = true} : vector<8x1xf32> -> vector<8x1xf32>
      %78 = arith.truncf %74 : vector<8x8xf32> to vector<8x8xbf16>
      %cst_51 = arith.constant dense<0.000000e+00> : vector<8x8xf32>
      %79 = tpu.matmul %78, %68, %cst_51 {dimension_numbers = #tpu.dot_dimension_numbers<[1], [0], [0], [1], [0, 0, 1, 1], [], []>} : vector<8x8xbf16>, vector<8x8xbf16>, vector<8x8xf32> -> vector<8x8xf32>
      %80 = vector.broadcast %77 : vector<8x1xf32> to vector<8x8xf32>
      %81 = arith.mulf %79, %80 : vector<8x8xf32>
      %82 = arith.truncf %81 : vector<8x8xf32> to vector<8x8xbf16>
      %c0_52 = arith.constant 0 : index
      %c16_53 = arith.constant 16 : index
      %83 = vector.load %arg17[%c0_52, %c16_53] : memref<16x32xbf16, #tpu.memory_space<vmem>>, vector<8x8xbf16>
      tpu.vector_store %arg17[%c0_52, %c16_53], %82 {strides = array<i32>} : memref<16x32xbf16, #tpu.memory_space<vmem>>, vector<8x8xbf16>,
      %c0_54 = arith.constant 0 : index
      %c24 = arith.constant 24 : index
      %84 = vector.load %arg16[%c0_54, %c24] : memref<16x96xbf16, #tpu.memory_space<vmem>>, vector<8x8xbf16>
      %c0_55 = arith.constant 0 : index
      %c56 = arith.constant 56 : index
      %85 = vector.load %arg16[%c0_55, %c56] : memref<16x96xbf16, #tpu.memory_space<vmem>>, vector<8x8xbf16>
      %c0_56 = arith.constant 0 : index
      %c88 = arith.constant 88 : index
      %86 = vector.load %arg16[%c0_56, %c88] : memref<16x96xbf16, #tpu.memory_space<vmem>>, vector<8x8xbf16>
      %cst_57 = arith.constant dense<0.000000e+00> : vector<8x8xf32>
      %87 = tpu.matmul %84, %85, %cst_57 {dimension_numbers = #tpu.dot_dimension_numbers<[1], [1], [0], [0], [0, 0, 1, 0], [], []>} : vector<8x8xbf16>, vector<8x8xbf16>, vector<8x8xf32> -> vector<8x8xf32>
      %cst_58 = arith.constant dense<0xFF800000> : vector<8xf32>
      %88 = vector.multi_reduction <maximumf>, %87, %cst_58 [1] : vector<8x8xf32> to vector<8xf32>
      %89 = vector.shape_cast %88 : vector<8xf32> to vector<8x1xf32>
      %90 = vector.broadcast %89 : vector<8x1xf32> to vector<8x8xf32>
      %91 = arith.subf %87, %90 : vector<8x8xf32>
      %92 = math.exp %91 : vector<8x8xf32>
      %cst_59 = arith.constant dense<0.000000e+00> : vector<8xf32>
      %93 = vector.multi_reduction <add>, %92, %cst_59 [1] : vector<8x8xf32> to vector<8xf32>
      %94 = vector.shape_cast %93 : vector<8xf32> to vector<8x1xf32>
      %95 = tpu.reciprocal %94 {approx = true} : vector<8x1xf32> -> vector<8x1xf32>
      %96 = arith.truncf %92 : vector<8x8xf32> to vector<8x8xbf16>
      %cst_60 = arith.constant dense<0.000000e+00> : vector<8x8xf32>
      %97 = tpu.matmul %96, %86, %cst_60 {dimension_numbers = #tpu.dot_dimension_numbers<[1], [0], [0], [1], [0, 0, 1, 1], [], []>} : vector<8x8xbf16>, vector<8x8xbf16>, vector<8x8xf32> -> vector<8x8xf32>
      %98 = vector.broadcast %95 : vector<8x1xf32> to vector<8x8xf32>
      %99 = arith.mulf %97, %98 : vector<8x8xf32>
      %100 = arith.truncf %99 : vector<8x8xf32> to vector<8x8xbf16>
      %c0_61 = arith.constant 0 : index
      %c24_62 = arith.constant 24 : index
      %101 = vector.load %arg17[%c0_61, %c24_62] : memref<16x32xbf16, #tpu.memory_space<vmem>>, vector<8x8xbf16>
      tpu.vector_store %arg17[%c0_61, %c24_62], %100 {strides = array<i32>} : memref<16x32xbf16, #tpu.memory_space<vmem>>, vector<8x8xbf16>,
      %c8_63 = arith.constant 8 : index
      %c0_64 = arith.constant 0 : index
      %102 = vector.load %arg16[%c8_63, %c0_64] : memref<16x96xbf16, #tpu.memory_space<vmem>>, vector<8x8xbf16>
      %c8_65 = arith.constant 8 : index
      %c32_66 = arith.constant 32 : index
      %103 = vector.load %arg16[%c8_65, %c32_66] : memref<16x96xbf16, #tpu.memory_space<vmem>>, vector<8x8xbf16>
      %c8_67 = arith.constant 8 : index
      %c64_68 = arith.constant 64 : index
      %104 = vector.load %arg16[%c8_67, %c64_68] : memref<16x96xbf16, #tpu.memory_space<vmem>>, vector<8x8xbf16>
      %cst_69 = arith.constant dense<0.000000e+00> : vector<8x8xf32>
      %105 = tpu.matmul %102, %103, %cst_69 {dimension_numbers = #tpu.dot_dimension_numbers<[1], [1], [0], [0], [0, 0, 1, 0], [], []>} : vector<8x8xbf16>, vector<8x8xbf16>, vector<8x8xf32> -> vector<8x8xf32>
      %cst_70 = arith.constant dense<0xFF800000> : vector<8xf32>
      %106 = vector.multi_reduction <maximumf>, %105, %cst_70 [1] : vector<8x8xf32> to vector<8xf32>
      %107 = vector.shape_cast %106 : vector<8xf32> to vector<8x1xf32>
      %108 = vector.broadcast %107 : vector<8x1xf32> to vector<8x8xf32>
      %109 = arith.subf %105, %108 : vector<8x8xf32>
      %110 = math.exp %109 : vector<8x8xf32>
      %cst_71 = arith.constant dense<0.000000e+00> : vector<8xf32>
      %111 = vector.multi_reduction <add>, %110, %cst_71 [1] : vector<8x8xf32> to vector<8xf32>
      %112 = vector.shape_cast %111 : vector<8xf32> to vector<8x1xf32>
      %113 = tpu.reciprocal %112 {approx = true} : vector<8x1xf32> -> vector<8x1xf32>
      %114 = arith.truncf %110 : vector<8x8xf32> to vector<8x8xbf16>
      %cst_72 = arith.constant dense<0.000000e+00> : vector<8x8xf32>
      %115 = tpu.matmul %114, %104, %cst_72 {dimension_numbers = #tpu.dot_dimension_numbers<[1], [0], [0], [1], [0, 0, 1, 1], [], []>} : vector<8x8xbf16>, vector<8x8xbf16>, vector<8x8xf32> -> vector<8x8xf32>
      %116 = vector.broadcast %113 : vector<8x1xf32> to vector<8x8xf32>
      %117 = arith.mulf %115, %116 : vector<8x8xf32>
      %118 = arith.truncf %117 : vector<8x8xf32> to vector<8x8xbf16>
      %c8_73 = arith.constant 8 : index
      %c0_74 = arith.constant 0 : index
      %119 = vector.load %arg17[%c8_73, %c0_74] : memref<16x32xbf16, #tpu.memory_space<vmem>>, vector<8x8xbf16>
      tpu.vector_store %arg17[%c8_73, %c0_74], %118 {strides = array<i32>} : memref<16x32xbf16, #tpu.memory_space<vmem>>, vector<8x8xbf16>,
      %c8_75 = arith.constant 8 : index
      %c8_76 = arith.constant 8 : index
      %120 = vector.load %arg16[%c8_75, %c8_76] : memref<16x96xbf16, #tpu.memory_space<vmem>>, vector<8x8xbf16>
      %c8_77 = arith.constant 8 : index
      %c40_78 = arith.constant 40 : index
      %121 = vector.load %arg16[%c8_77, %c40_78] : memref<16x96xbf16, #tpu.memory_space<vmem>>, vector<8x8xbf16>
      %c8_79 = arith.constant 8 : index
      %c72_80 = arith.constant 72 : index
      %122 = vector.load %arg16[%c8_79, %c72_80] : memref<16x96xbf16, #tpu.memory_space<vmem>>, vector<8x8xbf16>
      %cst_81 = arith.constant dense<0.000000e+00> : vector<8x8xf32>
      %123 = tpu.matmul %120, %121, %cst_81 {dimension_numbers = #tpu.dot_dimension_numbers<[1], [1], [0], [0], [0, 0, 1, 0], [], []>} : vector<8x8xbf16>, vector<8x8xbf16>, vector<8x8xf32> -> vector<8x8xf32>
      %cst_82 = arith.constant dense<0xFF800000> : vector<8xf32>
      %124 = vector.multi_reduction <maximumf>, %123, %cst_82 [1] : vector<8x8xf32> to vector<8xf32>
      %125 = vector.shape_cast %124 : vector<8xf32> to vector<8x1xf32>
      %126 = vector.broadcast %125 : vector<8x1xf32> to vector<8x8xf32>
      %127 = arith.subf %123, %126 : vector<8x8xf32>
      %128 = math.exp %127 : vector<8x8xf32>
      %cst_83 = arith.constant dense<0.000000e+00> : vector<8xf32>
      %129 = vector.multi_reduction <add>, %128, %cst_83 [1] : vector<8x8xf32> to vector<8xf32>
      %130 = vector.shape_cast %129 : vector<8xf32> to vector<8x1xf32>
      %131 = tpu.reciprocal %130 {approx = true} : vector<8x1xf32> -> vector<8x1xf32>
      %132 = arith.truncf %128 : vector<8x8xf32> to vector<8x8xbf16>
      %cst_84 = arith.constant dense<0.000000e+00> : vector<8x8xf32>
      %133 = tpu.matmul %132, %122, %cst_84 {dimension_numbers = #tpu.dot_dimension_numbers<[1], [0], [0], [1], [0, 0, 1, 1], [], []>} : vector<8x8xbf16>, vector<8x8xbf16>, vector<8x8xf32> -> vector<8x8xf32>
      %134 = vector.broadcast %131 : vector<8x1xf32> to vector<8x8xf32>
      %135 = arith.mulf %133, %134 : vector<8x8xf32>
      %136 = arith.truncf %135 : vector<8x8xf32> to vector<8x8xbf16>
      %c8_85 = arith.constant 8 : index
      %c8_86 = arith.constant 8 : index
      %137 = vector.load %arg17[%c8_85, %c8_86] : memref<16x32xbf16, #tpu.memory_space<vmem>>, vector<8x8xbf16>
      tpu.vector_store %arg17[%c8_85, %c8_86], %136 {strides = array<i32>} : memref<16x32xbf16, #tpu.memory_space<vmem>>, vector<8x8xbf16>,
      %c8_87 = arith.constant 8 : index
      %c16_88 = arith.constant 16 : index
      %138 = vector.load %arg16[%c8_87, %c16_88] : memref<16x96xbf16, #tpu.memory_space<vmem>>, vector<8x8xbf16>
      %c8_89 = arith.constant 8 : index
      %c48_90 = arith.constant 48 : index
      %139 = vector.load %arg16[%c8_89, %c48_90] : memref<16x96xbf16, #tpu.memory_space<vmem>>, vector<8x8xbf16>
      %c8_91 = arith.constant 8 : index
      %c80_92 = arith.constant 80 : index
      %140 = vector.load %arg16[%c8_91, %c80_92] : memref<16x96xbf16, #tpu.memory_space<vmem>>, vector<8x8xbf16>
      %cst_93 = arith.constant dense<0.000000e+00> : vector<8x8xf32>
      %141 = tpu.matmul %138, %139, %cst_93 {dimension_numbers = #tpu.dot_dimension_numbers<[1], [1], [0], [0], [0, 0, 1, 0], [], []>} : vector<8x8xbf16>, vector<8x8xbf16>, vector<8x8xf32> -> vector<8x8xf32>
      %cst_94 = arith.constant dense<0xFF800000> : vector<8xf32>
      %142 = vector.multi_reduction <maximumf>, %141, %cst_94 [1] : vector<8x8xf32> to vector<8xf32>
      %143 = vector.shape_cast %142 : vector<8xf32> to vector<8x1xf32>
      %144 = vector.broadcast %143 : vector<8x1xf32> to vector<8x8xf32>
      %145 = arith.subf %141, %144 : vector<8x8xf32>
      %146 = math.exp %145 : vector<8x8xf32>
      %cst_95 = arith.constant dense<0.000000e+00> : vector<8xf32>
      %147 = vector.multi_reduction <add>, %146, %cst_95 [1] : vector<8x8xf32> to vector<8xf32>
      %148 = vector.shape_cast %147 : vector<8xf32> to vector<8x1xf32>
      %149 = tpu.reciprocal %148 {approx = true} : vector<8x1xf32> -> vector<8x1xf32>
      %150 = arith.truncf %146 : vector<8x8xf32> to vector<8x8xbf16>
      %cst_96 = arith.constant dense<0.000000e+00> : vector<8x8xf32>
      %151 = tpu.matmul %150, %140, %cst_96 {dimension_numbers = #tpu.dot_dimension_numbers<[1], [0], [0], [1], [0, 0, 1, 1], [], []>} : vector<8x8xbf16>, vector<8x8xbf16>, vector<8x8xf32> -> vector<8x8xf32>
      %152 = vector.broadcast %149 : vector<8x1xf32> to vector<8x8xf32>
      %153 = arith.mulf %151, %152 : vector<8x8xf32>
      %154 = arith.truncf %153 : vector<8x8xf32> to vector<8x8xbf16>
      %c8_97 = arith.constant 8 : index
      %c16_98 = arith.constant 16 : index
      %155 = vector.load %arg17[%c8_97, %c16_98] : memref<16x32xbf16, #tpu.memory_space<vmem>>, vector<8x8xbf16>
      tpu.vector_store %arg17[%c8_97, %c16_98], %154 {strides = array<i32>} : memref<16x32xbf16, #tpu.memory_space<vmem>>, vector<8x8xbf16>,
      %c8_99 = arith.constant 8 : index
      %c24_100 = arith.constant 24 : index
      %156 = vector.load %arg16[%c8_99, %c24_100] : memref<16x96xbf16, #tpu.memory_space<vmem>>, vector<8x8xbf16>
      %c8_101 = arith.constant 8 : index
      %c56_102 = arith.constant 56 : index
      %157 = vector.load %arg16[%c8_101, %c56_102] : memref<16x96xbf16, #tpu.memory_space<vmem>>, vector<8x8xbf16>
      %c8_103 = arith.constant 8 : index
      %c88_104 = arith.constant 88 : index
      %158 = vector.load %arg16[%c8_103, %c88_104] : memref<16x96xbf16, #tpu.memory_space<vmem>>, vector<8x8xbf16>
      %cst_105 = arith.constant dense<0.000000e+00> : vector<8x8xf32>
      %159 = tpu.matmul %156, %157, %cst_105 {dimension_numbers = #tpu.dot_dimension_numbers<[1], [1], [0], [0], [0, 0, 1, 0], [], []>} : vector<8x8xbf16>, vector<8x8xbf16>, vector<8x8xf32> -> vector<8x8xf32>
      %cst_106 = arith.constant dense<0xFF800000> : vector<8xf32>
      %160 = vector.multi_reduction <maximumf>, %159, %cst_106 [1] : vector<8x8xf32> to vector<8xf32>
      %161 = vector.shape_cast %160 : vector<8xf32> to vector<8x1xf32>
      %162 = vector.broadcast %161 : vector<8x1xf32> to vector<8x8xf32>
      %163 = arith.subf %159, %162 : vector<8x8xf32>
      %164 = math.exp %163 : vector<8x8xf32>
      %cst_107 = arith.constant dense<0.000000e+00> : vector<8xf32>
      %165 = vector.multi_reduction <add>, %164, %cst_107 [1] : vector<8x8xf32> to vector<8xf32>
      %166 = vector.shape_cast %165 : vector<8xf32> to vector<8x1xf32>
      %167 = tpu.reciprocal %166 {approx = true} : vector<8x1xf32> -> vector<8x1xf32>
      %168 = arith.truncf %164 : vector<8x8xf32> to vector<8x8xbf16>
      %cst_108 = arith.constant dense<0.000000e+00> : vector<8x8xf32>
      %169 = tpu.matmul %168, %158, %cst_108 {dimension_numbers = #tpu.dot_dimension_numbers<[1], [0], [0], [1], [0, 0, 1, 1], [], []>} : vector<8x8xbf16>, vector<8x8xbf16>, vector<8x8xf32> -> vector<8x8xf32>
      %170 = vector.broadcast %167 : vector<8x1xf32> to vector<8x8xf32>
      %171 = arith.mulf %169, %170 : vector<8x8xf32>
      %172 = arith.truncf %171 : vector<8x8xf32> to vector<8x8xbf16>
      %c8_109 = arith.constant 8 : index
      %c24_110 = arith.constant 24 : index
      %173 = vector.load %arg17[%c8_109, %c24_110] : memref<16x32xbf16, #tpu.memory_space<vmem>>, vector<8x8xbf16>
      tpu.vector_store %arg17[%c8_109, %c24_110], %172 {strides = array<i32>} : memref<16x32xbf16, #tpu.memory_space<vmem>>, vector<8x8xbf16>,
      %c0_111 = arith.constant 0 : index
      %c0_112 = arith.constant 0 : index
      %174 = vector.load %arg17[%c0_111, %c0_112] : memref<16x32xbf16, #tpu.memory_space<vmem>>, vector<16x32xbf16>
      %c0_113 = arith.constant 0 : index
      %c0_114 = arith.constant 0 : index
      %175 = vector.load %arg5[%c0_113, %c0_114] : memref<32x32xbf16, #tpu.memory_space<vmem>>, vector<32x32xbf16>
      %cst_115 = arith.constant dense<0.000000e+00> : vector<16x32xf32>
      %176 = tpu.matmul %174, %175, %cst_115 {dimension_numbers = #tpu.dot_dimension_numbers<[1], [0], [0], [1], [0, 0, 1, 1], [], []>} : vector<16x32xbf16>, vector<32x32xbf16>, vector<16x32xf32> -> vector<16x32xf32>
      %c0_116 = arith.constant 0 : index
      %c0_117 = arith.constant 0 : index
      %177 = vector.load %arg6[%c0_116, %c0_117] : memref<1x32xf32, #tpu.memory_space<vmem>>, vector<1x32xf32>
      %178 = vector.broadcast %177 : vector<1x32xf32> to vector<16x32xf32>
      %179 = arith.addf %176, %178 : vector<16x32xf32>
      %180 = arith.addf %21, %179 : vector<16x32xf32>
      %c0_118 = arith.constant 0 : index
      %c0_119 = arith.constant 0 : index
      %181 = vector.load %arg7[%c0_118, %c0_119] : memref<1x32xf32, #tpu.memory_space<vmem>>, vector<1x32xf32>
      %c0_120 = arith.constant 0 : index
      %c0_121 = arith.constant 0 : index
      %182 = vector.load %arg8[%c0_120, %c0_121] : memref<1x32xf32, #tpu.memory_space<vmem>>, vector<1x32xf32>
      %cst_122 = arith.constant dense<0.000000e+00> : vector<16xf32>
      %183 = vector.multi_reduction <add>, %180, %cst_122 [1] : vector<16x32xf32> to vector<16xf32>
      %184 = vector.shape_cast %183 : vector<16xf32> to vector<16x1xf32>
      %cst_123 = arith.constant 3.200000e+01 : f32
      %185 = vector.broadcast %cst_123 : f32 to vector<16x1xf32>
      %186 = arith.divf %184, %185 : vector<16x1xf32>
      %187 = vector.broadcast %186 : vector<16x1xf32> to vector<16x32xf32>
      %188 = arith.subf %180, %187 : vector<16x32xf32>
      %189 = arith.mulf %188, %188 : vector<16x32xf32>
      %cst_124 = arith.constant dense<0.000000e+00> : vector<16xf32>
      %190 = vector.multi_reduction <add>, %189, %cst_124 [1] : vector<16x32xf32> to vector<16xf32>
      %191 = vector.shape_cast %190 : vector<16xf32> to vector<16x1xf32>
      %cst_125 = arith.constant 3.200000e+01 : f32
      %192 = vector.broadcast %cst_125 : f32 to vector<16x1xf32>
      %193 = arith.divf %191, %192 : vector<16x1xf32>
      %194 = vector.broadcast %186 : vector<16x1xf32> to vector<16x32xf32>
      %195 = arith.subf %180, %194 : vector<16x32xf32>
      %cst_126 = arith.constant 9.99999974E-6 : f32
      %196 = vector.broadcast %cst_126 : f32 to vector<16x1xf32>
      %197 = arith.addf %193, %196 : vector<16x1xf32>
      %198 = math.rsqrt %197 : vector<16x1xf32>
      %199 = vector.broadcast %198 : vector<16x1xf32> to vector<16x32xf32>
      %200 = arith.mulf %195, %199 : vector<16x32xf32>
      %201 = vector.broadcast %181 : vector<1x32xf32> to vector<16x32xf32>
      %202 = arith.mulf %200, %201 : vector<16x32xf32>
      %203 = vector.broadcast %182 : vector<1x32xf32> to vector<16x32xf32>
      %204 = arith.addf %202, %203 : vector<16x32xf32>
      %c0_127 = arith.constant 0 : index
      %c0_128 = arith.constant 0 : index
      %205 = vector.load %arg18[%c0_127, %c0_128] : memref<16x32xf32, #tpu.memory_space<vmem>>, vector<16x32xf32>
      tpu.vector_store %arg18[%c0_127, %c0_128], %204 {strides = array<i32>} : memref<16x32xf32, #tpu.memory_space<vmem>>, vector<16x32xf32>,
      %206 = arith.truncf %204 : vector<16x32xf32> to vector<16x32xbf16>
      %c0_129 = arith.constant 0 : index
      %c0_130 = arith.constant 0 : index
      %207 = vector.load %arg19[%c0_129, %c0_130] : memref<16x32xbf16, #tpu.memory_space<vmem>>, vector<16x32xbf16>
      tpu.vector_store %arg19[%c0_129, %c0_130], %206 {strides = array<i32>} : memref<16x32xbf16, #tpu.memory_space<vmem>>, vector<16x32xbf16>,
      %cst_131 = arith.constant 0.000000e+00 : f32
      %208 = vector.broadcast %cst_131 : f32 to vector<16x32xf32>
      %c0_132 = arith.constant 0 : index
      %c0_133 = arith.constant 0 : index
      %209 = vector.load %arg20[%c0_132, %c0_133] : memref<16x32xf32, #tpu.memory_space<vmem>>, vector<16x32xf32>
      tpu.vector_store %arg20[%c0_132, %c0_133], %208 {strides = array<i32>} : memref<16x32xf32, #tpu.memory_space<vmem>>, vector<16x32xf32>,
    } else {
    }
    %c0 = arith.constant 0 : index
    %c0_1 = arith.constant 0 : index
    %3 = vector.load %arg19[%c0, %c0_1] : memref<16x32xbf16, #tpu.memory_space<vmem>>, vector<16x32xbf16>
    %c0_2 = arith.constant 0 : index
    %c0_3 = arith.constant 0 : index
    %4 = vector.load %arg9[%c0_2, %c0_3] : memref<32x64xbf16, #tpu.memory_space<vmem>>, vector<32x64xbf16>
    %cst = arith.constant dense<0.000000e+00> : vector<16x64xf32>
    %5 = tpu.matmul %3, %4, %cst {dimension_numbers = #tpu.dot_dimension_numbers<[1], [0], [0], [1], [0, 0, 1, 1], [], []>} : vector<16x32xbf16>, vector<32x64xbf16>, vector<16x64xf32> -> vector<16x64xf32>
    %c0_4 = arith.constant 0 : index
    %c0_5 = arith.constant 0 : index
    %6 = vector.load %arg10[%c0_4, %c0_5] : memref<1x64xf32, #tpu.memory_space<vmem>>, vector<1x64xf32>
    %7 = vector.broadcast %6 : vector<1x64xf32> to vector<16x64xf32>
    %8 = arith.addf %5, %7 : vector<16x64xf32>
    %cst_6 = arith.constant 0.000000e+00 : f32
    %9 = vector.broadcast %cst_6 : f32 to vector<16x64xf32>
    %10 = arith.maximumf %8, %9 : vector<16x64xf32>
    %c0_7 = arith.constant 0 : index
    %c0_8 = arith.constant 0 : index
    %11 = vector.load %arg20[%c0_7, %c0_8] : memref<16x32xf32, #tpu.memory_space<vmem>>, vector<16x32xf32>
    %12 = arith.truncf %10 : vector<16x64xf32> to vector<16x64xbf16>
    %c0_9 = arith.constant 0 : index
    %c0_10 = arith.constant 0 : index
    %13 = vector.load %arg11[%c0_9, %c0_10] : memref<64x32xbf16, #tpu.memory_space<vmem>>, vector<64x32xbf16>
    %cst_11 = arith.constant dense<0.000000e+00> : vector<16x32xf32>
    %14 = tpu.matmul %12, %13, %cst_11 {dimension_numbers = #tpu.dot_dimension_numbers<[1], [0], [0], [1], [0, 0, 1, 1], [], []>} : vector<16x64xbf16>, vector<64x32xbf16>, vector<16x32xf32> -> vector<16x32xf32>
    %15 = arith.addf %11, %14 : vector<16x32xf32>
    %c0_12 = arith.constant 0 : index
    %c0_13 = arith.constant 0 : index
    %16 = vector.load %arg20[%c0_12, %c0_13] : memref<16x32xf32, #tpu.memory_space<vmem>>, vector<16x32xf32>
    tpu.vector_store %arg20[%c0_12, %c0_13], %15 {strides = array<i32>} : memref<16x32xf32, #tpu.memory_space<vmem>>, vector<16x32xf32>,
    %c0_i32_14 = arith.constant 0 : i32
    %17 = arith.cmpi eq, %arg1, %c0_i32_14 : i32
    %18 = arith.extui %17 : i1 to i32
    %c0_i32_15 = arith.constant 0 : i32
    %19 = arith.cmpi ne, %18, %c0_i32_15 : i32
    scf.if %19 {
      %c0_16 = arith.constant 0 : index
      %c0_17 = arith.constant 0 : index
      %20 = vector.load %arg20[%c0_16, %c0_17] : memref<16x32xf32, #tpu.memory_space<vmem>>, vector<16x32xf32>
      %c0_18 = arith.constant 0 : index
      %c0_19 = arith.constant 0 : index
      %21 = vector.load %arg12[%c0_18, %c0_19] : memref<1x32xf32, #tpu.memory_space<vmem>>, vector<1x32xf32>
      %22 = vector.broadcast %21 : vector<1x32xf32> to vector<16x32xf32>
      %23 = arith.addf %20, %22 : vector<16x32xf32>
      %c0_20 = arith.constant 0 : index
      %c0_21 = arith.constant 0 : index
      %24 = vector.load %arg18[%c0_20, %c0_21] : memref<16x32xf32, #tpu.memory_space<vmem>>, vector<16x32xf32>
      %25 = arith.addf %24, %23 : vector<16x32xf32>
      %c0_22 = arith.constant 0 : index
      %c0_23 = arith.constant 0 : index
      %26 = vector.load %arg13[%c0_22, %c0_23] : memref<1x32xf32, #tpu.memory_space<vmem>>, vector<1x32xf32>
      %c0_24 = arith.constant 0 : index
      %c0_25 = arith.constant 0 : index
      %27 = vector.load %arg14[%c0_24, %c0_25] : memref<1x32xf32, #tpu.memory_space<vmem>>, vector<1x32xf32>
      %cst_26 = arith.constant dense<0.000000e+00> : vector<16xf32>
      %28 = vector.multi_reduction <add>, %25, %cst_26 [1] : vector<16x32xf32> to vector<16xf32>
      %29 = vector.shape_cast %28 : vector<16xf32> to vector<16x1xf32>
      %cst_27 = arith.constant 3.200000e+01 : f32
      %30 = vector.broadcast %cst_27 : f32 to vector<16x1xf32>
      %31 = arith.divf %29, %30 : vector<16x1xf32>
      %32 = vector.broadcast %31 : vector<16x1xf32> to vector<16x32xf32>
      %33 = arith.subf %25, %32 : vector<16x32xf32>
      %34 = arith.mulf %33, %33 : vector<16x32xf32>
      %cst_28 = arith.constant dense<0.000000e+00> : vector<16xf32>
      %35 = vector.multi_reduction <add>, %34, %cst_28 [1] : vector<16x32xf32> to vector<16xf32>
      %36 = vector.shape_cast %35 : vector<16xf32> to vector<16x1xf32>
      %cst_29 = arith.constant 3.200000e+01 : f32
      %37 = vector.broadcast %cst_29 : f32 to vector<16x1xf32>
      %38 = arith.divf %36, %37 : vector<16x1xf32>
      %39 = vector.broadcast %31 : vector<16x1xf32> to vector<16x32xf32>
      %40 = arith.subf %25, %39 : vector<16x32xf32>
      %cst_30 = arith.constant 9.99999974E-6 : f32
      %41 = vector.broadcast %cst_30 : f32 to vector<16x1xf32>
      %42 = arith.addf %38, %41 : vector<16x1xf32>
      %43 = math.rsqrt %42 : vector<16x1xf32>
      %44 = vector.broadcast %43 : vector<16x1xf32> to vector<16x32xf32>
      %45 = arith.mulf %40, %44 : vector<16x32xf32>
      %46 = vector.broadcast %26 : vector<1x32xf32> to vector<16x32xf32>
      %47 = arith.mulf %45, %46 : vector<16x32xf32>
      %48 = vector.broadcast %27 : vector<1x32xf32> to vector<16x32xf32>
      %49 = arith.addf %47, %48 : vector<16x32xf32>
      %50 = vector.shape_cast %49 : vector<16x32xf32> to vector<2x8x32xf32>
      %c0_31 = arith.constant 0 : index
      %c0_32 = arith.constant 0 : index
      %c0_33 = arith.constant 0 : index
      %51 = vector.load %arg15[%c0_31, %c0_32, %c0_33] : memref<2x8x32xf32, #tpu.memory_space<vmem>>, vector<2x8x32xf32>
      tpu.vector_store %arg15[%c0_31, %c0_32, %c0_33], %50 {strides = array<i32>} : memref<2x8x32xf32, #tpu.memory_space<vmem>>, vector<2x8x32xf32>,
    } else {
    }
    return
  }
  func.func @transform_0(%arg0: i32, %arg1: i32) -> (i32, i32, i32) {
    %c0_i32 = arith.constant 0 : i32
    %c0_i32_0 = arith.constant 0 : i32
    %c0_i32_1 = arith.constant 0 : i32
    return %arg0, %c0_i32, %c0_i32_0 : i32, i32, i32
  }
  func.func @transform_1(%arg0: i32, %arg1: i32) -> (i32, i32) {
    %c0_i32 = arith.constant 0 : i32
    %c0_i32_0 = arith.constant 0 : i32
    %c0_i32_1 = arith.constant 0 : i32
    return %c0_i32, %c0_i32_0 : i32, i32
  }
  func.func @transform_2(%arg0: i32, %arg1: i32) -> (i32, i32) {
    %c0_i32 = arith.constant 0 : i32
    %c0_i32_0 = arith.constant 0 : i32
    %c0_i32_1 = arith.constant 0 : i32
    return %c0_i32, %c0_i32_0 : i32, i32
  }
  func.func @transform_3(%arg0: i32, %arg1: i32) -> (i32, i32) {
    %c0_i32 = arith.constant 0 : i32
    %c0_i32_0 = arith.constant 0 : i32
    %c0_i32_1 = arith.constant 0 : i32
    return %c0_i32, %c0_i32_0 : i32, i32
  }
  func.func @transform_4(%arg0: i32, %arg1: i32) -> (i32, i32) {
    %c0_i32 = arith.constant 0 : i32
    %c0_i32_0 = arith.constant 0 : i32
    %c0_i32_1 = arith.constant 0 : i32
    return %c0_i32, %c0_i32_0 : i32, i32
  }
  func.func @transform_5(%arg0: i32, %arg1: i32) -> (i32, i32) {
    %c0_i32 = arith.constant 0 : i32
    %c0_i32_0 = arith.constant 0 : i32
    %c0_i32_1 = arith.constant 0 : i32
    return %c0_i32, %c0_i32_0 : i32, i32
  }
  func.func @transform_6(%arg0: i32, %arg1: i32) -> (i32, i32) {
    %c0_i32 = arith.constant 0 : i32
    %c0_i32_0 = arith.constant 0 : i32
    %c0_i32_1 = arith.constant 0 : i32
    return %c0_i32, %c0_i32_0 : i32, i32
  }
  func.func @transform_7(%arg0: i32, %arg1: i32) -> (i32, i32) {
    %c0_i32 = arith.constant 0 : i32
    %c0_i32_0 = arith.constant 0 : i32
    return %c0_i32, %arg1 : i32, i32
  }
  func.func @transform_8(%arg0: i32, %arg1: i32) -> (i32, i32) {
    %c0_i32 = arith.constant 0 : i32
    %c0_i32_0 = arith.constant 0 : i32
    return %c0_i32, %arg1 : i32, i32
  }
  func.func @transform_9(%arg0: i32, %arg1: i32) -> (i32, i32) {
    %c0_i32 = arith.constant 0 : i32
    %c0_i32_0 = arith.constant 0 : i32
    return %arg1, %c0_i32 : i32, i32
  }
  func.func @transform_10(%arg0: i32, %arg1: i32) -> (i32, i32) {
    %c0_i32 = arith.constant 0 : i32
    %c0_i32_0 = arith.constant 0 : i32
    %c0_i32_1 = arith.constant 0 : i32
    return %c0_i32, %c0_i32_0 : i32, i32
  }
  func.func @transform_11(%arg0: i32, %arg1: i32) -> (i32, i32) {
    %c0_i32 = arith.constant 0 : i32
    %c0_i32_0 = arith.constant 0 : i32
    %c0_i32_1 = arith.constant 0 : i32
    return %c0_i32, %c0_i32_0 : i32, i32
  }
  func.func @transform_12(%arg0: i32, %arg1: i32) -> (i32, i32) {
    %c0_i32 = arith.constant 0 : i32
    %c0_i32_0 = arith.constant 0 : i32
    %c0_i32_1 = arith.constant 0 : i32
    return %c0_i32, %c0_i32_0 : i32, i32
  }
  func.func @transform_13(%arg0: i32, %arg1: i32) -> (i32, i32, i32) {
    %c0_i32 = arith.constant 0 : i32
    %c0_i32_0 = arith.constant 0 : i32
    %c0_i32_1 = arith.constant 0 : i32
    return %arg0, %c0_i32, %c0_i32_0 : i32, i32, i32
  }
}

</mosaic_0001>

<bundles_post_ra>
// kernel: tpu_custom_call.1
= control target key start
LH: loop header
LB: loop body
LE: loop exit
PB: predicated region body
PF: predicated region fallthrough
CT: control target
= control target key end

     0   :  { %18 = vsyncpa [#allocation8], 0  ;;  %s2406_s0 = inlined_call_operand.vmem [shape: f32[2,8,32], index: 0, kind: input, shape index: {}]   ;;  %s2407_s1 = inlined_call_operand.vmem [shape: bf16[32,96], index: 1, kind: input, shape index: {}]   ;;  %s2408_s2 = inlined_call_operand.hbm [shape: f32[1,96], index: 2, kind: input, shape index: {}]   ;;  %s2409_s3 = inlined_call_operand.vmem [shape: bf16[32,32], index: 3, kind: input, shape index: {}]   ;;  %s2410_s4 = inlined_call_operand.hbm [shape: f32[1,32], index: 4, kind: input, shape index: {}]   ;;  %s2411_s5 = inlined_call_operand.hbm [shape: f32[1,32], index: 5, kind: input, shape index: {}]   ;;  %s2412_s6 = inlined_call_operand.hbm [shape: f32[1,32], index: 6, kind: input, shape index: {}]   ;;  %s2413_s7 = inlined_call_operand.hbm [shape: bf16[32,64], index: 7, kind: input, shape index: {}]   ;;  %s2414_s8 = inlined_call_operand.hbm [shape: f32[1,64], index: 8, kind: input, shape index: {}]   ;;  %s2415_s9 = inlined_call_operand.vmem [shape: bf16[64,32], index: 9, kind: input, shape index: {}]   ;;  %s2416_s10 = inlined_call_operand.vmem [shape: f32[1,32], index: 10, kind: input, shape index: {}]   ;;  %s2417_s11 = inlined_call_operand.vmem [shape: f32[1,32], index: 11, kind: input, shape index: {}]   ;;  %s2418_s12 = inlined_call_operand.vmem [shape: f32[1,32], index: 12, kind: input, shape index: {}]   ;;  %s2419_s13 = inlined_call_operand.hbm [shape: f32[2,8,32], index: 13, kind: output, shape index: {}]  }
   0x1   :  { %19 = vsyncpa [#allocation11], 0 }
   0x2   :  { %20 = vsyncpa [#allocation14], 0 }
   0x3   :  { %21 = vsyncpa [#allocation17], 0 }
   0x4   :  { %22 = vsyncpa [#allocation9], 0  ;;  %s2033_s25 = smov [#allocation10]   ;;  %s2034_s27 = smov [#allocation13]  }
   0x5   :  { %s45_s26 = sshll.u32 %s2033_s25, 4  ;;  %s65_s28 = sshll.u32 %s2034_s27, 4  ;;  %s46_s26 = int_to_ptr.vmem [resolvable:$true] %s45_s26  ;;  %s66_s28 = int_to_ptr.vmem [resolvable:$true] %s65_s28 }
   0x6   :  { %s1891_s29 = scalar_lea.vmem %s46_s26, 16  ;;  %s1895_s30 = scalar_lea.vmem %s46_s26, 32 }
   0x7   :  { %p1892_p0 = scmp.ne.s32.totalorder %s46_s26, %s1891_s29  ;;  %p1896_p1 = scmp.lt.s32.totalorder %s46_s26, %s46_s26 }
   0x8   :  { %p1897_p2 = scmp.lt.s32.totalorder %s1895_s30, %s1891_s29 }
   0xa   :  { %p1898_p3 = por %p1897_p2, %p1896_p1 }
   0xc   :  { %p1899_p4 = pnand %p1898_p3, %p1892_p0 }
   0xe   :  { %1902 = shalt.err (!%p1899_p4)
}
   0xf   :  { %48 = dma.hbm_to_vmem [thread:$0]  %s2410_s4, 16, %s46_s26, [#allocation11]  }
  0x10   :  { %s1911_s16 = scalar_lea.vmem %s66_s28, 16  ;;  %s1915_s17 = scalar_lea.vmem %s66_s28, 32 }
  0x11   :  { %p1912_p5 = scmp.ne.s32.totalorder %s66_s28, %s1911_s16  ;;  %p1916_p6 = scmp.lt.s32.totalorder %s66_s28, %s66_s28 }
  0x12   :  { %p1917_p7 = scmp.lt.s32.totalorder %s1915_s17, %s1911_s16 }
  0x14   :  { %p1918_p8 = por %p1917_p7, %p1916_p6 }
  0x16   :  { %p1919_p9 = pnand %p1918_p8, %p1912_p5 }
  0x18   :  { %1922 = shalt.err (!%p1919_p9)
}
  0x19   :  { %68 = dma.hbm_to_vmem [thread:$0]  %s2412_s6, 16, %s66_s28, [#allocation14]  }
  0x1a   :  { %s2035_s20 = smov [#allocation7]   ;;  %s2036_s22 = smov [#allocation12]  }
  0x1b   :  { %s33_s21 = sshll.u32 %s2035_s20, 4  ;;  %s55_s23 = sshll.u32 %s2036_s22, 4  ;;  %s34_s21 = int_to_ptr.vmem [resolvable:$true] %s33_s21  ;;  %s56_s23 = int_to_ptr.vmem [resolvable:$true] %s55_s23 }
  0x1c   :  { %s1931_s24 = scalar_lea.vmem %s34_s21, 16  ;;  %s1935_s4 = scalar_lea.vmem %s34_s21, 32 }
  0x1d   :  { %p1932_p10 = scmp.ne.s32.totalorder %s34_s21, %s1931_s24  ;;  %p1936_p11 = scmp.lt.s32.totalorder %s34_s21, %s34_s21 }
  0x1e   :  { %p1937_p12 = scmp.lt.s32.totalorder %s1935_s4, %s1931_s24 }
  0x20   :  { %p1938_p13 = por %p1937_p12, %p1936_p11 }
  0x22   :  { %p1939_p0 = pnand %p1938_p13, %p1932_p10 }
  0x24   :  { %1942 = shalt.err (!%p1939_p0)
}
  0x25   :  { %36 = dma.hbm_to_vmem [thread:$0]  %s2408_s2, 16, %s34_s21, [#allocation8]  }
  0x26   :  { %s1951_s27 = scalar_lea.vmem %s56_s23, 16  ;;  %s1955_s6 = scalar_lea.vmem %s56_s23, 32 }
  0x27   :  { %p1952_p1 = scmp.ne.s32.totalorder %s56_s23, %s1951_s27  ;;  %p1956_p2 = scmp.lt.s32.totalorder %s56_s23, %s56_s23 }
  0x28   :  { %p1957_p3 = scmp.lt.s32.totalorder %s1955_s6, %s1951_s27 }
  0x2a   :  { %p1958_p4 = por %p1957_p3, %p1956_p2 }
  0x2c   :  { %p1959_p5 = pnand %p1958_p4, %p1952_p1 }
  0x2e   :  { %1962 = shalt.err (!%p1959_p5)
}
  0x2f   :  { %58 = dma.hbm_to_vmem [thread:$0]  %s2411_s5, 16, %s56_s23, [#allocation11]  }
  0x30   :  { %s2037_s30 = smov [#allocation15]  }
  0x31   :  { %s74_s14 = sshll.u32 %s2037_s30, 4  ;;  %s75_s14 = int_to_ptr.vmem [resolvable:$true] %s74_s14 }
  0x32   :  { %s1971_s15 = scalar_lea.vmem %s75_s14, 256  ;;  %p1976_p7 = scmp.lt.s32.totalorder %s75_s14, %s75_s14 }
  0x33   :  { %p1972_p6 = scmp.ne.s32.totalorder %s75_s14, %s1971_s15  ;;  %p1977_p8 = scmp.lt.s32.totalorder %s1971_s15, %s1971_s15 }
  0x35   :  { %p1978_p9 = por %p1977_p8, %p1976_p7 }
  0x37   :  { %p1979_p10 = pnand %p1978_p9, %p1972_p6 }
  0x39   :  { %1982 = shalt.err (!%p1979_p10)
}
  0x3a   :  { %s2038_s2 = smov 64   ;;  %s2039_s16 = smov 4  }
  0x3b   :  { %80 = dma.hbm_to_vmem [thread:$0]  %s2413_s7, 256, %s75_s14, [#allocation14], %s2038_s2, %s2038_s2, %s2039_s16  }
  0x3c   :  { %s2040_s19 = smov [#allocation16]  }
  0x3d   :  { %s87_s5 = sshll.u32 %s2040_s19, 4  ;;  %s88_s5 = int_to_ptr.vmem [resolvable:$true] %s87_s5 }
  0x3e   :  { %s1991_s20 = scalar_lea.vmem %s88_s5, 16  ;;  %s1995_s21 = scalar_lea.vmem %s88_s5, 32 }
  0x3f   :  { %p1992_p11 = scmp.ne.s32.totalorder %s88_s5, %s1991_s20  ;;  %p1996_p12 = scmp.lt.s32.totalorder %s88_s5, %s88_s5 }
  0x40   :  { %p1997_p13 = scmp.lt.s32.totalorder %s1995_s21, %s1991_s20 }
  0x42   :  { %p1998_p0 = por %p1997_p13, %p1996_p12 }
  0x44   :  { %p1999_p1 = pnand %p1998_p0, %p1992_p11 }
  0x46   :  { %2002 = shalt.err (!%p1999_p1)
}
  0x47   :  { %90 = dma.hbm_to_vmem [thread:$0]  %s2414_s8, 16, %s88_s5, [#allocation17]  }
  0x48   :  { %2023 = dma.done.wait [#allocation8], 16  }
  0x49   :  { %2024 = vsyncadd [#allocation8], 4294967280 }
  0x4a   :  { %2025 = dma.done.wait [#allocation11], 32  }
  0x4b   :  { %2026 = vsyncadd [#allocation11], 4294967264 }
  0x4c   :  { %2027 = dma.done.wait [#allocation14], 272  }
  0x4d   :  { %2028 = vsyncadd [#allocation14], 4294967024 }
  0x4e   :  { %2029 = dma.done.wait [#allocation17], 16  }
  0x4f   :  { %2030 = vsyncadd [#allocation17], 4294967280  ;;  %vm148_vm0 = vcmask 261120   ;;  %v2041_v0 = vmov 0.0   ;;  %vm2042_vm1 = vmmov 0   ;;  %v1823_v1 = vld [vmem:[%s2407_s1 + $0x8] sm:$0xff]  }
  0x50   :  { %1666 = vmatprep.subr.bf16.mxu0 %v2041_v0  ;;  %1670 = vmatprep.mubr.msk.bf16.mxu0 %vm2042_vm1, %v2041_v0  ;;  %1304 = vst.msk [vmem:[#allocation6] sm:$0xff] %vm148_vm0, %v2041_v0  ;;  %1305 = vst.msk [vmem:[#allocation6 + $0x8] sm:$0xff] %vm148_vm0, %v2041_v0  ;;  %v1824_v2 = vld [vmem:[%s2407_s1] sm:$0xff]   ;;  %v2172_v4 = vld [vmem:[%s2406_s0 + $0x8] sm:$0xff]  ;;  %vm201_vm2 = vcmask 781312   ;;  %s2044_s1 = smov 96  }
  0x51   :  { %1674 = vmatprep.subr.bf16.mxu1 %v2041_v0  ;;  %1676 = vmatprep.mubr.msk.bf16.mxu1 %vm2042_vm1, %v2041_v0  ;;  %v2167_v3 = vld [vmem:[%s2406_s0] sm:$0xff]  ;;  %v1552_v6 = vld [vmem:[#allocation7] ss:$0 sm:$0xff]  ;;  %s2043_s0 = smov 120   ;;  %s2045_s28 = smov 80   ;;  %vm210_vm3 = vcmask 64512  }
  0x52   :  { %1667 = vmatpush3.bf16.msra.mxu0 %v1823_v1  ;;  %v124_v5 = vpack.c.bf16 %v2172_v4, %v2167_v3  ;;  %s2046_s29 = smov 88   ;;  %s2047_s30 = smov 72   ;;  %vm273_vm4 = vcmask 1043456   ;;  %vm319_vm5 = vcmask 60416   ;;  %vm442_vm6 = vcmask 126016  }
  0x53   :  { %1668 = vmatprep.subr.bf16.mxu0 %v2041_v0  ;;  %s2048_s14 = smov 112   ;;  %s2049_s15 = smov 104   ;;  %vm565_vm7 = vcmask 191616   ;;  %vm688_vm8 = vcmask 257216   ;;  %vm1301_vm9 = vcmask 257024   ;;  %vm1418_vm10 = vcmask 523264  }
  0x54   :  { %s2050_s16 = smov 56   ;;  %s2051_s17 = smov 48  }
  0x55   :  { %s2052_s18 = smov 40   ;;  %s2054_s19 = smov 16  }
  0x56   :  { %1669 = vmatpush3.bf16.msra.mxu0 %v1824_v2  ;;  %s2055_s21 = smov 24  }
  0x57   :  { %1680 = vmatprep.subr.bf16.mxu0 %v2041_v0 }
  0x59   :  { %1671 = vmatmul.mubr.msk.bf16.vlgmr.msra.gmra.mxu0 %vm148_vm0, %v124_v5 }
  0x5a   :  { %1682 = vmatprep.mubr.msk.bf16.mxu0 %vm2042_vm1, %v2041_v0 }
 0x119   :  { %v186_v7 = vpop.f32.mrf.mxu0 }
 0x11a   :  { %v187_v8 = vadd.f32 %v1552_v6, %v186_v7 }
 0x11b   :  { %v1672_v9 = vpop.f32.mrf.mxu0 }
 0x11c   :  { %v1610_v10 = vpack.c.bf16 %v187_v8, %v187_v8 }
 0x11d   :  { %v189_v11 = vpop.f32.mrf.mxu0 }
 0x11e   :  { %202 = vst.msk [vmem:[#allocation2] sm:$0xf] %vm201_vm2, %v1610_v10  ;;  %v190_v12 = vadd.f32 %v1552_v6, %v189_v11 }
 0x11f   :  { %v1673_v13 = vpop.f32.mrf.mxu0 }
 0x120   :  { %v1611_v14 = vpack.c.bf16 %v190_v12, %v190_v12 }
 0x122   :  { %203 = vst.msk [vmem:[#allocation2 + $0x4] sm:$0xf] %vm201_vm2, %v1611_v14 }
 0x125   :  { %v1825_v15 = vld [vmem:[#allocation2] ss:$0 sps:$4 sm:$0xff]  }
 0x126   :  { %v204_v16 = vld [vmem:[#allocation2] sm:$0xf]  ;;  %325 = vrot.lane.b32.xlu1 %v1825_v15, %s2043_s0 }
 0x127   :  { %v1558_v17 = vcombine.low %v204_v16, %v204_v16  ;;  %v2181_v18 = vld [vmem:[#allocation2] ss:$0 sps:$4 sm:$0xff]  }
 0x128   :  { %v2184_v19 = vld [vmem:[#allocation2] ss:$0 sps:$4 sm:$0xff]  }
 0x129   :  { %208 = vrot.lane.b32.xlu0 %v1558_v17, %s2044_s1  ;;  %v2186_v20 = vld [vmem:[#allocation2 + $0x4] sm:$0xf] }
 0x12a   :  { %450 = vrot.lane.b32.xlu1 %v2181_v18, %s2045_s28  ;;  %v2192_v21 = vcombine.low %v2186_v20, %v2186_v20  ;;  %v2196_v22 = vld [vmem:[#allocation2 + $0x4] ss:$0 sps:$4 sm:$0xff]  }
 0x12b   :  { %v2200_v23 = vld [vmem:[#allocation2 + $0x4] ss:$0 sps:$4 sm:$0xff]  }
 0x12c   :  { %v2204_v24 = vld [vmem:[#allocation2 + $0x4] ss:$0 sps:$4 sm:$0xff]  }
 0x12d   :  { %327 = vrot.lane.b32.xlu0 %v1825_v15, %s2046_s29 }
 0x12e   :  { %573 = vrot.lane.b32.xlu1 %v2184_v19, %s2047_s30 }
 0x131   :  { %448 = vrot.lane.b32.xlu0 %v2181_v18, %s2048_s14 }
 0x132   :  { %694 = vrot.lane.b32.xlu1 %v2192_v21, %s2044_s1 }
 0x135   :  { %571 = vrot.lane.b32.xlu0 %v2184_v19, %s2049_s15 }
 0x136   :  { %808 = vrot.lane.b32.xlu1 %v2196_v22, %s2043_s0 }
 0x139   :  { %810 = vrot.lane.b32.xlu0 %v2196_v22, %s2046_s29  ;;  %s2056_s29 = smov [#allocation18]  }
 0x13a   :  { %930 = vrot.lane.b32.xlu1 %v2200_v23, %s2048_s14 }
 0x13d   :  { %932 = vrot.lane.b32.xlu0 %v2200_v23, %s2045_s28 }
 0x13e   :  { %1052 = vrot.lane.b32.xlu1 %v2204_v24, %s2049_s15 }
 0x141   :  { %1054 = vrot.lane.b32.xlu0 %v2204_v24, %s2047_s30  ;;  %s1537_s30 = sshll.u32 %s2056_s29, 4  ;;  %s1538_s30 = int_to_ptr.vmem [resolvable:$true] %s1537_s30 }
 0x142   :  { %268 = vrot.lane.b32.xlu1 %v1558_v17, %s2038_s2  ;;  %s2003_s14 = scalar_lea.vmem %s1538_s30, 256  ;;  %p2008_p3 = scmp.lt.s32.totalorder %s1538_s30, %s1538_s30 }
 0x143   :  { %p2004_p2 = scmp.ne.s32.totalorder %s1538_s30, %s2003_s14  ;;  %p2009_p4 = scmp.lt.s32.totalorder %s2003_s14, %s2003_s14 }
 0x145   :  { %386 = vrot.lane.b32.xlu0 %v1825_v15, %s2050_s16  ;;  %p2010_p5 = por %p2009_p4, %p2008_p3 }
 0x147   :  { %p2011_p6 = pnand %p2010_p5, %p2004_p2 }
 0x198   :  { %v326_v25 = vpop.permute.xlu1 %325 }
 0x19b   :  { %v209_v26 = vpop.permute.xlu0 %208 }
 0x19c   :  { %v215_v27 = vsel %vm210_vm3, %v209_v26, 0  ;;  %v451_v28 = vpop.permute.xlu1 %450 }
 0x19d   :  { %1675 = vmatpush3.bf16.xpose.msra.mxu1 %v215_v27  ;;  %v456_v34 = vsel %vm210_vm3, %v451_v28, 0 }
 0x19e   :  { %1686 = vmatprep.subr.bf16.mxu1 %v2041_v0 }
 0x19f   :  { %v328_v29 = vpop.permute.xlu0 %327 }
 0x1a0   :  { %v574_v30 = vpop.permute.xlu1 %573  ;;  %v333_v31 = vsel %vm210_vm3, %v328_v29, 0 }
 0x1a1   :  { %v579_v38 = vsel %vm210_vm3, %v574_v30, 0 }
 0x1a3   :  { %v449_v37 = vpop.permute.xlu0 %448 }
 0x1a4   :  { %1677 = vmatmul.mubr.msk.bf16.vlgmr.msra.gmra.mxu1 %vm210_vm3, %v204_v16  ;;  %v695_v32 = vpop.permute.xlu1 %694 }
 0x1a5   :  { %1687 = vmatpush3.bf16.xpose.msra.mxu1 %v333_v31  ;;  %1688 = vmatprep.mubr.msk.bf16.mxu1 %vm2042_vm1, %v2041_v0  ;;  %v700_v42 = vsel %vm210_vm3, %v695_v32, 0 }
 0x1a6   :  { %1698 = vmatprep.subr.bf16.mxu1 %v2041_v0 }
 0x1a7   :  { %v572_v41 = vpop.permute.xlu0 %571 }
 0x1a8   :  { %v809_v33 = vpop.permute.xlu1 %808 }
 0x1ab   :  { %v811_v43 = vpop.permute.xlu0 %810 }
 0x1ac   :  { %1689 = vmatmul.mubr.msk.bf16.vlgmr.msra.gmra.mxu1 %vm210_vm3, %v326_v25  ;;  %v931_v35 = vpop.permute.xlu1 %930  ;;  %v816_v44 = vsel %vm210_vm3, %v811_v43, 0 }
 0x1ad   :  { %1699 = vmatpush3.bf16.xpose.msra.mxu1 %v456_v34  ;;  %1700 = vmatprep.mubr.msk.bf16.mxu1 %vm2042_vm1, %v2041_v0 }
 0x1ae   :  { %1710 = vmatprep.subr.bf16.mxu1 %v2041_v0 }
 0x1af   :  { %v933_v45 = vpop.permute.xlu0 %932 }
 0x1b0   :  { %v1053_v36 = vpop.permute.xlu1 %1052  ;;  %v938_v46 = vsel %vm210_vm3, %v933_v45, 0 }
 0x1b3   :  { %v1055_v47 = vpop.permute.xlu0 %1054 }
 0x1b4   :  { %1701 = vmatmul.mubr.msk.bf16.vlgmr.msra.gmra.mxu1 %vm210_vm3, %v449_v37  ;;  %v269_v39 = vpop.permute.xlu1 %268  ;;  %v1060_v48 = vsel %vm210_vm3, %v1055_v47, 0 }
 0x1b5   :  { %1711 = vmatpush3.bf16.xpose.msra.mxu1 %v579_v38  ;;  %1712 = vmatprep.mubr.msk.bf16.mxu1 %vm2042_vm1, %v2041_v0  ;;  %v275_v40 = vsel %vm273_vm4, %v269_v39, 0 }
 0x1b6   :  { %1722 = vmatprep.subr.bf16.mxu1 %v2041_v0  ;;  %1681 = vmatpush3.bf16.msra.mxu0 %v275_v40 }
 0x1b7   :  { %1692 = vmatprep.subr.bf16.mxu0 %v2041_v0  ;;  %v387_v32 = vpop.permute.xlu0 %386 }
 0x1b8   :  { %v392_v40 = vsel %vm273_vm4, %v387_v32, 0 }
 0x1bc   :  { %1713 = vmatmul.mubr.msk.bf16.vlgmr.msra.gmra.mxu1 %vm210_vm3, %v572_v41 }
 0x1bd   :  { %1723 = vmatpush3.bf16.xpose.msra.mxu1 %v700_v42  ;;  %1724 = vmatprep.mubr.msk.bf16.mxu1 %vm2042_vm1, %v2041_v0 }
 0x1be   :  { %1734 = vmatprep.subr.bf16.mxu1 %v2041_v0 }
 0x1c4   :  { %1725 = vmatmul.mubr.msk.bf16.vlgmr.msra.gmra.mxu1 %vm210_vm3, %v2186_v20 }
 0x1c5   :  { %1735 = vmatpush3.bf16.xpose.msra.mxu1 %v816_v44  ;;  %1736 = vmatprep.mubr.msk.bf16.mxu1 %vm2042_vm1, %v2041_v0 }
 0x1c6   :  { %1746 = vmatprep.subr.bf16.mxu1 %v2041_v0 }
 0x1cc   :  { %1737 = vmatmul.mubr.msk.bf16.vlgmr.msra.gmra.mxu1 %vm210_vm3, %v809_v33 }
 0x1cd   :  { %1747 = vmatpush3.bf16.xpose.msra.mxu1 %v938_v46  ;;  %1748 = vmatprep.mubr.msk.bf16.mxu1 %vm2042_vm1, %v2041_v0 }
 0x1ce   :  { %1758 = vmatprep.subr.bf16.mxu1 %v2041_v0 }
 0x1d4   :  { %1749 = vmatmul.mubr.msk.bf16.vlgmr.msra.gmra.mxu1 %vm210_vm3, %v931_v35 }
 0x1d5   :  { %1759 = vmatpush3.bf16.xpose.msra.mxu1 %v1060_v48  ;;  %1760 = vmatprep.mubr.msk.bf16.mxu1 %vm2042_vm1, %v2041_v0 }
 0x1d6   :  { %1770 = vmatprep.subr.bf16.mxu1 %v2041_v0 }
 0x1dc   :  { %1761 = vmatmul.mubr.msk.bf16.vlgmr.msra.gmra.mxu1 %vm210_vm3, %v1053_v36 }
 0x1dd   :  { %1774 = vmatprep.mubr.msk.bf16.mxu1 %vm2042_vm1, %v2041_v0 }
 0x264   :  { %v251_v49 = vpop.f32.mrf.mxu1 }
 0x265   :  { %v257_v50 = vsel %vm210_vm3, %v251_v49, -inf }
 0x266   :  { %v1678_v51 = vpop.f32.mrf.mxu1  ;;  %258 = vmax.xlane.f32.xlu0 %v257_v50 }
 0x268   :  { %v254_v52 = vpop.f32.mrf.mxu1 }
 0x26a   :  { %v1679_v53 = vpop.f32.mrf.mxu1 }
 0x26c   :  { %v369_v54 = vpop.f32.mrf.mxu1 }
 0x26d   :  { %v375_v55 = vsel %vm210_vm3, %v369_v54, -inf }
 0x26e   :  { %v1690_v56 = vpop.f32.mrf.mxu1  ;;  %376 = vmax.xlane.f32.xlu1 %v375_v55 }
 0x270   :  { %v372_v57 = vpop.f32.mrf.mxu1 }
 0x272   :  { %v1691_v58 = vpop.f32.mrf.mxu1 }
 0x274   :  { %v2255_v59 = vpop.f32.mrf.mxu1 }
 0x276   :  { %v1702_v60 = vpop.f32.mrf.mxu1 }
 0x278   :  { %v495_v61 = vpop.f32.mrf.mxu1 }
 0x27a   :  { %v1703_v62 = vpop.f32.mrf.mxu1 }
 0x27c   :  { %v2257_v63 = vpop.f32.mrf.mxu1  ;;  %509 = vrot.lane.b32.xlu0 %v2181_v18, %s2051_s17  ;;  %v498_v18 = vsel %vm210_vm3, %v2255_v59, -inf }
 0x27d   :  { %v621_v25 = vsel %vm210_vm3, %v2257_v63, -inf }
 0x27e   :  { %v1714_v1 = vpop.f32.mrf.mxu1 }
 0x27f   :  { %632 = vrot.lane.b32.xlu1 %v2184_v19, %s2052_s18 }
 0x280   :  { %v618_v2 = vpop.f32.mrf.mxu1 }
 0x282   :  { %v1715_v5 = vpop.f32.mrf.mxu1 }
 0x284   :  { %v2263_v6 = vpop.f32.mrf.mxu1 }
 0x285   :  { %v742_v28 = vsel %vm210_vm3, %v2263_v6, -inf }
 0x286   :  { %v1726_v7 = vpop.f32.mrf.mxu1 }
 0x288   :  { %v739_v8 = vpop.f32.mrf.mxu1 }
 0x28a   :  { %v1727_v9 = vpop.f32.mrf.mxu1 }
 0x28c   :  { %v2265_v10 = vpop.f32.mrf.mxu1 }
 0x28d   :  { %v858_v29 = vsel %vm210_vm3, %v2265_v10, -inf }
 0x28e   :  { %v1738_v11 = vpop.f32.mrf.mxu1 }
 0x290   :  { %v855_v12 = vpop.f32.mrf.mxu1 }
 0x292   :  { %v1739_v13 = vpop.f32.mrf.mxu1 }
 0x294   :  { %v2267_v14 = vpop.f32.mrf.mxu1 }
 0x295   :  { %v980_v30 = vsel %vm210_vm3, %v2267_v14, -inf }
 0x296   :  { %v1750_v15 = vpop.f32.mrf.mxu1 }
 0x298   :  { %v977_v16 = vpop.f32.mrf.mxu1 }
 0x29a   :  { %v1751_v17 = vpop.f32.mrf.mxu1 }
 0x29b   :  { %499 = vmax.xlane.f32.xlu0 %v498_v18 }
 0x29c   :  { %v2271_v19 = vpop.f32.mrf.mxu1 }
 0x29d   :  { %v1102_v31 = vsel %vm210_vm3, %v2271_v19, -inf }
 0x29e   :  { %v1762_v20 = vpop.f32.mrf.mxu1 }
 0x29f   :  { %622 = vmax.xlane.f32.xlu0 %v621_v25 }
 0x2a0   :  { %v1099_v26 = vpop.f32.mrf.mxu1 }
 0x2a2   :  { %v1763_v27 = vpop.f32.mrf.mxu1 }
 0x2a3   :  { %743 = vmax.xlane.f32.xlu0 %v742_v28  ;;  %859 = vmax.xlane.f32.xlu1 %v858_v29 }
 0x2a7   :  { %981 = vmax.xlane.f32.xlu0 %v980_v30 }
 0x2ab   :  { %1103 = vmax.xlane.f32.xlu0 %v1102_v31 }
 0x2b4   :  { %869 = vrot.lane.b32.xlu1 %v2196_v22, %s2050_s16 }
 0x2b8   :  { %991 = vrot.lane.b32.xlu1 %v2200_v23, %s2051_s17 }
 0x2bc   :  { %1113 = vrot.lane.b32.xlu1 %v2204_v24, %s2052_s18 }
 0x2c1   :  { %753 = vrot.lane.b32.xlu0 %v2192_v21, %s2038_s2  ;;  %s2053_s2 = smov 8  }
 0x2ef   :  { %v259_v33 = vpop.xlane.xlu0 %258 }
 0x2f0   :  { %v260_v34 = vsub.f32 %v251_v49, %v259_v33 }
 0x2f2   :  { %v261_v35 = vmul.f32 1.442695, %v260_v34 }
 0x2f3   :  { %v510_v23 = vpop.permute.xlu0 %509 }
 0x2f4   :  { %1843 = vpow2.f32 %v261_v35  ;;  %v515_v42 = vsel %vm273_vm4, %v510_v23, 0 }
 0x2f7   :  { %v377_v36 = vpop.xlane.xlu1 %376 }
 0x2f8   :  { %v378_v37 = vsub.f32 %v369_v54, %v377_v36 }
 0x2fa   :  { %v379_v38 = vmul.f32 1.442695, %v378_v37 }
 0x2fb   :  { %v633_v46 = vpop.permute.xlu1 %632 }
 0x2fc   :  { %1845 = vpow2.f32 %v379_v38  ;;  %v638_v2 = vsel %vm273_vm4, %v633_v46, 0 }
 0x301   :  { %v1844_v39 = vpop.eup %1843 }
 0x302   :  { %v267_v22 = vpack.c.bf16 %v1844_v39, %v1844_v39  ;;  %v263_v9 = vsel %vm210_vm3, %v1844_v39, 0.0 }
 0x304   :  { %1683 = vmatmul.mubr.msk.bf16.vlgmr.msra.gmra.mxu0 %vm210_vm3, %v267_v22 }
 0x305   :  { %1693 = vmatpush3.bf16.msra.mxu0 %v392_v40  ;;  %1694 = vmatprep.mubr.msk.bf16.mxu0 %vm2042_vm1, %v2041_v0 }
 0x306   :  { %1704 = vmatprep.subr.bf16.mxu0 %v2041_v0 }
 0x309   :  { %v1846_v21 = vpop.eup %1845 }
 0x30a   :  { %v381_v24 = vsel %vm210_vm3, %v1846_v21, 0.0  ;;  %v385_v41 = vpack.c.bf16 %v1846_v21, %v1846_v21 }
 0x30b   :  { %382 = vadd.xlane.f32.xlu1 %v381_v24 }
 0x30c   :  { %1695 = vmatmul.mubr.msk.bf16.vlgmr.msra.gmra.mxu0 %vm210_vm3, %v385_v41 }
 0x30d   :  { %1705 = vmatpush3.bf16.msra.mxu0 %v515_v42  ;;  %1706 = vmatprep.mubr.msk.bf16.mxu0 %vm2042_vm1, %v2041_v0 }
 0x30e   :  { %1716 = vmatprep.subr.bf16.mxu0 %v2041_v0 }
 0x324   :  { %v500_v43 = vpop.xlane.xlu0 %499 }
 0x325   :  { %v501_v44 = vsub.f32 %v2255_v59, %v500_v43 }
 0x327   :  { %v502_v45 = vmul.f32 1.442695, %v501_v44 }
 0x328   :  { %v623_v47 = vpop.xlane.xlu0 %622 }
 0x329   :  { %1847 = vpow2.f32 %v502_v45  ;;  %v624_v48 = vsub.f32 %v2257_v63, %v623_v47 }
 0x32b   :  { %v625_v49 = vmul.f32 1.442695, %v624_v48 }
 0x32c   :  { %v744_v50 = vpop.xlane.xlu0 %743  ;;  %v860_v51 = vpop.xlane.xlu1 %859 }
 0x32d   :  { %1849 = vpow2.f32 %v625_v49  ;;  %v861_v52 = vsub.f32 %v2265_v10, %v860_v51  ;;  %v745_v53 = vsub.f32 %v2263_v6, %v744_v50 }
 0x32f   :  { %v862_v54 = vmul.f32 1.442695, %v861_v52  ;;  %v746_v57 = vmul.f32 1.442695, %v745_v53 }
 0x330   :  { %v982_v55 = vpop.xlane.xlu0 %981  ;;  %v870_v17 = vpop.permute.xlu1 %869 }
 0x331   :  { %v983_v56 = vsub.f32 %v2267_v14, %v982_v55  ;;  %1851 = vpow2.f32 %v862_v54  ;;  %v875_v20 = vsel %vm273_vm4, %v870_v17, 0 }
 0x333   :  { %v984_v58 = vmul.f32 1.442695, %v983_v56 }
 0x334   :  { %v1104_v59 = vpop.xlane.xlu0 %1103  ;;  %v992_v26 = vpop.permute.xlu1 %991 }
 0x335   :  { %1853 = vpow2.f32 %v984_v58  ;;  %v1105_v60 = vsub.f32 %v2271_v19, %v1104_v59  ;;  %v997_v28 = vsel %vm273_vm4, %v992_v26, 0 }
 0x336   :  { %v1848_v61 = vpop.eup %1847  ;;  %1855 = vpow2.f32 %v746_v57 }
 0x337   :  { %v1106_v62 = vmul.f32 1.442695, %v1105_v60  ;;  %v504_v63 = vsel %vm210_vm3, %v1848_v61, 0.0  ;;  %v508_v1 = vpack.c.bf16 %v1848_v61, %v1848_v61 }
 0x338   :  { %505 = vadd.xlane.f32.xlu1 %v504_v63  ;;  %v754_v7 = vpop.permute.xlu0 %753  ;;  %v1114_v29 = vpop.permute.xlu1 %1113 }
 0x339   :  { %1857 = vpow2.f32 %v1106_v62  ;;  %1707 = vmatmul.mubr.msk.bf16.vlgmr.msra.gmra.mxu0 %vm210_vm3, %v508_v1  ;;  %v759_v12 = vsel %vm273_vm4, %v754_v7, 0  ;;  %v1119_v31 = vsel %vm273_vm4, %v1114_v29, 0 }
 0x33a   :  { %v1850_v5 = vpop.eup %1849  ;;  %1717 = vmatpush3.bf16.msra.mxu0 %v638_v2  ;;  %1718 = vmatprep.mubr.msk.bf16.mxu0 %vm2042_vm1, %v2041_v0 }
 0x33b   :  { %v627_v6 = vsel %vm210_vm3, %v1850_v5, 0.0  ;;  %1728 = vmatprep.subr.bf16.mxu0 %v2041_v0  ;;  %v631_v10 = vpack.c.bf16 %v1850_v5, %v1850_v5 }
 0x33c   :  { %628 = vadd.xlane.f32.xlu1 %v627_v6 }
 0x33e   :  { %v1852_v8 = vpop.eup %1851 }
 0x33f   :  { %v864_v11 = vsel %vm210_vm3, %v1852_v8, 0.0  ;;  %v868_v27 = vpack.c.bf16 %v1852_v8, %v1852_v8 }
 0x340   :  { %264 = vadd.xlane.f32.xlu1 %v263_v9  ;;  %865 = vadd.xlane.f32.xlu0 %v864_v11 }
 0x341   :  { %1719 = vmatmul.mubr.msk.bf16.vlgmr.msra.gmra.mxu0 %vm210_vm3, %v631_v10 }
 0x342   :  { %v1854_v13 = vpop.eup %1853  ;;  %1729 = vmatpush3.bf16.msra.mxu0 %v759_v12  ;;  %1730 = vmatprep.mubr.msk.bf16.mxu0 %vm2042_vm1, %v2041_v0 }
 0x343   :  { %v986_v14 = vsel %vm210_vm3, %v1854_v13, 0.0  ;;  %1740 = vmatprep.subr.bf16.mxu0 %v2041_v0  ;;  %v1856_v15 = vpop.eup %1855  ;;  %v990_v30 = vpack.c.bf16 %v1854_v13, %v1854_v13 }
 0x344   :  { %987 = vadd.xlane.f32.xlu0 %v986_v14  ;;  %v752_v19 = vpack.c.bf16 %v1856_v15, %v1856_v15  ;;  %v748_v25 = vsel %vm210_vm3, %v1856_v15, 0.0 }
 0x346   :  { %v1858_v16 = vpop.eup %1857 }
 0x347   :  { %v1108_v18 = vsel %vm210_vm3, %v1858_v16, 0.0  ;;  %v1112_v32 = vpack.c.bf16 %v1858_v16, %v1858_v16 }
 0x348   :  { %1109 = vadd.xlane.f32.xlu0 %v1108_v18 }
 0x349   :  { %1731 = vmatmul.mubr.msk.bf16.vlgmr.msra.gmra.mxu0 %vm210_vm3, %v752_v19 }
 0x34a   :  { %1741 = vmatpush3.bf16.msra.mxu0 %v875_v20  ;;  %1742 = vmatprep.mubr.msk.bf16.mxu0 %vm2042_vm1, %v2041_v0  ;;  %v1833_v20 = vld [vmem:[%s2409_s3 + $0x8] sm:$0xff]  }
 0x34b   :  { %1752 = vmatprep.subr.bf16.mxu0 %v2041_v0  ;;  %1771 = vmatpush3.bf16.msra.mxu1 %v1833_v20 }
 0x34c   :  { %749 = vadd.xlane.f32.xlu0 %v748_v25  ;;  %1772 = vmatprep.subr.bf16.mxu1 %v2041_v0 }
 0x351   :  { %1743 = vmatmul.mubr.msk.bf16.vlgmr.msra.gmra.mxu0 %vm210_vm3, %v868_v27  ;;  %v1834_v27 = vld [vmem:[%s2409_s3] sm:$0xff]  }
 0x352   :  { %1753 = vmatpush3.bf16.msra.mxu0 %v997_v28  ;;  %1754 = vmatprep.mubr.msk.bf16.mxu0 %vm2042_vm1, %v2041_v0 }
 0x353   :  { %1764 = vmatprep.subr.bf16.mxu0 %v2041_v0  ;;  %1773 = vmatpush3.bf16.msra.mxu1 %v1834_v27  ;;  %v1842_v27 = vld [vmem:[%s2415_s9] sm:$0xff]  }
 0x354   :  { %1786 = vmatprep.subr.bf16.mxu1 %v2041_v0 }
 0x359   :  { %1755 = vmatmul.mubr.msk.bf16.vlgmr.msra.gmra.mxu0 %vm210_vm3, %v990_v30 }
 0x35a   :  { %1765 = vmatpush3.bf16.msra.mxu0 %v1119_v31  ;;  %1766 = vmatprep.mubr.msk.bf16.mxu0 %vm2042_vm1, %v2041_v0 }
 0x35b   :  { %1778 = vmatprep.subr.bf16.mxu0 %v2041_v0 }
 0x361   :  { %1767 = vmatmul.mubr.msk.bf16.vlgmr.msra.gmra.mxu0 %vm210_vm3, %v1112_v32 }
 0x362   :  { %1782 = vmatprep.mubr.msk.bf16.mxu0 %vm2042_vm1, %v2041_v0 }
 0x394   :  { %v383_v33 = vpop.xlane.xlu1 %382 }
 0x395   :  { %1859 = vrcp.f32 %v383_v33 }
 0x3a2   :  { %v1860_v40 = vpop.eup %1859 }
 0x3c1   :  { %v506_v34 = vpop.xlane.xlu1 %505 }
 0x3c4   :  { %v311_v35 = vpop.f32.mrf.mxu0 }
 0x3c5   :  { %v629_v36 = vpop.xlane.xlu1 %628 }
 0x3c6   :  { %v1684_v37 = vpop.f32.mrf.mxu0 }
 0x3c8   :  { %v314_v38 = vpop.f32.mrf.mxu0 }
 0x3c9   :  { %v265_v39 = vpop.xlane.xlu1 %264  ;;  %v866_v47 = vpop.xlane.xlu0 %865 }
 0x3ca   :  { %1861 = vrcp.f32 %v265_v39  ;;  %v1685_v22 = vpop.f32.mrf.mxu0 }
 0x3cb   :  { %1863 = vrcp.f32 %v506_v34 }
 0x3cc   :  { %v428_v21 = vpop.f32.mrf.mxu0 }
 0x3cd   :  { %v434_v23 = vmul.f32 %v1860_v40, %v428_v21  ;;  %v988_v48 = vpop.xlane.xlu0 %987 }
 0x3ce   :  { %v1696_v24 = vpop.f32.mrf.mxu0 }
 0x3cf   :  { %v1612_v41 = vpack.c.bf16 %v434_v23, %v434_v23 }
 0x3d0   :  { %v431_v42 = vpop.f32.mrf.mxu0 }
 0x3d1   :  { %439 = vrot.lane.b32.xlu1 %v1612_v41, %s2053_s2  ;;  %v1110_v49 = vpop.xlane.xlu0 %1109  ;;  %v1588_v41 = vld [vmem:[#allocation10] ss:$0 sm:$0xff] }
 0x3d2   :  { %v1697_v43 = vpop.f32.mrf.mxu0 }
 0x3d5   :  { %v750_v51 = vpop.xlane.xlu0 %749 }
 0x3d6   :  { %1865 = vrcp.f32 %v750_v51 }
 0x3d7   :  { %v1862_v44 = vpop.eup %1861  ;;  %1867 = vrcp.f32 %v866_v47 }
 0x3d8   :  { %v317_v45 = vmul.f32 %v1862_v44, %v311_v35  ;;  %v1864_v50 = vpop.eup %1863  ;;  %1869 = vrcp.f32 %v629_v36 }
 0x3d9   :  { %1871 = vrcp.f32 %v988_v48 }
 0x3da   :  { %v318_v46 = vpack.c.bf16 %v317_v45, %v317_v45  ;;  %1873 = vrcp.f32 %v1110_v49 }
 0x3dc   :  { %320 = vst.msk [vmem:[#allocation3] sm:$0xf] %vm319_vm5, %v318_v46 }
 0x3e3   :  { %v1866_v62 = vpop.eup %1865 }
 0x3e4   :  { %v1868_v8 = vpop.eup %1867 }
 0x3e5   :  { %v1870_v11 = vpop.eup %1869 }
 0x3e6   :  { %v1872_v18 = vpop.eup %1871 }
 0x3e7   :  { %v1874_v31 = vpop.eup %1873 }
 0x3f9   :  { %v551_v52 = vpop.f32.mrf.mxu0 }
 0x3fa   :  { %v557_v53 = vmul.f32 %v1864_v50, %v551_v52 }
 0x3fb   :  { %v1708_v54 = vpop.f32.mrf.mxu0 }
 0x3fc   :  { %v1613_v55 = vpack.c.bf16 %v557_v53, %v557_v53 }
 0x3fd   :  { %v554_v56 = vpop.f32.mrf.mxu0 }
 0x3fe   :  { %562 = vrot.lane.b32.xlu1 %v1613_v55, %s2054_s19 }
 0x3ff   :  { %v1709_v57 = vpop.f32.mrf.mxu0 }
 0x401   :  { %v674_v58 = vpop.f32.mrf.mxu0 }
 0x402   :  { %v680_v13 = vmul.f32 %v1870_v11, %v674_v58  ;;  %v1594_v11 = vld [vmem:[#allocation13] ss:$0 sm:$0xff] }
 0x403   :  { %v1720_v59 = vpop.f32.mrf.mxu0 }
 0x404   :  { %v1614_v17 = vpack.c.bf16 %v680_v13, %v680_v13 }
 0x405   :  { %v677_v60 = vpop.f32.mrf.mxu0 }
 0x407   :  { %v1721_v61 = vpop.f32.mrf.mxu0 }
 0x408   :  { %v1836_v61 = vld [vmem:[#allocation15 + $0x8] sm:$0xff]  }
 0x409   :  { %v795_v63 = vpop.f32.mrf.mxu0  ;;  %1779 = vmatpush3.bf16.msra.mxu0 %v1836_v61 }
 0x40a   :  { %v801_v1 = vmul.f32 %v1866_v62, %v795_v63  ;;  %1780 = vmatprep.subr.bf16.mxu0 %v2041_v0  ;;  %v1839_v62 = vld [vmem:[%s2415_s9 + $0x18] sm:$0xff]  }
 0x40b   :  { %v1732_v2 = vpop.f32.mrf.mxu0 }
 0x40c   :  { %v802_v5 = vpack.c.bf16 %v801_v1, %v801_v1 }
 0x40d   :  { %v798_v6 = vpop.f32.mrf.mxu0 }
 0x40e   :  { %803 = vst.msk [vmem:[#allocation3 + $0x4] sm:$0xf] %vm319_vm5, %v802_v5 }
 0x40f   :  { %v1733_v7 = vpop.f32.mrf.mxu0 }
 0x411   :  { %v911_v9 = vpop.f32.mrf.mxu0 }
 0x412   :  { %v917_v10 = vmul.f32 %v1868_v8, %v911_v9  ;;  %v1593_v9 = vld [vmem:[#allocation12] ss:$0 sm:$0xff] }
 0x413   :  { %v1744_v12 = vpop.f32.mrf.mxu0 }
 0x414   :  { %v1615_v14 = vpack.c.bf16 %v917_v10, %v917_v10 }
 0x415   :  { %v914_v15 = vpop.f32.mrf.mxu0 }
 0x416   :  { %922 = vrot.lane.b32.xlu0 %v1615_v14, %s2053_s2 }
 0x417   :  { %v1745_v16 = vpop.f32.mrf.mxu0 }
 0x419   :  { %v1033_v19 = vpop.f32.mrf.mxu0 }
 0x41a   :  { %v1039_v25 = vmul.f32 %v1872_v18, %v1033_v19  ;;  %685 = vrot.lane.b32.xlu0 %v1614_v17, %s2055_s21 }
 0x41b   :  { %v1756_v26 = vpop.f32.mrf.mxu0 }
 0x41c   :  { %v1616_v28 = vpack.c.bf16 %v1039_v25, %v1039_v25  ;;  %v1840_v25 = vld [vmem:[%s2415_s9 + $0x10] sm:$0xff]   ;;  %v1841_v26 = vld [vmem:[%s2415_s9 + $0x8] sm:$0xff]  }
 0x41d   :  { %v1036_v29 = vpop.f32.mrf.mxu0 }
 0x41e   :  { %1044 = vrot.lane.b32.xlu1 %v1616_v28, %s2054_s19  ;;  %v1597_v28 = vld [vmem:[#allocation16] ss:$0 sm:$0xff] }
 0x41f   :  { %v1757_v30 = vpop.f32.mrf.mxu0 }
 0x421   :  { %v1155_v32 = vpop.f32.mrf.mxu0 }
 0x422   :  { %v1161_v33 = vmul.f32 %v1874_v31, %v1155_v32 }
 0x423   :  { %v1768_v34 = vpop.f32.mrf.mxu0 }
 0x424   :  { %v1617_v35 = vpack.c.bf16 %v1161_v33, %v1161_v33 }
 0x425   :  { %v1158_v36 = vpop.f32.mrf.mxu0 }
 0x426   :  { %1166 = vrot.lane.b32.xlu1 %v1617_v35, %s2055_s21 }
 0x427   :  { %v1769_v37 = vpop.f32.mrf.mxu0 }
 0x443   :  { %v440_v38 = vpop.permute.xlu1 %439 }
 0x444   :  { %443 = vst.msk [vmem:[#allocation3] sm:$0xf] %vm442_vm6, %v440_v38  ;;  %v1383_v38 = vld [vmem:[#allocation6] sm:$0xff] }
 0x470   :  { %v563_v39 = vpop.permute.xlu1 %562 }
 0x471   :  { %566 = vst.msk [vmem:[#allocation3] sm:$0xf] %vm565_vm7, %v563_v39 }
 0x488   :  { %v923_v22 = vpop.permute.xlu0 %922 }
 0x489   :  { %925 = vst.msk [vmem:[#allocation3 + $0x4] sm:$0xf] %vm442_vm6, %v923_v22 }
 0x48c   :  { %v686_v40 = vpop.permute.xlu0 %685 }
 0x48d   :  { %689 = vst.msk [vmem:[#allocation3] sm:$0xf] %vm688_vm8, %v686_v40  ;;  %v1384_v40 = vld [vmem:[#allocation6 + $0x8] sm:$0xff] }
 0x490   :  { %v1045_v21 = vpop.permute.xlu1 %1044 }
 0x491   :  { %1047 = vst.msk [vmem:[#allocation3 + $0x4] sm:$0xf] %vm565_vm7, %v1045_v21 }
 0x498   :  { %v1167_v23 = vpop.permute.xlu1 %1166 }
 0x499   :  { %1169 = vst.msk [vmem:[#allocation3 + $0x4] sm:$0xf] %vm688_vm8, %v1167_v23 }
 0x4a0   :  { %v1835_v24 = vld [vmem:[#allocation3] sm:$0xff]  }
 0x4a1   :  { %1775 = vmatmul.mubr.msk.bf16.vlgmr.msra.gmra.mxu1 %vm148_vm0, %v1835_v24 }
 0x4a2   :  { %1794 = vmatprep.mubr.msk.bf16.mxu1 %vm2042_vm1, %v2041_v0  ;;  %1787 = vmatpush3.bf16.msra.mxu1 %v1839_v62 }
 0x4a3   :  { %1788 = vmatprep.subr.bf16.mxu1 %v2041_v0 }
 0x4a6   :  { %1789 = vmatpush3.bf16.msra.mxu1 %v1840_v25 }
 0x4a7   :  { %1790 = vmatprep.subr.bf16.mxu1 %v2041_v0 }
 0x4aa   :  { %1791 = vmatpush3.bf16.msra.mxu1 %v1841_v26 }
 0x4ab   :  { %1792 = vmatprep.subr.bf16.mxu1 %v2041_v0 }
 0x4ae   :  { %1793 = vmatpush3.bf16.msra.mxu1 %v1842_v27 }
 0x561   :  { %v1237_v42 = vpop.f32.mrf.mxu1 }
 0x562   :  { %v1238_v43 = vadd.f32 %v1588_v41, %v1237_v42 }
 0x563   :  { %v1776_v44 = vpop.f32.mrf.mxu1 }
 0x564   :  { %v1244_v45 = vadd.f32 %v1238_v43, %v2167_v3 }
 0x565   :  { %v1240_v46 = vpop.f32.mrf.mxu1 }
 0x566   :  { %v1241_v47 = vadd.f32 %v1588_v41, %v1240_v46  ;;  %v1248_v48 = vsel %vm148_vm0, %v1244_v45, 0.0  ;;  %v1607_v41 = vld [vmem:[%s2416_s10] ss:$0 sm:$0xff] }
 0x567   :  { %1249 = vadd.xlane.f32.xlu0 %v1248_v48  ;;  %v1777_v49 = vpop.f32.mrf.mxu1 }
 0x568   :  { %v1245_v50 = vadd.f32 %v1241_v47, %v2172_v4  ;;  %v1837_v4 = vld [vmem:[#allocation15] sm:$0xff]  }
 0x569   :  { %1781 = vmatpush3.bf16.msra.mxu0 %v1837_v4 }
 0x56a   :  { %v1251_v51 = vsel %vm148_vm0, %v1245_v50, 0.0 }
 0x56b   :  { %1252 = vadd.xlane.f32.xlu1 %v1251_v51 }
 0x5f0   :  { %v1250_v52 = vpop.xlane.xlu0 %1249 }
 0x5f1   :  { %v1255_v53 = vmul.f32 0.03125, %v1250_v52 }
 0x5f3   :  { %v1257_v54 = vsub.f32 %v1244_v45, %v1255_v53 }
 0x5f4   :  { %v1253_v55 = vpop.xlane.xlu1 %1252 }
 0x5f5   :  { %v1256_v56 = vmul.f32 0.03125, %v1253_v55  ;;  %v1259_v57 = vmul.f32 %v1257_v54, %v1257_v54 }
 0x5f7   :  { %v1258_v58 = vsub.f32 %v1245_v50, %v1256_v56  ;;  %v1261_v3 = vsel %vm148_vm0, %v1259_v57, 0.0 }
 0x5f8   :  { %1262 = vadd.xlane.f32.xlu0 %v1261_v3 }
 0x5f9   :  { %v1260_v59 = vmul.f32 %v1258_v58, %v1258_v58 }
 0x5fb   :  { %v1264_v60 = vsel %vm148_vm0, %v1260_v59, 0.0 }
 0x5fc   :  { %1265 = vadd.xlane.f32.xlu0 %v1264_v60 }
 0x681   :  { %v1263_v63 = vpop.xlane.xlu0 %1262 }
 0x682   :  { %v1267_v1 = vmul.f32 0.03125, %v1263_v63 }
 0x684   :  { %v1269_v2 = vadd.f32 1e-05, %v1267_v1 }
 0x685   :  { %v1266_v5 = vpop.xlane.xlu0 %1265 }
 0x686   :  { %1875 = vrsqrt.f32 %v1269_v2  ;;  %v1268_v6 = vmul.f32 0.03125, %v1266_v5 }
 0x688   :  { %v1270_v7 = vadd.f32 1e-05, %v1268_v6  ;;  %v1608_v6 = vld [vmem:[%s2417_s11] ss:$0 sm:$0xff] }
 0x68a   :  { %1877 = vrsqrt.f32 %v1270_v7 }
 0x693   :  { %v1876_v8 = vpop.eup %1875 }
 0x694   :  { %v1273_v10 = vmul.f32 %v1876_v8, %v1257_v54  ;;  %v1609_v8 = vld [vmem:[%s2418_s12] ss:$0 sm:$0xff] }
 0x696   :  { %v1281_v12 = vmul.f32 %v1593_v9, %v1273_v10 }
 0x697   :  { %v1878_v13 = vpop.eup %1877 }
 0x698   :  { %v1289_v14 = vadd.f32 %v1594_v11, %v1281_v12  ;;  %v1274_v15 = vmul.f32 %v1878_v13, %v1258_v58 }
 0x69a   :  { %1291 = vst.msk [vmem:[#allocation4] sm:$0xff] %vm148_vm0, %v1289_v14  ;;  %v1618_v16 = vpack.c.bf16 %v1289_v14, %v1289_v14  ;;  %v1282_v17 = vmul.f32 %v1593_v9, %v1274_v15 }
 0x69c   :  { %1302 = vst.msk [vmem:[#allocation5] sm:$0xf] %vm1301_vm9, %v1618_v16  ;;  %v1290_v18 = vadd.f32 %v1594_v11, %v1282_v17 }
 0x69e   :  { %1292 = vst.msk [vmem:[#allocation4 + $0x8] sm:$0xff] %vm148_vm0, %v1290_v18  ;;  %v1619_v19 = vpack.c.bf16 %v1290_v18, %v1290_v18 }
 0x6a0   :  { %1303 = vst.msk [vmem:[#allocation5 + $0x4] sm:$0xf] %vm1301_vm9, %v1619_v19 }
 0x6a1   :  { %v1481_v44 = vld [vmem:[#allocation4] sm:$0xff] }
 0x6a5   :  { %v1482_v49 = vld [vmem:[#allocation4 + $0x8] sm:$0xff] }
 0x6a7   :  { %v1838_v20 = vld [vmem:[#allocation5] sm:$0xff]  }
 0x6a8   :  { %1783 = vmatmul.mubr.msk.bf16.vlgmr.msra.gmra.mxu0 %vm148_vm0, %v1838_v20 }
 0x768   :  { %v1374_v29 = vpop.f32.mrf.mxu0 }
 0x769   :  { %v1375_v31 = vadd.f32 %v1597_v28, %v1374_v29 }
 0x76a   :  { %v1784_v30 = vpop.f32.mrf.mxu0 }
 0x76b   :  { %v1381_v35 = vmax.f32 %v1375_v31, 0.0 }
 0x76c   :  { %v1377_v32 = vpop.f32.mrf.mxu0 }
 0x76d   :  { %v1378_v33 = vadd.f32 %v1597_v28, %v1377_v32 }
 0x76e   :  { %v1785_v34 = vpop.f32.mrf.mxu0 }
 0x76f   :  { %v1382_v36 = vmax.f32 %v1378_v33, 0.0 }
 0x771   :  { %v1385_v37 = vpack.c.bf16 %v1382_v36, %v1381_v35 }
 0x773   :  { %1795 = vmatmul.mubr.msk.bf16.vlgmr.msra.gmra.mxu1 %vm1418_vm10, %v1385_v37 }
 0x833   :  { %v1456_v39 = vpop.f32.mrf.mxu1 }
 0x834   :  { %v1463_v0 = vadd.f32 %v1456_v39, %v1383_v38 }
 0x835   :  { %v1796_v22 = vpop.f32.mrf.mxu1 }
 0x836   :  { %1465 = vst.msk [vmem:[#allocation6] sm:$0xff] %vm148_vm0, %v1463_v0 }
 0x837   :  { %v1459_v21 = vpop.f32.mrf.mxu1 }
 0x838   :  { %v1464_v23 = vadd.f32 %v1459_v21, %v1384_v40 }
 0x839   :  { %v1797_v24 = vpop.f32.mrf.mxu1 }
 0x83a   :  { %1466 = vst.msk [vmem:[#allocation6 + $0x8] sm:$0xff] %vm148_vm0, %v1464_v23 }
 0x83d   :  { %v1470_v42 = vld [vmem:[#allocation6] sm:$0xff] }
 0x83e   :  { %v1479_v43 = vadd.f32 %v1607_v41, %v1470_v42 }
 0x840   :  { %v1483_v45 = vadd.f32 %v1481_v44, %v1479_v43 }
 0x841   :  { %v1471_v46 = vld [vmem:[#allocation6 + $0x8] sm:$0xff] }
 0x842   :  { %v1487_v47 = vsel %vm148_vm0, %v1483_v45, 0.0  ;;  %v1480_v48 = vadd.f32 %v1607_v41, %v1471_v46 }
 0x843   :  { %1488 = vadd.xlane.f32.xlu1 %v1487_v47 }
 0x844   :  { %v1484_v50 = vadd.f32 %v1482_v49, %v1480_v48 }
 0x846   :  { %v1490_v51 = vsel %vm148_vm0, %v1484_v50, 0.0 }
 0x847   :  { %1491 = vadd.xlane.f32.xlu0 %v1490_v51 }
 0x8cc   :  { %v1489_v52 = vpop.xlane.xlu1 %1488 }
 0x8cd   :  { %v1494_v53 = vmul.f32 0.03125, %v1489_v52 }
 0x8cf   :  { %v1496_v54 = vsub.f32 %v1483_v45, %v1494_v53 }
 0x8d0   :  { %v1492_v55 = vpop.xlane.xlu0 %1491 }
 0x8d1   :  { %v1495_v56 = vmul.f32 0.03125, %v1492_v55  ;;  %v1498_v57 = vmul.f32 %v1496_v54, %v1496_v54 }
 0x8d3   :  { %v1497_v58 = vsub.f32 %v1484_v50, %v1495_v56  ;;  %v1500_v3 = vsel %vm148_vm0, %v1498_v57, 0.0 }
 0x8d4   :  { %1501 = vadd.xlane.f32.xlu1 %v1500_v3 }
 0x8d5   :  { %v1499_v59 = vmul.f32 %v1497_v58, %v1497_v58 }
 0x8d7   :  { %v1503_v60 = vsel %vm148_vm0, %v1499_v59, 0.0 }
 0x8d8   :  { %1504 = vadd.xlane.f32.xlu0 %v1503_v60 }
 0x95d   :  { %v1502_v61 = vpop.xlane.xlu1 %1501 }
 0x95e   :  { %v1506_v4 = vmul.f32 0.03125, %v1502_v61 }
 0x960   :  { %v1508_v62 = vadd.f32 1e-05, %v1506_v4 }
 0x961   :  { %v1505_v63 = vpop.xlane.xlu0 %1504 }
 0x962   :  { %1879 = vrsqrt.f32 %v1508_v62  ;;  %v1507_v1 = vmul.f32 0.03125, %v1505_v63 }
 0x964   :  { %v1509_v2 = vadd.f32 1e-05, %v1507_v1 }
 0x966   :  { %1881 = vrsqrt.f32 %v1509_v2 }
 0x96f   :  { %v1880_v5 = vpop.eup %1879 }
 0x970   :  { %v1512_v7 = vmul.f32 %v1880_v5, %v1496_v54 }
 0x972   :  { %v1520_v9 = vmul.f32 %v1608_v6, %v1512_v7 }
 0x973   :  { %v1882_v10 = vpop.eup %1881 }
 0x974   :  { %v1513_v11 = vmul.f32 %v1882_v10, %v1497_v58  ;;  %v1528_v12 = vadd.f32 %v1609_v8, %v1520_v9 }
 0x976   :  { %v1521_v13 = vmul.f32 %v1608_v6, %v1513_v11  ;;  %1530 = vst.msk [vmem:[#allocation18] sm:$0xff] %vm148_vm0, %v1528_v12 }
 0x978   :  { %v1529_v14 = vadd.f32 %v1609_v8, %v1521_v13 }
 0x97a   :  { %1531 = vst.msk [vmem:[#allocation18 + $0x8] sm:$0xff] %vm148_vm0, %v1529_v14 }
 0x97b   :  { %2014 = shalt.err (!%p2011_p6)
}
 0x97c   :  { %s2057_s11 = smov 128  }
 0x97d   :  { %1543 = dma.vmem_to_hbm [thread:$0]  %s1538_s30, 256, %s2419_s13, [#allocation9], %s2057_s11, %s2057_s11, %s2053_s2  }
 0x97e   :  { %2031 = dma.done.wait [#allocation9], 256  }
 0x97f   :  { %2032 = vsyncadd [#allocation9], 4294967040 }
 0x980   :  { %1547 = vsyncpa [#allocation8], 1 }
 0x981   :  { %1548 = vsyncpa [#allocation11], 1 }
 0x982   :  { %1549 = vsyncpa [#allocation14], 1 }
 0x983   :  { %1550 = vsyncpa [#allocation17], 1 }
 0x984   :  { %1551 = vsyncpa [#allocation9], 1 }

// kernel: tpu_custom_call.1
= control target key start
LH: loop header
LB: loop body
LE: loop exit
PB: predicated region body
PF: predicated region fallthrough
CT: control target
= control target key end

     0   :  { %18 = vsyncpa [#allocation8], 0  ;;  %s2406_s0 = inlined_call_operand.vmem [shape: f32[2,8,32], index: 0, kind: input, shape index: {}]   ;;  %s2407_s1 = inlined_call_operand.vmem [shape: bf16[32,96], index: 1, kind: input, shape index: {}]   ;;  %s2408_s2 = inlined_call_operand.hbm [shape: f32[1,96], index: 2, kind: input, shape index: {}]   ;;  %s2409_s3 = inlined_call_operand.vmem [shape: bf16[32,32], index: 3, kind: input, shape index: {}]   ;;  %s2410_s4 = inlined_call_operand.hbm [shape: f32[1,32], index: 4, kind: input, shape index: {}]   ;;  %s2411_s5 = inlined_call_operand.hbm [shape: f32[1,32], index: 5, kind: input, shape index: {}]   ;;  %s2412_s6 = inlined_call_operand.hbm [shape: f32[1,32], index: 6, kind: input, shape index: {}]   ;;  %s2413_s7 = inlined_call_operand.hbm [shape: bf16[32,64], index: 7, kind: input, shape index: {}]   ;;  %s2414_s8 = inlined_call_operand.hbm [shape: f32[1,64], index: 8, kind: input, shape index: {}]   ;;  %s2415_s9 = inlined_call_operand.vmem [shape: bf16[64,32], index: 9, kind: input, shape index: {}]   ;;  %s2416_s10 = inlined_call_operand.vmem [shape: f32[1,32], index: 10, kind: input, shape index: {}]   ;;  %s2417_s11 = inlined_call_operand.vmem [shape: f32[1,32], index: 11, kind: input, shape index: {}]   ;;  %s2418_s12 = inlined_call_operand.vmem [shape: f32[1,32], index: 12, kind: input, shape index: {}]   ;;  %s2419_s13 = inlined_call_operand.hbm [shape: f32[2,8,32], index: 13, kind: output, shape index: {}]  }
   0x1   :  { %19 = vsyncpa [#allocation11], 0 }
   0x2   :  { %20 = vsyncpa [#allocation14], 0 }
   0x3   :  { %21 = vsyncpa [#allocation17], 0 }
   0x4   :  { %22 = vsyncpa [#allocation9], 0  ;;  %s2033_s25 = smov [#allocation10]   ;;  %s2034_s27 = smov [#allocation13]  }
   0x5   :  { %s45_s26 = sshll.u32 %s2033_s25, 4  ;;  %s65_s28 = sshll.u32 %s2034_s27, 4  ;;  %s46_s26 = int_to_ptr.vmem [resolvable:$true] %s45_s26  ;;  %s66_s28 = int_to_ptr.vmem [resolvable:$true] %s65_s28 }
   0x6   :  { %s1891_s29 = scalar_lea.vmem %s46_s26, 16  ;;  %s1895_s30 = scalar_lea.vmem %s46_s26, 32 }
   0x7   :  { %p1892_p0 = scmp.ne.s32.totalorder %s46_s26, %s1891_s29  ;;  %p1896_p1 = scmp.lt.s32.totalorder %s46_s26, %s46_s26 }
   0x8   :  { %p1897_p2 = scmp.lt.s32.totalorder %s1895_s30, %s1891_s29 }
   0xa   :  { %p1898_p3 = por %p1897_p2, %p1896_p1 }
   0xc   :  { %p1899_p4 = pnand %p1898_p3, %p1892_p0 }
   0xe   :  { %1902 = shalt.err (!%p1899_p4)
}
   0xf   :  { %48 = dma.hbm_to_vmem [thread:$0]  %s2410_s4, 16, %s46_s26, [#allocation11]  }
  0x10   :  { %s1911_s16 = scalar_lea.vmem %s66_s28, 16  ;;  %s1915_s17 = scalar_lea.vmem %s66_s28, 32 }
  0x11   :  { %p1912_p5 = scmp.ne.s32.totalorder %s66_s28, %s1911_s16  ;;  %p1916_p6 = scmp.lt.s32.totalorder %s66_s28, %s66_s28 }
  0x12   :  { %p1917_p7 = scmp.lt.s32.totalorder %s1915_s17, %s1911_s16 }
  0x14   :  { %p1918_p8 = por %p1917_p7, %p1916_p6 }
  0x16   :  { %p1919_p9 = pnand %p1918_p8, %p1912_p5 }
  0x18   :  { %1922 = shalt.err (!%p1919_p9)
}
  0x19   :  { %68 = dma.hbm_to_vmem [thread:$0]  %s2412_s6, 16, %s66_s28, [#allocation14]  }
  0x1a   :  { %s2035_s20 = smov [#allocation7]   ;;  %s2036_s22 = smov [#allocation12]  }
  0x1b   :  { %s33_s21 = sshll.u32 %s2035_s20, 4  ;;  %s55_s23 = sshll.u32 %s2036_s22, 4  ;;  %s34_s21 = int_to_ptr.vmem [resolvable:$true] %s33_s21  ;;  %s56_s23 = int_to_ptr.vmem [resolvable:$true] %s55_s23 }
  0x1c   :  { %s1931_s24 = scalar_lea.vmem %s34_s21, 16  ;;  %s1935_s4 = scalar_lea.vmem %s34_s21, 32 }
  0x1d   :  { %p1932_p10 = scmp.ne.s32.totalorder %s34_s21, %s1931_s24  ;;  %p1936_p11 = scmp.lt.s32.totalorder %s34_s21, %s34_s21 }
  0x1e   :  { %p1937_p12 = scmp.lt.s32.totalorder %s1935_s4, %s1931_s24 }
  0x20   :  { %p1938_p13 = por %p1937_p12, %p1936_p11 }
  0x22   :  { %p1939_p0 = pnand %p1938_p13, %p1932_p10 }
  0x24   :  { %1942 = shalt.err (!%p1939_p0)
}
  0x25   :  { %36 = dma.hbm_to_vmem [thread:$0]  %s2408_s2, 16, %s34_s21, [#allocation8]  }
  0x26   :  { %s1951_s27 = scalar_lea.vmem %s56_s23, 16  ;;  %s1955_s6 = scalar_lea.vmem %s56_s23, 32 }
  0x27   :  { %p1952_p1 = scmp.ne.s32.totalorder %s56_s23, %s1951_s27  ;;  %p1956_p2 = scmp.lt.s32.totalorder %s56_s23, %s56_s23 }
  0x28   :  { %p1957_p3 = scmp.lt.s32.totalorder %s1955_s6, %s1951_s27 }
  0x2a   :  { %p1958_p4 = por %p1957_p3, %p1956_p2 }
  0x2c   :  { %p1959_p5 = pnand %p1958_p4, %p1952_p1 }
  0x2e   :  { %1962 = shalt.err (!%p1959_p5)
}
  0x2f   :  { %58 = dma.hbm_to_vmem [thread:$0]  %s2411_s5, 16, %s56_s23, [#allocation11]  }
  0x30   :  { %s2037_s30 = smov [#allocation15]  }
  0x31   :  { %s74_s14 = sshll.u32 %s2037_s30, 4  ;;  %s75_s14 = int_to_ptr.vmem [resolvable:$true] %s74_s14 }
  0x32   :  { %s1971_s15 = scalar_lea.vmem %s75_s14, 256  ;;  %p1976_p7 = scmp.lt.s32.totalorder %s75_s14, %s75_s14 }
  0x33   :  { %p1972_p6 = scmp.ne.s32.totalorder %s75_s14, %s1971_s15  ;;  %p1977_p8 = scmp.lt.s32.totalorder %s1971_s15, %s1971_s15 }
  0x35   :  { %p1978_p9 = por %p1977_p8, %p1976_p7 }
  0x37   :  { %p1979_p10 = pnand %p1978_p9, %p1972_p6 }
  0x39   :  { %1982 = shalt.err (!%p1979_p10)
}
  0x3a   :  { %s2038_s2 = smov 64   ;;  %s2039_s16 = smov 4  }
  0x3b   :  { %80 = dma.hbm_to_vmem [thread:$0]  %s2413_s7, 256, %s75_s14, [#allocation14], %s2038_s2, %s2038_s2, %s2039_s16  }
  0x3c   :  { %s2040_s19 = smov [#allocation16]  }
  0x3d   :  { %s87_s5 = sshll.u32 %s2040_s19, 4  ;;  %s88_s5 = int_to_ptr.vmem [resolvable:$true] %s87_s5 }
  0x3e   :  { %s1991_s20 = scalar_lea.vmem %s88_s5, 16  ;;  %s1995_s21 = scalar_lea.vmem %s88_s5, 32 }
  0x3f   :  { %p1992_p11 = scmp.ne.s32.totalorder %s88_s5, %s1991_s20  ;;  %p1996_p12 = scmp.lt.s32.totalorder %s88_s5, %s88_s5 }
  0x40   :  { %p1997_p13 = scmp.lt.s32.totalorder %s1995_s21, %s1991_s20 }
  0x42   :  { %p1998_p0 = por %p1997_p13, %p1996_p12 }
  0x44   :  { %p1999_p1 = pnand %p1998_p0, %p1992_p11 }
  0x46   :  { %2002 = shalt.err (!%p1999_p1)
}
  0x47   :  { %90 = dma.hbm_to_vmem [thread:$0]  %s2414_s8, 16, %s88_s5, [#allocation17]  }
  0x48   :  { %2023 = dma.done.wait [#allocation8], 16  }
  0x49   :  { %2024 = vsyncadd [#allocation8], 4294967280 }
  0x4a   :  { %2025 = dma.done.wait [#allocation11], 32  }
  0x4b   :  { %2026 = vsyncadd [#allocation11], 4294967264 }
  0x4c   :  { %2027 = dma.done.wait [#allocation14], 272  }
  0x4d   :  { %2028 = vsyncadd [#allocation14], 4294967024 }
  0x4e   :  { %2029 = dma.done.wait [#allocation17], 16  }
  0x4f   :  { %2030 = vsyncadd [#allocation17], 4294967280  ;;  %vm148_vm0 = vcmask 261120   ;;  %v2041_v0 = vmov 0.0   ;;  %vm2042_vm1 = vmmov 0   ;;  %v1823_v1 = vld [vmem:[%s2407_s1 + $0x8] sm:$0xff]  }
  0x50   :  { %1666 = vmatprep.subr.bf16.mxu0 %v2041_v0  ;;  %1670 = vmatprep.mubr.msk.bf16.mxu0 %vm2042_vm1, %v2041_v0  ;;  %1304 = vst.msk [vmem:[#allocation6] sm:$0xff] %vm148_vm0, %v2041_v0  ;;  %1305 = vst.msk [vmem:[#allocation6 + $0x8] sm:$0xff] %vm148_vm0, %v2041_v0  ;;  %v1824_v2 = vld [vmem:[%s2407_s1] sm:$0xff]   ;;  %v2172_v4 = vld [vmem:[%s2406_s0 + $0x8] sm:$0xff]  ;;  %vm201_vm2 = vcmask 781312   ;;  %s2044_s1 = smov 96  }
  0x51   :  { %1674 = vmatprep.subr.bf16.mxu1 %v2041_v0  ;;  %1676 = vmatprep.mubr.msk.bf16.mxu1 %vm2042_vm1, %v2041_v0  ;;  %v2167_v3 = vld [vmem:[%s2406_s0] sm:$0xff]  ;;  %v1552_v6 = vld [vmem:[#allocation7] ss:$0 sm:$0xff]  ;;  %s2043_s0 = smov 120   ;;  %s2045_s28 = smov 80   ;;  %vm210_vm3 = vcmask 64512  }
  0x52   :  { %1667 = vmatpush3.bf16.msra.mxu0 %v1823_v1  ;;  %v124_v5 = vpack.c.bf16 %v2172_v4, %v2167_v3  ;;  %s2046_s29 = smov 88   ;;  %s2047_s30 = smov 72   ;;  %vm273_vm4 = vcmask 1043456   ;;  %vm319_vm5 = vcmask 60416   ;;  %vm442_vm6 = vcmask 126016  }
  0x53   :  { %1668 = vmatprep.subr.bf16.mxu0 %v2041_v0  ;;  %s2048_s14 = smov 112   ;;  %s2049_s15 = smov 104   ;;  %vm565_vm7 = vcmask 191616   ;;  %vm688_vm8 = vcmask 257216   ;;  %vm1301_vm9 = vcmask 257024   ;;  %vm1418_vm10 = vcmask 523264  }
  0x54   :  { %s2050_s16 = smov 56   ;;  %s2051_s17 = smov 48  }
  0x55   :  { %s2052_s18 = smov 40   ;;  %s2054_s19 = smov 16  }
  0x56   :  { %1669 = vmatpush3.bf16.msra.mxu0 %v1824_v2  ;;  %s2055_s21 = smov 24  }
  0x57   :  { %1680 = vmatprep.subr.bf16.mxu0 %v2041_v0 }
  0x59   :  { %1671 = vmatmul.mubr.msk.bf16.vlgmr.msra.gmra.mxu0 %vm148_vm0, %v124_v5 }
  0x5a   :  { %1682 = vmatprep.mubr.msk.bf16.mxu0 %vm2042_vm1, %v2041_v0 }
 0x119   :  { %v186_v7 = vpop.f32.mrf.mxu0 }
 0x11a   :  { %v187_v8 = vadd.f32 %v1552_v6, %v186_v7 }
 0x11b   :  { %v1672_v9 = vpop.f32.mrf.mxu0 }
 0x11c   :  { %v1610_v10 = vpack.c.bf16 %v187_v8, %v187_v8 }
 0x11d   :  { %v189_v11 = vpop.f32.mrf.mxu0 }
 0x11e   :  { %202 = vst.msk [vmem:[#allocation2] sm:$0xf] %vm201_vm2, %v1610_v10  ;;  %v190_v12 = vadd.f32 %v1552_v6, %v189_v11 }
 0x11f   :  { %v1673_v13 = vpop.f32.mrf.mxu0 }
 0x120   :  { %v1611_v14 = vpack.c.bf16 %v190_v12, %v190_v12 }
 0x122   :  { %203 = vst.msk [vmem:[#allocation2 + $0x4] sm:$0xf] %vm201_vm2, %v1611_v14 }
 0x125   :  { %v1825_v15 = vld [vmem:[#allocation2] ss:$0 sps:$4 sm:$0xff]  }
 0x126   :  { %v204_v16 = vld [vmem:[#allocation2] sm:$0xf]  ;;  %325 = vrot.lane.b32.xlu1 %v1825_v15, %s2043_s0 }
 0x127   :  { %v1558_v17 = vcombine.low %v204_v16, %v204_v16  ;;  %v2181_v18 = vld [vmem:[#allocation2] ss:$0 sps:$4 sm:$0xff]  }
 0x128   :  { %v2184_v19 = vld [vmem:[#allocation2] ss:$0 sps:$4 sm:$0xff]  }
 0x129   :  { %208 = vrot.lane.b32.xlu0 %v1558_v17, %s2044_s1  ;;  %v2186_v20 = vld [vmem:[#allocation2 + $0x4] sm:$0xf] }
 0x12a   :  { %450 = vrot.lane.b32.xlu1 %v2181_v18, %s2045_s28  ;;  %v2192_v21 = vcombine.low %v2186_v20, %v2186_v20  ;;  %v2196_v22 = vld [vmem:[#allocation2 + $0x4] ss:$0 sps:$4 sm:$0xff]  }
 0x12b   :  { %v2200_v23 = vld [vmem:[#allocation2 + $0x4] ss:$0 sps:$4 sm:$0xff]  }
 0x12c   :  { %v2204_v24 = vld [vmem:[#allocation2 + $0x4] ss:$0 sps:$4 sm:$0xff]  }
 0x12d   :  { %327 = vrot.lane.b32.xlu0 %v1825_v15, %s2046_s29 }
 0x12e   :  { %573 = vrot.lane.b32.xlu1 %v2184_v19, %s2047_s30 }
 0x131   :  { %448 = vrot.lane.b32.xlu0 %v2181_v18, %s2048_s14 }
 0x132   :  { %694 = vrot.lane.b32.xlu1 %v2192_v21, %s2044_s1 }
 0x135   :  { %571 = vrot.lane.b32.xlu0 %v2184_v19, %s2049_s15 }
 0x136   :  { %808 = vrot.lane.b32.xlu1 %v2196_v22, %s2043_s0 }
 0x139   :  { %810 = vrot.lane.b32.xlu0 %v2196_v22, %s2046_s29  ;;  %s2056_s29 = smov [#allocation18]  }
 0x13a   :  { %930 = vrot.lane.b32.xlu1 %v2200_v23, %s2048_s14 }
 0x13d   :  { %932 = vrot.lane.b32.xlu0 %v2200_v23, %s2045_s28 }
 0x13e   :  { %1052 = vrot.lane.b32.xlu1 %v2204_v24, %s2049_s15 }
 0x141   :  { %1054 = vrot.lane.b32.xlu0 %v2204_v24, %s2047_s30  ;;  %s1537_s30 = sshll.u32 %s2056_s29, 4  ;;  %s1538_s30 = int_to_ptr.vmem [resolvable:$true] %s1537_s30 }
 0x142   :  { %268 = vrot.lane.b32.xlu1 %v1558_v17, %s2038_s2  ;;  %s2003_s14 = scalar_lea.vmem %s1538_s30, 256  ;;  %p2008_p3 = scmp.lt.s32.totalorder %s1538_s30, %s1538_s30 }
 0x143   :  { %p2004_p2 = scmp.ne.s32.totalorder %s1538_s30, %s2003_s14  ;;  %p2009_p4 = scmp.lt.s32.totalorder %s2003_s14, %s2003_s14 }
 0x145   :  { %386 = vrot.lane.b32.xlu0 %v1825_v15, %s2050_s16  ;;  %p2010_p5 = por %p2009_p4, %p2008_p3 }
 0x147   :  { %p2011_p6 = pnand %p2010_p5, %p2004_p2 }
 0x198   :  { %v326_v25 = vpop.permute.xlu1 %325 }
 0x19b   :  { %v209_v26 = vpop.permute.xlu0 %208 }
 0x19c   :  { %v215_v27 = vsel %vm210_vm3, %v209_v26, 0  ;;  %v451_v28 = vpop.permute.xlu1 %450 }
 0x19d   :  { %1675 = vmatpush3.bf16.xpose.msra.mxu1 %v215_v27  ;;  %v456_v34 = vsel %vm210_vm3, %v451_v28, 0 }
 0x19e   :  { %1686 = vmatprep.subr.bf16.mxu1 %v2041_v0 }
 0x19f   :  { %v328_v29 = vpop.permute.xlu0 %327 }
 0x1a0   :  { %v574_v30 = vpop.permute.xlu1 %573  ;;  %v333_v31 = vsel %vm210_vm3, %v328_v29, 0 }
 0x1a1   :  { %v579_v38 = vsel %vm210_vm3, %v574_v30, 0 }
 0x1a3   :  { %v449_v37 = vpop.permute.xlu0 %448 }
 0x1a4   :  { %1677 = vmatmul.mubr.msk.bf16.vlgmr.msra.gmra.mxu1 %vm210_vm3, %v204_v16  ;;  %v695_v32 = vpop.permute.xlu1 %694 }
 0x1a5   :  { %1687 = vmatpush3.bf16.xpose.msra.mxu1 %v333_v31  ;;  %1688 = vmatprep.mubr.msk.bf16.mxu1 %vm2042_vm1, %v2041_v0  ;;  %v700_v42 = vsel %vm210_vm3, %v695_v32, 0 }
 0x1a6   :  { %1698 = vmatprep.subr.bf16.mxu1 %v2041_v0 }
 0x1a7   :  { %v572_v41 = vpop.permute.xlu0 %571 }
 0x1a8   :  { %v809_v33 = vpop.permute.xlu1 %808 }
 0x1ab   :  { %v811_v43 = vpop.permute.xlu0 %810 }
 0x1ac   :  { %1689 = vmatmul.mubr.msk.bf16.vlgmr.msra.gmra.mxu1 %vm210_vm3, %v326_v25  ;;  %v931_v35 = vpop.permute.xlu1 %930  ;;  %v816_v44 = vsel %vm210_vm3, %v811_v43, 0 }
 0x1ad   :  { %1699 = vmatpush3.bf16.xpose.msra.mxu1 %v456_v34  ;;  %1700 = vmatprep.mubr.msk.bf16.mxu1 %vm2042_vm1, %v2041_v0 }
 0x1ae   :  { %1710 = vmatprep.subr.bf16.mxu1 %v2041_v0 }
 0x1af   :  { %v933_v45 = vpop.permute.xlu0 %932 }
 0x1b0   :  { %v1053_v36 = vpop.permute.xlu1 %1052  ;;  %v938_v46 = vsel %vm210_vm3, %v933_v45, 0 }
 0x1b3   :  { %v1055_v47 = vpop.permute.xlu0 %1054 }
 0x1b4   :  { %1701 = vmatmul.mubr.msk.bf16.vlgmr.msra.gmra.mxu1 %vm210_vm3, %v449_v37  ;;  %v269_v39 = vpop.permute.xlu1 %268  ;;  %v1060_v48 = vsel %vm210_vm3, %v1055_v47, 0 }
 0x1b5   :  { %1711 = vmatpush3.bf16.xpose.msra.mxu1 %v579_v38  ;;  %1712 = vmatprep.mubr.msk.bf16.mxu1 %vm2042_vm1, %v2041_v0  ;;  %v275_v40 = vsel %vm273_vm4, %v269_v39, 0 }
 0x1b6   :  { %1722 = vmatprep.subr.bf16.mxu1 %v2041_v0  ;;  %1681 = vmatpush3.bf16.msra.mxu0 %v275_v40 }
 0x1b7   :  { %1692 = vmatprep.subr.bf16.mxu0 %v2041_v0  ;;  %v387_v32 = vpop.permute.xlu0 %386 }
 0x1b8   :  { %v392_v40 = vsel %vm273_vm4, %v387_v32, 0 }
 0x1bc   :  { %1713 = vmatmul.mubr.msk.bf16.vlgmr.msra.gmra.mxu1 %vm210_vm3, %v572_v41 }
 0x1bd   :  { %1723 = vmatpush3.bf16.xpose.msra.mxu1 %v700_v42  ;;  %1724 = vmatprep.mubr.msk.bf16.mxu1 %vm2042_vm1, %v2041_v0 }
 0x1be   :  { %1734 = vmatprep.subr.bf16.mxu1 %v2041_v0 }
 0x1c4   :  { %1725 = vmatmul.mubr.msk.bf16.vlgmr.msra.gmra.mxu1 %vm210_vm3, %v2186_v20 }
 0x1c5   :  { %1735 = vmatpush3.bf16.xpose.msra.mxu1 %v816_v44  ;;  %1736 = vmatprep.mubr.msk.bf16.mxu1 %vm2042_vm1, %v2041_v0 }
 0x1c6   :  { %1746 = vmatprep.subr.bf16.mxu1 %v2041_v0 }
 0x1cc   :  { %1737 = vmatmul.mubr.msk.bf16.vlgmr.msra.gmra.mxu1 %vm210_vm3, %v809_v33 }
 0x1cd   :  { %1747 = vmatpush3.bf16.xpose.msra.mxu1 %v938_v46  ;;  %1748 = vmatprep.mubr.msk.bf16.mxu1 %vm2042_vm1, %v2041_v0 }
 0x1ce   :  { %1758 = vmatprep.subr.bf16.mxu1 %v2041_v0 }
 0x1d4   :  { %1749 = vmatmul.mubr.msk.bf16.vlgmr.msra.gmra.mxu1 %vm210_vm3, %v931_v35 }
 0x1d5   :  { %1759 = vmatpush3.bf16.xpose.msra.mxu1 %v1060_v48  ;;  %1760 = vmatprep.mubr.msk.bf16.mxu1 %vm2042_vm1, %v2041_v0 }
 0x1d6   :  { %1770 = vmatprep.subr.bf16.mxu1 %v2041_v0 }
 0x1dc   :  { %1761 = vmatmul.mubr.msk.bf16.vlgmr.msra.gmra.mxu1 %vm210_vm3, %v1053_v36 }
 0x1dd   :  { %1774 = vmatprep.mubr.msk.bf16.mxu1 %vm2042_vm1, %v2041_v0 }
 0x264   :  { %v251_v49 = vpop.f32.mrf.mxu1 }
 0x265   :  { %v257_v50 = vsel %vm210_vm3, %v251_v49, -inf }
 0x266   :  { %v1678_v51 = vpop.f32.mrf.mxu1  ;;  %258 = vmax.xlane.f32.xlu0 %v257_v50 }
 0x268   :  { %v254_v52 = vpop.f32.mrf.mxu1 }
 0x26a   :  { %v1679_v53 = vpop.f32.mrf.mxu1 }
 0x26c   :  { %v369_v54 = vpop.f32.mrf.mxu1 }
 0x26d   :  { %v375_v55 = vsel %vm210_vm3, %v369_v54, -inf }
 0x26e   :  { %v1690_v56 = vpop.f32.mrf.mxu1  ;;  %376 = vmax.xlane.f32.xlu1 %v375_v55 }
 0x270   :  { %v372_v57 = vpop.f32.mrf.mxu1 }
 0x272   :  { %v1691_v58 = vpop.f32.mrf.mxu1 }
 0x274   :  { %v2255_v59 = vpop.f32.mrf.mxu1 }
 0x276   :  { %v1702_v60 = vpop.f32.mrf.mxu1 }
 0x278   :  { %v495_v61 = vpop.f32.mrf.mxu1 }
 0x27a   :  { %v1703_v62 = vpop.f32.mrf.mxu1 }
 0x27c   :  { %v2257_v63 = vpop.f32.mrf.mxu1  ;;  %509 = vrot.lane.b32.xlu0 %v2181_v18, %s2051_s17  ;;  %v498_v18 = vsel %vm210_vm3, %v2255_v59, -inf }
 0x27d   :  { %v621_v25 = vsel %vm210_vm3, %v2257_v63, -inf }
 0x27e   :  { %v1714_v1 = vpop.f32.mrf.mxu1 }
 0x27f   :  { %632 = vrot.lane.b32.xlu1 %v2184_v19, %s2052_s18 }
 0x280   :  { %v618_v2 = vpop.f32.mrf.mxu1 }
 0x282   :  { %v1715_v5 = vpop.f32.mrf.mxu1 }
 0x284   :  { %v2263_v6 = vpop.f32.mrf.mxu1 }
 0x285   :  { %v742_v28 = vsel %vm210_vm3, %v2263_v6, -inf }
 0x286   :  { %v1726_v7 = vpop.f32.mrf.mxu1 }
 0x288   :  { %v739_v8 = vpop.f32.mrf.mxu1 }
 0x28a   :  { %v1727_v9 = vpop.f32.mrf.mxu1 }
 0x28c   :  { %v2265_v10 = vpop.f32.mrf.mxu1 }
 0x28d   :  { %v858_v29 = vsel %vm210_vm3, %v2265_v10, -inf }
 0x28e   :  { %v1738_v11 = vpop.f32.mrf.mxu1 }
 0x290   :  { %v855_v12 = vpop.f32.mrf.mxu1 }
 0x292   :  { %v1739_v13 = vpop.f32.mrf.mxu1 }
 0x294   :  { %v2267_v14 = vpop.f32.mrf.mxu1 }
 0x295   :  { %v980_v30 = vsel %vm210_vm3, %v2267_v14, -inf }
 0x296   :  { %v1750_v15 = vpop.f32.mrf.mxu1 }
 0x298   :  { %v977_v16 = vpop.f32.mrf.mxu1 }
 0x29a   :  { %v1751_v17 = vpop.f32.mrf.mxu1 }
 0x29b   :  { %499 = vmax.xlane.f32.xlu0 %v498_v18 }
 0x29c   :  { %v2271_v19 = vpop.f32.mrf.mxu1 }
 0x29d   :  { %v1102_v31 = vsel %vm210_vm3, %v2271_v19, -inf }
 0x29e   :  { %v1762_v20 = vpop.f32.mrf.mxu1 }
 0x29f   :  { %622 = vmax.xlane.f32.xlu0 %v621_v25 }
 0x2a0   :  { %v1099_v26 = vpop.f32.mrf.mxu1 }
 0x2a2   :  { %v1763_v27 = vpop.f32.mrf.mxu1 }
 0x2a3   :  { %743 = vmax.xlane.f32.xlu0 %v742_v28  ;;  %859 = vmax.xlane.f32.xlu1 %v858_v29 }
 0x2a7   :  { %981 = vmax.xlane.f32.xlu0 %v980_v30 }
 0x2ab   :  { %1103 = vmax.xlane.f32.xlu0 %v1102_v31 }
 0x2b4   :  { %869 = vrot.lane.b32.xlu1 %v2196_v22, %s2050_s16 }
 0x2b8   :  { %991 = vrot.lane.b32.xlu1 %v2200_v23, %s2051_s17 }
 0x2bc   :  { %1113 = vrot.lane.b32.xlu1 %v2204_v24, %s2052_s18 }
 0x2c1   :  { %753 = vrot.lane.b32.xlu0 %v2192_v21, %s2038_s2  ;;  %s2053_s2 = smov 8  }
 0x2ef   :  { %v259_v33 = vpop.xlane.xlu0 %258 }
 0x2f0   :  { %v260_v34 = vsub.f32 %v251_v49, %v259_v33 }
 0x2f2   :  { %v261_v35 = vmul.f32 1.442695, %v260_v34 }
 0x2f3   :  { %v510_v23 = vpop.permute.xlu0 %509 }
 0x2f4   :  { %1843 = vpow2.f32 %v261_v35  ;;  %v515_v42 = vsel %vm273_vm4, %v510_v23, 0 }
 0x2f7   :  { %v377_v36 = vpop.xlane.xlu1 %376 }
 0x2f8   :  { %v378_v37 = vsub.f32 %v369_v54, %v377_v36 }
 0x2fa   :  { %v379_v38 = vmul.f32 1.442695, %v378_v37 }
 0x2fb   :  { %v633_v46 = vpop.permute.xlu1 %632 }
 0x2fc   :  { %1845 = vpow2.f32 %v379_v38  ;;  %v638_v2 = vsel %vm273_vm4, %v633_v46, 0 }
 0x301   :  { %v1844_v39 = vpop.eup %1843 }
 0x302   :  { %v267_v22 = vpack.c.bf16 %v1844_v39, %v1844_v39  ;;  %v263_v9 = vsel %vm210_vm3, %v1844_v39, 0.0 }
 0x304   :  { %1683 = vmatmul.mubr.msk.bf16.vlgmr.msra.gmra.mxu0 %vm210_vm3, %v267_v22 }
 0x305   :  { %1693 = vmatpush3.bf16.msra.mxu0 %v392_v40  ;;  %1694 = vmatprep.mubr.msk.bf16.mxu0 %vm2042_vm1, %v2041_v0 }
 0x306   :  { %1704 = vmatprep.subr.bf16.mxu0 %v2041_v0 }
 0x309   :  { %v1846_v21 = vpop.eup %1845 }
 0x30a   :  { %v381_v24 = vsel %vm210_vm3, %v1846_v21, 0.0  ;;  %v385_v41 = vpack.c.bf16 %v1846_v21, %v1846_v21 }
 0x30b   :  { %382 = vadd.xlane.f32.xlu1 %v381_v24 }
 0x30c   :  { %1695 = vmatmul.mubr.msk.bf16.vlgmr.msra.gmra.mxu0 %vm210_vm3, %v385_v41 }
 0x30d   :  { %1705 = vmatpush3.bf16.msra.mxu0 %v515_v42  ;;  %1706 = vmatprep.mubr.msk.bf16.mxu0 %vm2042_vm1, %v2041_v0 }
 0x30e   :  { %1716 = vmatprep.subr.bf16.mxu0 %v2041_v0 }
 0x324   :  { %v500_v43 = vpop.xlane.xlu0 %499 }
 0x325   :  { %v501_v44 = vsub.f32 %v2255_v59, %v500_v43 }
 0x327   :  { %v502_v45 = vmul.f32 1.442695, %v501_v44 }
 0x328   :  { %v623_v47 = vpop.xlane.xlu0 %622 }
 0x329   :  { %1847 = vpow2.f32 %v502_v45  ;;  %v624_v48 = vsub.f32 %v2257_v63, %v623_v47 }
 0x32b   :  { %v625_v49 = vmul.f32 1.442695, %v624_v48 }
 0x32c   :  { %v744_v50 = vpop.xlane.xlu0 %743  ;;  %v860_v51 = vpop.xlane.xlu1 %859 }
 0x32d   :  { %1849 = vpow2.f32 %v625_v49  ;;  %v861_v52 = vsub.f32 %v2265_v10, %v860_v51  ;;  %v745_v53 = vsub.f32 %v2263_v6, %v744_v50 }
 0x32f   :  { %v862_v54 = vmul.f32 1.442695, %v861_v52  ;;  %v746_v57 = vmul.f32 1.442695, %v745_v53 }
 0x330   :  { %v982_v55 = vpop.xlane.xlu0 %981  ;;  %v870_v17 = vpop.permute.xlu1 %869 }
 0x331   :  { %v983_v56 = vsub.f32 %v2267_v14, %v982_v55  ;;  %1851 = vpow2.f32 %v862_v54  ;;  %v875_v20 = vsel %vm273_vm4, %v870_v17, 0 }
 0x333   :  { %v984_v58 = vmul.f32 1.442695, %v983_v56 }
 0x334   :  { %v1104_v59 = vpop.xlane.xlu0 %1103  ;;  %v992_v26 = vpop.permute.xlu1 %991 }
 0x335   :  { %1853 = vpow2.f32 %v984_v58  ;;  %v1105_v60 = vsub.f32 %v2271_v19, %v1104_v59  ;;  %v997_v28 = vsel %vm273_vm4, %v992_v26, 0 }
 0x336   :  { %v1848_v61 = vpop.eup %1847  ;;  %1855 = vpow2.f32 %v746_v57 }
 0x337   :  { %v1106_v62 = vmul.f32 1.442695, %v1105_v60  ;;  %v504_v63 = vsel %vm210_vm3, %v1848_v61, 0.0  ;;  %v508_v1 = vpack.c.bf16 %v1848_v61, %v1848_v61 }
 0x338   :  { %505 = vadd.xlane.f32.xlu1 %v504_v63  ;;  %v754_v7 = vpop.permute.xlu0 %753  ;;  %v1114_v29 = vpop.permute.xlu1 %1113 }
 0x339   :  { %1857 = vpow2.f32 %v1106_v62  ;;  %1707 = vmatmul.mubr.msk.bf16.vlgmr.msra.gmra.mxu0 %vm210_vm3, %v508_v1  ;;  %v759_v12 = vsel %vm273_vm4, %v754_v7, 0  ;;  %v1119_v31 = vsel %vm273_vm4, %v1114_v29, 0 }
 0x33a   :  { %v1850_v5 = vpop.eup %1849  ;;  %1717 = vmatpush3.bf16.msra.mxu0 %v638_v2  ;;  %1718 = vmatprep.mubr.msk.bf16.mxu0 %vm2042_vm1, %v2041_v0 }
 0x33b   :  { %v627_v6 = vsel %vm210_vm3, %v1850_v5, 0.0  ;;  %1728 = vmatprep.subr.bf16.mxu0 %v2041_v0  ;;  %v631_v10 = vpack.c.bf16 %v1850_v5, %v1850_v5 }
 0x33c   :  { %628 = vadd.xlane.f32.xlu1 %v627_v6 }
 0x33e   :  { %v1852_v8 = vpop.eup %1851 }
 0x33f   :  { %v864_v11 = vsel %vm210_vm3, %v1852_v8, 0.0  ;;  %v868_v27 = vpack.c.bf16 %v1852_v8, %v1852_v8 }
 0x340   :  { %264 = vadd.xlane.f32.xlu1 %v263_v9  ;;  %865 = vadd.xlane.f32.xlu0 %v864_v11 }
 0x341   :  { %1719 = vmatmul.mubr.msk.bf16.vlgmr.msra.gmra.mxu0 %vm210_vm3, %v631_v10 }
 0x342   :  { %v1854_v13 = vpop.eup %1853  ;;  %1729 = vmatpush3.bf16.msra.mxu0 %v759_v12  ;;  %1730 = vmatprep.mubr.msk.bf16.mxu0 %vm2042_vm1, %v2041_v0 }
 0x343   :  { %v986_v14 = vsel %vm210_vm3, %v1854_v13, 0.0  ;;  %1740 = vmatprep.subr.bf16.mxu0 %v2041_v0  ;;  %v1856_v15 = vpop.eup %1855  ;;  %v990_v30 = vpack.c.bf16 %v1854_v13, %v1854_v13 }
 0x344   :  { %987 = vadd.xlane.f32.xlu0 %v986_v14  ;;  %v752_v19 = vpack.c.bf16 %v1856_v15, %v1856_v15  ;;  %v748_v25 = vsel %vm210_vm3, %v1856_v15, 0.0 }
 0x346   :  { %v1858_v16 = vpop.eup %1857 }
 0x347   :  { %v1108_v18 = vsel %vm210_vm3, %v1858_v16, 0.0  ;;  %v1112_v32 = vpack.c.bf16 %v1858_v16, %v1858_v16 }
 0x348   :  { %1109 = vadd.xlane.f32.xlu0 %v1108_v18 }
 0x349   :  { %1731 = vmatmul.mubr.msk.bf16.vlgmr.msra.gmra.mxu0 %vm210_vm3, %v752_v19 }
 0x34a   :  { %1741 = vmatpush3.bf16.msra.mxu0 %v875_v20  ;;  %1742 = vmatprep.mubr.msk.bf16.mxu0 %vm2042_vm1, %v2041_v0  ;;  %v1833_v20 = vld [vmem:[%s2409_s3 + $0x8] sm:$0xff]  }
 0x34b   :  { %1752 = vmatprep.subr.bf16.mxu0 %v2041_v0  ;;  %1771 = vmatpush3.bf16.msra.mxu1 %v1833_v20 }
 0x34c   :  { %749 = vadd.xlane.f32.xlu0 %v748_v25  ;;  %1772 = vmatprep.subr.bf16.mxu1 %v2041_v0 }
 0x351   :  { %1743 = vmatmul.mubr.msk.bf16.vlgmr.msra.gmra.mxu0 %vm210_vm3, %v868_v27  ;;  %v1834_v27 = vld [vmem:[%s2409_s3] sm:$0xff]  }
 0x352   :  { %1753 = vmatpush3.bf16.msra.mxu0 %v997_v28  ;;  %1754 = vmatprep.mubr.msk.bf16.mxu0 %vm2042_vm1, %v2041_v0 }
 0x353   :  { %1764 = vmatprep.subr.bf16.mxu0 %v2041_v0  ;;  %1773 = vmatpush3.bf16.msra.mxu1 %v1834_v27  ;;  %v1842_v27 = vld [vmem:[%s2415_s9] sm:$0xff]  }
 0x354   :  { %1786 = vmatprep.subr.bf16.mxu1 %v2041_v0 }
 0x359   :  { %1755 = vmatmul.mubr.msk.bf16.vlgmr.msra.gmra.mxu0 %vm210_vm3, %v990_v30 }
 0x35a   :  { %1765 = vmatpush3.bf16.msra.mxu0 %v1119_v31  ;;  %1766 = vmatprep.mubr.msk.bf16.mxu0 %vm2042_vm1, %v2041_v0 }
 0x35b   :  { %1778 = vmatprep.subr.bf16.mxu0 %v2041_v0 }
 0x361   :  { %1767 = vmatmul.mubr.msk.bf16.vlgmr.msra.gmra.mxu0 %vm210_vm3, %v1112_v32 }
 0x362   :  { %1782 = vmatprep.mubr.msk.bf16.mxu0 %vm2042_vm1, %v2041_v0 }
 0x394   :  { %v383_v33 = vpop.xlane.xlu1 %382 }
 0x395   :  { %1859 = vrcp.f32 %v383_v33 }
 0x3a2   :  { %v1860_v40 = vpop.eup %1859 }
 0x3c1   :  { %v506_v34 = vpop.xlane.xlu1 %505 }
 0x3c4   :  { %v311_v35 = vpop.f32.mrf.mxu0 }
 0x3c5   :  { %v629_v36 = vpop.xlane.xlu1 %628 }
 0x3c6   :  { %v1684_v37 = vpop.f32.mrf.mxu0 }
 0x3c8   :  { %v314_v38 = vpop.f32.mrf.mxu0 }
 0x3c9   :  { %v265_v39 = vpop.xlane.xlu1 %264  ;;  %v866_v47 = vpop.xlane.xlu0 %865 }
 0x3ca   :  { %1861 = vrcp.f32 %v265_v39  ;;  %v1685_v22 = vpop.f32.mrf.mxu0 }
 0x3cb   :  { %1863 = vrcp.f32 %v506_v34 }
 0x3cc   :  { %v428_v21 = vpop.f32.mrf.mxu0 }
 0x3cd   :  { %v434_v23 = vmul.f32 %v1860_v40, %v428_v21  ;;  %v988_v48 = vpop.xlane.xlu0 %987 }
 0x3ce   :  { %v1696_v24 = vpop.f32.mrf.mxu0 }
 0x3cf   :  { %v1612_v41 = vpack.c.bf16 %v434_v23, %v434_v23 }
 0x3d0   :  { %v431_v42 = vpop.f32.mrf.mxu0 }
 0x3d1   :  { %439 = vrot.lane.b32.xlu1 %v1612_v41, %s2053_s2  ;;  %v1110_v49 = vpop.xlane.xlu0 %1109  ;;  %v1588_v41 = vld [vmem:[#allocation10] ss:$0 sm:$0xff] }
 0x3d2   :  { %v1697_v43 = vpop.f32.mrf.mxu0 }
 0x3d5   :  { %v750_v51 = vpop.xlane.xlu0 %749 }
 0x3d6   :  { %1865 = vrcp.f32 %v750_v51 }
 0x3d7   :  { %v1862_v44 = vpop.eup %1861  ;;  %1867 = vrcp.f32 %v866_v47 }
 0x3d8   :  { %v317_v45 = vmul.f32 %v1862_v44, %v311_v35  ;;  %v1864_v50 = vpop.eup %1863  ;;  %1869 = vrcp.f32 %v629_v36 }
 0x3d9   :  { %1871 = vrcp.f32 %v988_v48 }
 0x3da   :  { %v318_v46 = vpack.c.bf16 %v317_v45, %v317_v45  ;;  %1873 = vrcp.f32 %v1110_v49 }
 0x3dc   :  { %320 = vst.msk [vmem:[#allocation3] sm:$0xf] %vm319_vm5, %v318_v46 }
 0x3e3   :  { %v1866_v62 = vpop.eup %1865 }
 0x3e4   :  { %v1868_v8 = vpop.eup %1867 }
 0x3e5   :  { %v1870_v11 = vpop.eup %1869 }
 0x3e6   :  { %v1872_v18 = vpop.eup %1871 }
 0x3e7   :  { %v1874_v31 = vpop.eup %1873 }
 0x3f9   :  { %v551_v52 = vpop.f32.mrf.mxu0 }
 0x3fa   :  { %v557_v53 = vmul.f32 %v1864_v50, %v551_v52 }
 0x3fb   :  { %v1708_v54 = vpop.f32.mrf.mxu0 }
 0x3fc   :  { %v1613_v55 = vpack.c.bf16 %v557_v53, %v557_v53 }
 0x3fd   :  { %v554_v56 = vpop.f32.mrf.mxu0 }
 0x3fe   :  { %562 = vrot.lane.b32.xlu1 %v1613_v55, %s2054_s19 }
 0x3ff   :  { %v1709_v57 = vpop.f32.mrf.mxu0 }
 0x401   :  { %v674_v58 = vpop.f32.mrf.mxu0 }
 0x402   :  { %v680_v13 = vmul.f32 %v1870_v11, %v674_v58  ;;  %v1594_v11 = vld [vmem:[#allocation13] ss:$0 sm:$0xff] }
 0x403   :  { %v1720_v59 = vpop.f32.mrf.mxu0 }
 0x404   :  { %v1614_v17 = vpack.c.bf16 %v680_v13, %v680_v13 }
 0x405   :  { %v677_v60 = vpop.f32.mrf.mxu0 }
 0x407   :  { %v1721_v61 = vpop.f32.mrf.mxu0 }
 0x408   :  { %v1836_v61 = vld [vmem:[#allocation15 + $0x8] sm:$0xff]  }
 0x409   :  { %v795_v63 = vpop.f32.mrf.mxu0  ;;  %1779 = vmatpush3.bf16.msra.mxu0 %v1836_v61 }
 0x40a   :  { %v801_v1 = vmul.f32 %v1866_v62, %v795_v63  ;;  %1780 = vmatprep.subr.bf16.mxu0 %v2041_v0  ;;  %v1839_v62 = vld [vmem:[%s2415_s9 + $0x18] sm:$0xff]  }
 0x40b   :  { %v1732_v2 = vpop.f32.mrf.mxu0 }
 0x40c   :  { %v802_v5 = vpack.c.bf16 %v801_v1, %v801_v1 }
 0x40d   :  { %v798_v6 = vpop.f32.mrf.mxu0 }
 0x40e   :  { %803 = vst.msk [vmem:[#allocation3 + $0x4] sm:$0xf] %vm319_vm5, %v802_v5 }
 0x40f   :  { %v1733_v7 = vpop.f32.mrf.mxu0 }
 0x411   :  { %v911_v9 = vpop.f32.mrf.mxu0 }
 0x412   :  { %v917_v10 = vmul.f32 %v1868_v8, %v911_v9  ;;  %v1593_v9 = vld [vmem:[#allocation12] ss:$0 sm:$0xff] }
 0x413   :  { %v1744_v12 = vpop.f32.mrf.mxu0 }
 0x414   :  { %v1615_v14 = vpack.c.bf16 %v917_v10, %v917_v10 }
 0x415   :  { %v914_v15 = vpop.f32.mrf.mxu0 }
 0x416   :  { %922 = vrot.lane.b32.xlu0 %v1615_v14, %s2053_s2 }
 0x417   :  { %v1745_v16 = vpop.f32.mrf.mxu0 }
 0x419   :  { %v1033_v19 = vpop.f32.mrf.mxu0 }
 0x41a   :  { %v1039_v25 = vmul.f32 %v1872_v18, %v1033_v19  ;;  %685 = vrot.lane.b32.xlu0 %v1614_v17, %s2055_s21 }
 0x41b   :  { %v1756_v26 = vpop.f32.mrf.mxu0 }
 0x41c   :  { %v1616_v28 = vpack.c.bf16 %v1039_v25, %v1039_v25  ;;  %v1840_v25 = vld [vmem:[%s2415_s9 + $0x10] sm:$0xff]   ;;  %v1841_v26 = vld [vmem:[%s2415_s9 + $0x8] sm:$0xff]  }
 0x41d   :  { %v1036_v29 = vpop.f32.mrf.mxu0 }
 0x41e   :  { %1044 = vrot.lane.b32.xlu1 %v1616_v28, %s2054_s19  ;;  %v1597_v28 = vld [vmem:[#allocation16] ss:$0 sm:$0xff] }
 0x41f   :  { %v1757_v30 = vpop.f32.mrf.mxu0 }
 0x421   :  { %v1155_v32 = vpop.f32.mrf.mxu0 }
 0x422   :  { %v1161_v33 = vmul.f32 %v1874_v31, %v1155_v32 }
 0x423   :  { %v1768_v34 = vpop.f32.mrf.mxu0 }
 0x424   :  { %v1617_v35 = vpack.c.bf16 %v1161_v33, %v1161_v33 }
 0x425   :  { %v1158_v36 = vpop.f32.mrf.mxu0 }
 0x426   :  { %1166 = vrot.lane.b32.xlu1 %v1617_v35, %s2055_s21 }
 0x427   :  { %v1769_v37 = vpop.f32.mrf.mxu0 }
 0x443   :  { %v440_v38 = vpop.permute.xlu1 %439 }
 0x444   :  { %443 = vst.msk [vmem:[#allocation3] sm:$0xf] %vm442_vm6, %v440_v38  ;;  %v1383_v38 = vld [vmem:[#allocation6] sm:$0xff] }
 0x470   :  { %v563_v39 = vpop.permute.xlu1 %562 }
 0x471   :  { %566 = vst.msk [vmem:[#allocation3] sm:$0xf] %vm565_vm7, %v563_v39 }
 0x488   :  { %v923_v22 = vpop.permute.xlu0 %922 }
 0x489   :  { %925 = vst.msk [vmem:[#allocation3 + $0x4] sm:$0xf] %vm442_vm6, %v923_v22 }
 0x48c   :  { %v686_v40 = vpop.permute.xlu0 %685 }
 0x48d   :  { %689 = vst.msk [vmem:[#allocation3] sm:$0xf] %vm688_vm8, %v686_v40  ;;  %v1384_v40 = vld [vmem:[#allocation6 + $0x8] sm:$0xff] }
 0x490   :  { %v1045_v21 = vpop.permute.xlu1 %1044 }
 0x491   :  { %1047 = vst.msk [vmem:[#allocation3 + $0x4] sm:$0xf] %vm565_vm7, %v1045_v21 }
 0x498   :  { %v1167_v23 = vpop.permute.xlu1 %1166 }
 0x499   :  { %1169 = vst.msk [vmem:[#allocation3 + $0x4] sm:$0xf] %vm688_vm8, %v1167_v23 }
 0x4a0   :  { %v1835_v24 = vld [vmem:[#allocation3] sm:$0xff]  }
 0x4a1   :  { %1775 = vmatmul.mubr.msk.bf16.vlgmr.msra.gmra.mxu1 %vm148_vm0, %v1835_v24 }
 0x4a2   :  { %1794 = vmatprep.mubr.msk.bf16.mxu1 %vm2042_vm1, %v2041_v0  ;;  %1787 = vmatpush3.bf16.msra.mxu1 %v1839_v62 }
 0x4a3   :  { %1788 = vmatprep.subr.bf16.mxu1 %v2041_v0 }
 0x4a6   :  { %1789 = vmatpush3.bf16.msra.mxu1 %v1840_v25 }
 0x4a7   :  { %1790 = vmatprep.subr.bf16.mxu1 %v2041_v0 }
 0x4aa   :  { %1791 = vmatpush3.bf16.msra.mxu1 %v1841_v26 }
 0x4ab   :  { %1792 = vmatprep.subr.bf16.mxu1 %v2041_v0 }
 0x4ae   :  { %1793 = vmatpush3.bf16.msra.mxu1 %v1842_v27 }
 0x561   :  { %v1237_v42 = vpop.f32.mrf.mxu1 }
 0x562   :  { %v1238_v43 = vadd.f32 %v1588_v41, %v1237_v42 }
 0x563   :  { %v1776_v44 = vpop.f32.mrf.mxu1 }
 0x564   :  { %v1244_v45 = vadd.f32 %v1238_v43, %v2167_v3 }
 0x565   :  { %v1240_v46 = vpop.f32.mrf.mxu1 }
 0x566   :  { %v1241_v47 = vadd.f32 %v1588_v41, %v1240_v46  ;;  %v1248_v48 = vsel %vm148_vm0, %v1244_v45, 0.0  ;;  %v1607_v41 = vld [vmem:[%s2416_s10] ss:$0 sm:$0xff] }
 0x567   :  { %1249 = vadd.xlane.f32.xlu0 %v1248_v48  ;;  %v1777_v49 = vpop.f32.mrf.mxu1 }
 0x568   :  { %v1245_v50 = vadd.f32 %v1241_v47, %v2172_v4  ;;  %v1837_v4 = vld [vmem:[#allocation15] sm:$0xff]  }
 0x569   :  { %1781 = vmatpush3.bf16.msra.mxu0 %v1837_v4 }
 0x56a   :  { %v1251_v51 = vsel %vm148_vm0, %v1245_v50, 0.0 }
 0x56b   :  { %1252 = vadd.xlane.f32.xlu1 %v1251_v51 }
 0x5f0   :  { %v1250_v52 = vpop.xlane.xlu0 %1249 }
 0x5f1   :  { %v1255_v53 = vmul.f32 0.03125, %v1250_v52 }
 0x5f3   :  { %v1257_v54 = vsub.f32 %v1244_v45, %v1255_v53 }
 0x5f4   :  { %v1253_v55 = vpop.xlane.xlu1 %1252 }
 0x5f5   :  { %v1256_v56 = vmul.f32 0.03125, %v1253_v55  ;;  %v1259_v57 = vmul.f32 %v1257_v54, %v1257_v54 }
 0x5f7   :  { %v1258_v58 = vsub.f32 %v1245_v50, %v1256_v56  ;;  %v1261_v3 = vsel %vm148_vm0, %v1259_v57, 0.0 }
 0x5f8   :  { %1262 = vadd.xlane.f32.xlu0 %v1261_v3 }
 0x5f9   :  { %v1260_v59 = vmul.f32 %v1258_v58, %v1258_v58 }
 0x5fb   :  { %v1264_v60 = vsel %vm148_vm0, %v1260_v59, 0.0 }
 0x5fc   :  { %1265 = vadd.xlane.f32.xlu0 %v1264_v60 }
 0x681   :  { %v1263_v63 = vpop.xlane.xlu0 %1262 }
 0x682   :  { %v1267_v1 = vmul.f32 0.03125, %v1263_v63 }
 0x684   :  { %v1269_v2 = vadd.f32 1e-05, %v1267_v1 }
 0x685   :  { %v1266_v5 = vpop.xlane.xlu0 %1265 }
 0x686   :  { %1875 = vrsqrt.f32 %v1269_v2  ;;  %v1268_v6 = vmul.f32 0.03125, %v1266_v5 }
 0x688   :  { %v1270_v7 = vadd.f32 1e-05, %v1268_v6  ;;  %v1608_v6 = vld [vmem:[%s2417_s11] ss:$0 sm:$0xff] }
 0x68a   :  { %1877 = vrsqrt.f32 %v1270_v7 }
 0x693   :  { %v1876_v8 = vpop.eup %1875 }
 0x694   :  { %v1273_v10 = vmul.f32 %v1876_v8, %v1257_v54  ;;  %v1609_v8 = vld [vmem:[%s2418_s12] ss:$0 sm:$0xff] }
 0x696   :  { %v1281_v12 = vmul.f32 %v1593_v9, %v1273_v10 }
 0x697   :  { %v1878_v13 = vpop.eup %1877 }
 0x698   :  { %v1289_v14 = vadd.f32 %v1594_v11, %v1281_v12  ;;  %v1274_v15 = vmul.f32 %v1878_v13, %v1258_v58 }
 0x69a   :  { %1291 = vst.msk [vmem:[#allocation4] sm:$0xff] %vm148_vm0, %v1289_v14  ;;  %v1618_v16 = vpack.c.bf16 %v1289_v14, %v1289_v14  ;;  %v1282_v17 = vmul.f32 %v1593_v9, %v1274_v15 }
 0x69c   :  { %1302 = vst.msk [vmem:[#allocation5] sm:$0xf] %vm1301_vm9, %v1618_v16  ;;  %v1290_v18 = vadd.f32 %v1594_v11, %v1282_v17 }
 0x69e   :  { %1292 = vst.msk [vmem:[#allocation4 + $0x8] sm:$0xff] %vm148_vm0, %v1290_v18  ;;  %v1619_v19 = vpack.c.bf16 %v1290_v18, %v1290_v18 }
 0x6a0   :  { %1303 = vst.msk [vmem:[#allocation5 + $0x4] sm:$0xf] %vm1301_vm9, %v1619_v19 }
 0x6a1   :  { %v1481_v44 = vld [vmem:[#allocation4] sm:$0xff] }
 0x6a5   :  { %v1482_v49 = vld [vmem:[#allocation4 + $0x8] sm:$0xff] }
 0x6a7   :  { %v1838_v20 = vld [vmem:[#allocation5] sm:$0xff]  }
 0x6a8   :  { %1783 = vmatmul.mubr.msk.bf16.vlgmr.msra.gmra.mxu0 %vm148_vm0, %v1838_v20 }
 0x768   :  { %v1374_v29 = vpop.f32.mrf.mxu0 }
 0x769   :  { %v1375_v31 = vadd.f32 %v1597_v28, %v1374_v29 }
 0x76a   :  { %v1784_v30 = vpop.f32.mrf.mxu0 }
 0x76b   :  { %v1381_v35 = vmax.f32 %v1375_v31, 0.0 }
 0x76c   :  { %v1377_v32 = vpop.f32.mrf.mxu0 }
 0x76d   :  { %v1378_v33 = vadd.f32 %v1597_v28, %v1377_v32 }
 0x76e   :  { %v1785_v34 = vpop.f32.mrf.mxu0 }
 0x76f   :  { %v1382_v36 = vmax.f32 %v1378_v33, 0.0 }
 0x771   :  { %v1385_v37 = vpack.c.bf16 %v1382_v36, %v1381_v35 }
 0x773   :  { %1795 = vmatmul.mubr.msk.bf16.vlgmr.msra.gmra.mxu1 %vm1418_vm10, %v1385_v37 }
 0x833   :  { %v1456_v39 = vpop.f32.mrf.mxu1 }
 0x834   :  { %v1463_v0 = vadd.f32 %v1456_v39, %v1383_v38 }
 0x835   :  { %v1796_v22 = vpop.f32.mrf.mxu1 }
 0x836   :  { %1465 = vst.msk [vmem:[#allocation6] sm:$0xff] %vm148_vm0, %v1463_v0 }
 0x837   :  { %v1459_v21 = vpop.f32.mrf.mxu1 }
 0x838   :  { %v1464_v23 = vadd.f32 %v1459_v21, %v1384_v40 }
 0x839   :  { %v1797_v24 = vpop.f32.mrf.mxu1 }
 0x83a   :  { %1466 = vst.msk [vmem:[#allocation6 + $0x8] sm:$0xff] %vm148_vm0, %v1464_v23 }
 0x83d   :  { %v1470_v42 = vld [vmem:[#allocation6] sm:$0xff] }
 0x83e   :  { %v1479_v43 = vadd.f32 %v1607_v41, %v1470_v42 }
 0x840   :  { %v1483_v45 = vadd.f32 %v1481_v44, %v1479_v43 }
 0x841   :  { %v1471_v46 = vld [vmem:[#allocation6 + $0x8] sm:$0xff] }
 0x842   :  { %v1487_v47 = vsel %vm148_vm0, %v1483_v45, 0.0  ;;  %v1480_v48 = vadd.f32 %v1607_v41, %v1471_v46 }
 0x843   :  { %1488 = vadd.xlane.f32.xlu1 %v1487_v47 }
 0x844   :  { %v1484_v50 = vadd.f32 %v1482_v49, %v1480_v48 }
 0x846   :  { %v1490_v51 = vsel %vm148_vm0, %v1484_v50, 0.0 }
 0x847   :  { %1491 = vadd.xlane.f32.xlu0 %v1490_v51 }
 0x8cc   :  { %v1489_v52 = vpop.xlane.xlu1 %1488 }
 0x8cd   :  { %v1494_v53 = vmul.f32 0.03125, %v1489_v52 }
 0x8cf   :  { %v1496_v54 = vsub.f32 %v1483_v45, %v1494_v53 }
 0x8d0   :  { %v1492_v55 = vpop.xlane.xlu0 %1491 }
 0x8d1   :  { %v1495_v56 = vmul.f32 0.03125, %v1492_v55  ;;  %v1498_v57 = vmul.f32 %v1496_v54, %v1496_v54 }
 0x8d3   :  { %v1497_v58 = vsub.f32 %v1484_v50, %v1495_v56  ;;  %v1500_v3 = vsel %vm148_vm0, %v1498_v57, 0.0 }
 0x8d4   :  { %1501 = vadd.xlane.f32.xlu1 %v1500_v3 }
 0x8d5   :  { %v1499_v59 = vmul.f32 %v1497_v58, %v1497_v58 }
 0x8d7   :  { %v1503_v60 = vsel %vm148_vm0, %v1499_v59, 0.0 }
 0x8d8   :  { %1504 = vadd.xlane.f32.xlu0 %v1503_v60 }
 0x95d   :  { %v1502_v61 = vpop.xlane.xlu1 %1501 }
 0x95e   :  { %v1506_v4 = vmul.f32 0.03125, %v1502_v61 }
 0x960   :  { %v1508_v62 = vadd.f32 1e-05, %v1506_v4 }
 0x961   :  { %v1505_v63 = vpop.xlane.xlu0 %1504 }
 0x962   :  { %1879 = vrsqrt.f32 %v1508_v62  ;;  %v1507_v1 = vmul.f32 0.03125, %v1505_v63 }
 0x964   :  { %v1509_v2 = vadd.f32 1e-05, %v1507_v1 }
 0x966   :  { %1881 = vrsqrt.f32 %v1509_v2 }
 0x96f   :  { %v1880_v5 = vpop.eup %1879 }
 0x970   :  { %v1512_v7 = vmul.f32 %v1880_v5, %v1496_v54 }
 0x972   :  { %v1520_v9 = vmul.f32 %v1608_v6, %v1512_v7 }
 0x973   :  { %v1882_v10 = vpop.eup %1881 }
 0x974   :  { %v1513_v11 = vmul.f32 %v1882_v10, %v1497_v58  ;;  %v1528_v12 = vadd.f32 %v1609_v8, %v1520_v9 }
 0x976   :  { %v1521_v13 = vmul.f32 %v1608_v6, %v1513_v11  ;;  %1530 = vst.msk [vmem:[#allocation18] sm:$0xff] %vm148_vm0, %v1528_v12 }
 0x978   :  { %v1529_v14 = vadd.f32 %v1609_v8, %v1521_v13 }
 0x97a   :  { %1531 = vst.msk [vmem:[#allocation18 + $0x8] sm:$0xff] %vm148_vm0, %v1529_v14 }
 0x97b   :  { %2014 = shalt.err (!%p2011_p6)
}
 0x97c   :  { %s2057_s11 = smov 128  }
 0x97d   :  { %1543 = dma.vmem_to_hbm [thread:$0]  %s1538_s30, 256, %s2419_s13, [#allocation9], %s2057_s11, %s2057_s11, %s2053_s2  }
 0x97e   :  { %2031 = dma.done.wait [#allocation9], 256  }
 0x97f   :  { %2032 = vsyncadd [#allocation9], 4294967040 }
 0x980   :  { %1547 = vsyncpa [#allocation8], 1 }
 0x981   :  { %1548 = vsyncpa [#allocation11], 1 }
 0x982   :  { %1549 = vsyncpa [#allocation14], 1 }
 0x983   :  { %1550 = vsyncpa [#allocation17], 1 }
 0x984   :  { %1551 = vsyncpa [#allocation9], 1 }

</bundles_post_ra>
